<compile_context>
chip_gen: v7x
topology: tpu7x:2x2x1
jax: 0.10.0
libtpu: 0.0.40
codegen_flags: <defaults>
</compile_context>

<pallas_src>
import functools

import jax
import jax.numpy as jnp
from jax import lax
from jax.experimental import pallas as pl
from jax.experimental.pallas import tpu as pltpu

LANE = 128
VMEM_LIMIT = 32 * 1024 * 1024  # explicit scoped-VMEM budget (safe on v5e/v6e/v7x)


def _round_up(x, m):
    return ((x + m - 1) // m) * m


def _pad_last(a, target):
    pad = target - a.shape[-1]
    if pad <= 0:
        return a
    return jnp.pad(a, [(0, 0)] * (a.ndim - 1) + [(0, pad)])


def _pick_tile(n, candidates=(256, 128)):
    for t in candidates:
        if n % t == 0:
            return t
    return n  # small graphs: whole dimension (== full array dim, still legal)


# --------------------------------------------------------------------------- #
# Kernels
# --------------------------------------------------------------------------- #
def _project_kernel(h_ref, ns_ref, w_ref, p_ref):
    """p = (h * norm_src) @ W   — src-side norm folded into features (f32 math),
    result stored lane-dense in bf16 as the operand of the big aggregation matmul."""
    h_scaled = h_ref[...] * ns_ref[...]                       # (TM, Fin) f32, VPU
    p = jnp.dot(h_scaled, w_ref[...],
                preferred_element_type=jnp.float32)           # (TM, Fp)  MXU
    p_ref[...] = p.astype(p_ref.dtype)                        # bf16 store, 128-lane dense


def _aggregate_kernel(a_ref, p_ref, nd_ref, b_ref, o_ref, acc_ref, *, apply_relu):
    """acc += A[i,k] @ p[k];  at last k:  o = norm_dst * acc + b  (opt. relu)."""
    k = pl.program_id(1)

    @pl.when(k == 0)
    def _():
        acc_ref[...] = jnp.zeros_like(acc_ref)

    # bf16 x bf16 MXU matmul, f32 accumulation
    acc_ref[...] += jnp.dot(a_ref[...], p_ref[...],
                            preferred_element_type=jnp.float32)

    @pl.when(k == pl.num_programs(1) - 1)
    def _():
        out = acc_ref[...] * nd_ref[...] + b_ref[...]         # dst-side norm + bias, f32
        if apply_relu:
            out = jnp.maximum(out, 0.0)
        o_ref[...] = out.astype(o_ref.dtype)                  # lane-dense (TM, 128) store


# --------------------------------------------------------------------------- #
# One GraphConv layer (norm='both'): two pipelined pallas_calls
# --------------------------------------------------------------------------- #
def _graph_conv_layer(adj_bf16, norm_src, norm_dst, h, w, b, *, apply_relu):
    n = adj_bf16.shape[0]
    fin = h.shape[1]
    fout = w.shape[1]
    fp = _round_up(fout, LANE)                                # lane-dense padded width

    w_pad = _pad_last(w.astype(jnp.float32), fp)              # (Fin, Fp)
    b_pad = _pad_last(b.astype(jnp.float32).reshape(1, -1), fp)  # (1, Fp)

    tm = _pick_tile(n)
    tk = _pick_tile(n)

    # ---- pass 1: src-scale + dense projection ----
    proj = pl.pallas_call(
        _project_kernel,
        out_shape=jax.ShapeDtypeStruct((n, fp), jnp.bfloat16),
        grid_spec=pltpu.PrefetchScalarGridSpec(
            num_scalar_prefetch=0,
            grid=(n // tm,),
            in_specs=[
                pl.BlockSpec((tm, fin), lambda i: (i, 0)),    # h tile
                pl.BlockSpec((tm, 1), lambda i: (i, 0)),      # norm_src tile
                pl.BlockSpec((fin, fp), lambda i: (0, 0)),    # W resident
            ],
            out_specs=pl.BlockSpec((tm, fp), lambda i: (i, 0)),
        ),
        compiler_params=pltpu.CompilerParams(
            dimension_semantics=("parallel",),
            vmem_limit_bytes=VMEM_LIMIT,
        ),
    )(h, norm_src, w_pad)

    # ---- pass 2: tiled aggregation  o = norm_dst * (A @ proj) + b ----
    out = pl.pallas_call(
        functools.partial(_aggregate_kernel, apply_relu=apply_relu),
        out_shape=jax.ShapeDtypeStruct((n, fp), jnp.float32),
        grid_spec=pltpu.PrefetchScalarGridSpec(
            num_scalar_prefetch=0,
            grid=(n // tm, n // tk),                          # (dst tiles, src blocks)
            in_specs=[
                pl.BlockSpec((tm, tk), lambda i, k: (i, k)),  # A tile (bf16)
                pl.BlockSpec((tk, fp), lambda i, k: (k, 0)),  # projected src feats (bf16)
                pl.BlockSpec((tm, 1), lambda i, k: (i, 0)),   # norm_dst tile
                pl.BlockSpec((1, fp), lambda i, k: (0, 0)),   # bias resident
            ],
            out_specs=pl.BlockSpec((tm, fp), lambda i, k: (i, 0)),
            scratch_shapes=[pltpu.VMEM((tm, fp), jnp.float32)],
        ),
        compiler_params=pltpu.CompilerParams(
            dimension_semantics=("parallel", "arbitrary"),
            vmem_limit_bytes=VMEM_LIMIT,
        ),
    )(adj_bf16, proj, norm_dst, b_pad)
    return out


# --------------------------------------------------------------------------- #
# Full GCNNodeClassifier forward
# --------------------------------------------------------------------------- #
@jax.jit
def gcn_node_classifier_forward(adj, feats, w1, b1, w2, b2):
    """adj: dense (N_dst, N_src) with A[i, j] = 1.0 iff edge j -> i (f32 0/1)."""
    n_hidden = w1.shape[1]
    n_classes = w2.shape[1]

    # Degree normalization hoisted out of the kernels (computed once, XLA reduce).
    deg_in = jnp.sum(adj, axis=1, keepdims=True)              # (N, 1) dst in-degrees
    deg_out = jnp.sum(adj, axis=0, keepdims=True).T           # (N, 1) src out-degrees
    # zero-degree -> norm 0 (equivalent to DGL's clamp: those A rows/cols are all zero)
    norm_dst = jnp.where(deg_in > 0, lax.rsqrt(deg_in), 0.0).astype(jnp.float32)
    norm_src = jnp.where(deg_out > 0, lax.rsqrt(deg_out), 0.0).astype(jnp.float32)

    adj_bf16 = adj.astype(jnp.bfloat16)                       # exact (values are 0/1)

    # layer 0: GraphConv(in_feats -> n_hidden), relu
    h_pad = _graph_conv_layer(adj_bf16, norm_src, norm_dst, feats, w1, b1,
                              apply_relu=True)
    h = h_pad[:, :n_hidden]                                   # drop lane padding (zeros)

    # dropout(h): eval mode -> identity

    # layer 1: GraphConv(n_hidden -> n_classes)
    logits_pad = _graph_conv_layer(adj_bf16, norm_src, norm_dst, h, w2, b2,
                                   apply_relu=False)
    return logits_pad[:, :n_classes]


if __name__ == "__main__":
    # Small deterministic synthetic problem consistent with the module:
    #   N nodes, in_feats features, n_hidden=16, n_classes from labels (here 8).
    N, IN_FEATS, N_HIDDEN, N_CLASSES = 512, 32, 16, 8

    key = jax.random.PRNGKey(0)
    k_adj, k_x, k_w1, k_b1, k_w2, k_b2 = jax.random.split(key, 6)

    # Dense adjacency A[dst, src]: random sparse directed graph (some zero-degree nodes).
    adj = jax.random.bernoulli(k_adj, p=0.03, shape=(N, N)).astype(jnp.float32)

    feats = jax.random.normal(k_x, (N, IN_FEATS), dtype=jnp.float32)

    lim1 = (6.0 / (IN_FEATS + N_HIDDEN)) ** 0.5
    w1 = jax.random.uniform(k_w1, (IN_FEATS, N_HIDDEN), jnp.float32, -lim1, lim1)
    b1 = 0.1 * jax.random.normal(k_b1, (1, N_HIDDEN), dtype=jnp.float32)
    lim2 = (6.0 / (N_HIDDEN + N_CLASSES)) ** 0.5
    w2 = jax.random.uniform(k_w2, (N_HIDDEN, N_CLASSES), jnp.float32, -lim2, lim2)
    b2 = 0.1 * jax.random.normal(k_b2, (1, N_CLASSES), dtype=jnp.float32)

    logits = gcn_node_classifier_forward(adj, feats, w1, b1, w2, b2)
    jax.block_until_ready(logits)
    assert logits.shape == (N, N_CLASSES)

    # Pure-JAX f32 reference of the same math (high-precision matmuls).
    with jax.default_matmul_precision("highest"):
        deg_in = adj.sum(axis=1, keepdims=True)
        deg_out = adj.sum(axis=0, keepdims=True)
        nin = jnp.where(deg_in > 0, deg_in ** -0.5, 0.0)
        nout = jnp.where(deg_out > 0, deg_out ** -0.5, 0.0)
        a_hat = nin * adj * nout
        h_ref = jnp.maximum(jnp.dot(a_hat, jnp.dot(feats, w1)) + b1, 0.0)
        ref = jnp.dot(a_hat, jnp.dot(h_ref, w2)) + b2

    # bf16 MXU operands with f32 accumulation -> moderate tolerance vs f32 reference.
    max_err = float(jnp.max(jnp.abs(logits - ref)))
    assert jnp.allclose(logits, ref, atol=3e-2, rtol=3e-2), f"max_err={max_err}"

    print("KERNEL_OK")
</pallas_src>

<mosaic_0001>
module attributes {stable_mosaic.version = 11 : i64} {
  func.func @_project_kernel(%arg0: i32, %arg1: memref<256x32xf32, #tpu.memory_space<vmem>>, %arg2: memref<256x1xf32, #tpu.memory_space<vmem>>, %arg3: memref<32x128xf32, #tpu.memory_space<vmem>>, %arg4: memref<256x128xbf16, #tpu.memory_space<vmem>>) attributes {dimension_semantics = [#tpu.dimension_semantics<parallel>], iteration_bounds = array<i64: 2>, scalar_prefetch = 0 : i64, scratch_operands = 0 : i64, tpu.core_type = #tpu.core_type<tc>, window_params = [{transform_indices = @transform_0, window_bounds = array<i64: 256, 32>}, {transform_indices = @transform_1, window_bounds = array<i64: 256, 1>}, {pipeline_mode = #tpu.pipeline_mode<synchronous>, transform_indices = @transform_2, window_bounds = array<i64: 32, 128>}, {transform_indices = @transform_3, window_bounds = array<i64: 256, 128>}]} {
    %c0 = arith.constant 0 : index
    %c0_0 = arith.constant 0 : index
    %0 = vector.load %arg1[%c0, %c0_0] : memref<256x32xf32, #tpu.memory_space<vmem>>, vector<256x32xf32>
    %c0_1 = arith.constant 0 : index
    %c0_2 = arith.constant 0 : index
    %1 = vector.load %arg2[%c0_1, %c0_2] : memref<256x1xf32, #tpu.memory_space<vmem>>, vector<256x1xf32>
    %2 = vector.broadcast %1 : vector<256x1xf32> to vector<256x32xf32>
    %3 = arith.mulf %0, %2 : vector<256x32xf32>
    %c0_3 = arith.constant 0 : index
    %c0_4 = arith.constant 0 : index
    %4 = vector.load %arg3[%c0_3, %c0_4] : memref<32x128xf32, #tpu.memory_space<vmem>>, vector<32x128xf32>
    %cst = arith.constant dense<0.000000e+00> : vector<256x128xf32>
    %5 = tpu.matmul %3, %4, %cst {dimension_numbers = #tpu.dot_dimension_numbers<[1], [0], [0], [1], [0, 0, 1, 1], [], []>} : vector<256x32xf32>, vector<32x128xf32>, vector<256x128xf32> -> vector<256x128xf32>
    %6 = arith.truncf %5 : vector<256x128xf32> to vector<256x128xbf16>
    %c0_5 = arith.constant 0 : index
    %c0_6 = arith.constant 0 : index
    %7 = vector.load %arg4[%c0_5, %c0_6] : memref<256x128xbf16, #tpu.memory_space<vmem>>, vector<256x128xbf16>
    tpu.vector_store %arg4[%c0_5, %c0_6], %6 {strides = array<i32>} : memref<256x128xbf16, #tpu.memory_space<vmem>>, vector<256x128xbf16>,
    return
  }
  func.func @transform_0(%arg0: i32) -> (i32, i32) {
    %c0_i32 = arith.constant 0 : i32
    %c0_i32_0 = arith.constant 0 : i32
    return %arg0, %c0_i32 : i32, i32
  }
  func.func @transform_1(%arg0: i32) -> (i32, i32) {
    %c0_i32 = arith.constant 0 : i32
    %c0_i32_0 = arith.constant 0 : i32
    return %arg0, %c0_i32 : i32, i32
  }
  func.func @transform_2(%arg0: i32) -> (i32, i32) {
    %c0_i32 = arith.constant 0 : i32
    %c0_i32_0 = arith.constant 0 : i32
    %c0_i32_1 = arith.constant 0 : i32
    return %c0_i32, %c0_i32_0 : i32, i32
  }
  func.func @transform_3(%arg0: i32) -> (i32, i32) {
    %c0_i32 = arith.constant 0 : i32
    %c0_i32_0 = arith.constant 0 : i32
    return %arg0, %c0_i32 : i32, i32
  }
}

module attributes {stable_mosaic.version = 11 : i64} {
  func.func @_aggregate_kernel(%arg0: i32, %arg1: i32, %arg2: memref<256x256xbf16, #tpu.memory_space<vmem>>, %arg3: memref<256x128xbf16, #tpu.memory_space<vmem>>, %arg4: memref<256x1xf32, #tpu.memory_space<vmem>>, %arg5: memref<1x128xf32, #tpu.memory_space<vmem>>, %arg6: memref<256x128xf32, #tpu.memory_space<vmem>>, %arg7: memref<256x128xf32, #tpu.memory_space<vmem>>) attributes {dimension_semantics = [#tpu.dimension_semantics<parallel>, #tpu.dimension_semantics<arbitrary>], iteration_bounds = array<i64: 2, 2>, scalar_prefetch = 0 : i64, scratch_operands = 1 : i64, tpu.core_type = #tpu.core_type<tc>, window_params = [{transform_indices = @transform_0, window_bounds = array<i64: 256, 256>}, {transform_indices = @transform_1, window_bounds = array<i64: 256, 128>}, {transform_indices = @transform_2, window_bounds = array<i64: 256, 1>}, {pipeline_mode = #tpu.pipeline_mode<synchronous>, transform_indices = @transform_3, window_bounds = array<i64: 1, 128>}, {transform_indices = @transform_4, window_bounds = array<i64: 256, 128>}]} {
    %c0_i32 = arith.constant 0 : i32
    %0 = arith.cmpi eq, %arg1, %c0_i32 : i32
    %1 = arith.extui %0 : i1 to i32
    %c0_i32_0 = arith.constant 0 : i32
    %2 = arith.cmpi ne, %1, %c0_i32_0 : i32
    scf.if %2 {
      %cst_9 = arith.constant 0.000000e+00 : f32
      %12 = vector.broadcast %cst_9 : f32 to vector<256x128xf32>
      %c0_10 = arith.constant 0 : index
      %c0_11 = arith.constant 0 : index
      %13 = vector.load %arg7[%c0_10, %c0_11] : memref<256x128xf32, #tpu.memory_space<vmem>>, vector<256x128xf32>
      tpu.vector_store %arg7[%c0_10, %c0_11], %12 {strides = array<i32>} : memref<256x128xf32, #tpu.memory_space<vmem>>, vector<256x128xf32>,
    } else {
    }
    %c0 = arith.constant 0 : index
    %c0_1 = arith.constant 0 : index
    %3 = vector.load %arg7[%c0, %c0_1] : memref<256x128xf32, #tpu.memory_space<vmem>>, vector<256x128xf32>
    %c0_2 = arith.constant 0 : index
    %c0_3 = arith.constant 0 : index
    %4 = vector.load %arg2[%c0_2, %c0_3] : memref<256x256xbf16, #tpu.memory_space<vmem>>, vector<256x256xbf16>
    %c0_4 = arith.constant 0 : index
    %c0_5 = arith.constant 0 : index
    %5 = vector.load %arg3[%c0_4, %c0_5] : memref<256x128xbf16, #tpu.memory_space<vmem>>, vector<256x128xbf16>
    %cst = arith.constant dense<0.000000e+00> : vector<256x128xf32>
    %6 = tpu.matmul %4, %5, %cst {dimension_numbers = #tpu.dot_dimension_numbers<[1], [0], [0], [1], [0, 0, 1, 1], [], []>} : vector<256x256xbf16>, vector<256x128xbf16>, vector<256x128xf32> -> vector<256x128xf32>
    %7 = arith.addf %3, %6 : vector<256x128xf32>
    %c0_6 = arith.constant 0 : index
    %c0_7 = arith.constant 0 : index
    %8 = vector.load %arg7[%c0_6, %c0_7] : memref<256x128xf32, #tpu.memory_space<vmem>>, vector<256x128xf32>
    tpu.vector_store %arg7[%c0_6, %c0_7], %7 {strides = array<i32>} : memref<256x128xf32, #tpu.memory_space<vmem>>, vector<256x128xf32>,
    %c1_i32 = arith.constant 1 : i32
    %9 = arith.cmpi eq, %arg1, %c1_i32 : i32
    %10 = arith.extui %9 : i1 to i32
    %c0_i32_8 = arith.constant 0 : i32
    %11 = arith.cmpi ne, %10, %c0_i32_8 : i32
    scf.if %11 {
      %c0_9 = arith.constant 0 : index
      %c0_10 = arith.constant 0 : index
      %12 = vector.load %arg7[%c0_9, %c0_10] : memref<256x128xf32, #tpu.memory_space<vmem>>, vector<256x128xf32>
      %c0_11 = arith.constant 0 : index
      %c0_12 = arith.constant 0 : index
      %13 = vector.load %arg4[%c0_11, %c0_12] : memref<256x1xf32, #tpu.memory_space<vmem>>, vector<256x1xf32>
      %14 = vector.broadcast %13 : vector<256x1xf32> to vector<256x128xf32>
      %15 = arith.mulf %12, %14 : vector<256x128xf32>
      %c0_13 = arith.constant 0 : index
      %c0_14 = arith.constant 0 : index
      %16 = vector.load %arg5[%c0_13, %c0_14] : memref<1x128xf32, #tpu.memory_space<vmem>>, vector<1x128xf32>
      %17 = vector.broadcast %16 : vector<1x128xf32> to vector<256x128xf32>
      %18 = arith.addf %15, %17 : vector<256x128xf32>
      %cst_15 = arith.constant 0.000000e+00 : f32
      %19 = vector.broadcast %cst_15 : f32 to vector<256x128xf32>
      %20 = arith.maximumf %18, %19 : vector<256x128xf32>
      %c0_16 = arith.constant 0 : index
      %c0_17 = arith.constant 0 : index
      %21 = vector.load %arg6[%c0_16, %c0_17] : memref<256x128xf32, #tpu.memory_space<vmem>>, vector<256x128xf32>
      tpu.vector_store %arg6[%c0_16, %c0_17], %20 {strides = array<i32>} : memref<256x128xf32, #tpu.memory_space<vmem>>, vector<256x128xf32>,
    } else {
    }
    return
  }
  func.func @transform_0(%arg0: i32, %arg1: i32) -> (i32, i32) {
    %c0_i32 = arith.constant 0 : i32
    return %arg0, %arg1 : i32, i32
  }
  func.func @transform_1(%arg0: i32, %arg1: i32) -> (i32, i32) {
    %c0_i32 = arith.constant 0 : i32
    %c0_i32_0 = arith.constant 0 : i32
    return %arg1, %c0_i32 : i32, i32
  }
  func.func @transform_2(%arg0: i32, %arg1: i32) -> (i32, i32) {
    %c0_i32 = arith.constant 0 : i32
    %c0_i32_0 = arith.constant 0 : i32
    return %arg0, %c0_i32 : i32, i32
  }
  func.func @transform_3(%arg0: i32, %arg1: i32) -> (i32, i32) {
    %c0_i32 = arith.constant 0 : i32
    %c0_i32_0 = arith.constant 0 : i32
    %c0_i32_1 = arith.constant 0 : i32
    return %c0_i32, %c0_i32_0 : i32, i32
  }
  func.func @transform_4(%arg0: i32, %arg1: i32) -> (i32, i32) {
    %c0_i32 = arith.constant 0 : i32
    %c0_i32_0 = arith.constant 0 : i32
    return %arg0, %c0_i32 : i32, i32
  }
}

module attributes {stable_mosaic.version = 11 : i64} {
  func.func @_project_kernel(%arg0: i32, %arg1: memref<256x16xf32, #tpu.memory_space<vmem>>, %arg2: memref<256x1xf32, #tpu.memory_space<vmem>>, %arg3: memref<16x128xf32, #tpu.memory_space<vmem>>, %arg4: memref<256x128xbf16, #tpu.memory_space<vmem>>) attributes {dimension_semantics = [#tpu.dimension_semantics<parallel>], iteration_bounds = array<i64: 2>, scalar_prefetch = 0 : i64, scratch_operands = 0 : i64, tpu.core_type = #tpu.core_type<tc>, window_params = [{transform_indices = @transform_0, window_bounds = array<i64: 256, 16>}, {transform_indices = @transform_1, window_bounds = array<i64: 256, 1>}, {pipeline_mode = #tpu.pipeline_mode<synchronous>, transform_indices = @transform_2, window_bounds = array<i64: 16, 128>}, {transform_indices = @transform_3, window_bounds = array<i64: 256, 128>}]} {
    %c0 = arith.constant 0 : index
    %c0_0 = arith.constant 0 : index
    %0 = vector.load %arg1[%c0, %c0_0] : memref<256x16xf32, #tpu.memory_space<vmem>>, vector<256x16xf32>
    %c0_1 = arith.constant 0 : index
    %c0_2 = arith.constant 0 : index
    %1 = vector.load %arg2[%c0_1, %c0_2] : memref<256x1xf32, #tpu.memory_space<vmem>>, vector<256x1xf32>
    %2 = vector.broadcast %1 : vector<256x1xf32> to vector<256x16xf32>
    %3 = arith.mulf %0, %2 : vector<256x16xf32>
    %c0_3 = arith.constant 0 : index
    %c0_4 = arith.constant 0 : index
    %4 = vector.load %arg3[%c0_3, %c0_4] : memref<16x128xf32, #tpu.memory_space<vmem>>, vector<16x128xf32>
    %cst = arith.constant dense<0.000000e+00> : vector<256x128xf32>
    %5 = tpu.matmul %3, %4, %cst {dimension_numbers = #tpu.dot_dimension_numbers<[1], [0], [0], [1], [0, 0, 1, 1], [], []>} : vector<256x16xf32>, vector<16x128xf32>, vector<256x128xf32> -> vector<256x128xf32>
    %6 = arith.truncf %5 : vector<256x128xf32> to vector<256x128xbf16>
    %c0_5 = arith.constant 0 : index
    %c0_6 = arith.constant 0 : index
    %7 = vector.load %arg4[%c0_5, %c0_6] : memref<256x128xbf16, #tpu.memory_space<vmem>>, vector<256x128xbf16>
    tpu.vector_store %arg4[%c0_5, %c0_6], %6 {strides = array<i32>} : memref<256x128xbf16, #tpu.memory_space<vmem>>, vector<256x128xbf16>,
    return
  }
  func.func @transform_0(%arg0: i32) -> (i32, i32) {
    %c0_i32 = arith.constant 0 : i32
    %c0_i32_0 = arith.constant 0 : i32
    return %arg0, %c0_i32 : i32, i32
  }
  func.func @transform_1(%arg0: i32) -> (i32, i32) {
    %c0_i32 = arith.constant 0 : i32
    %c0_i32_0 = arith.constant 0 : i32
    return %arg0, %c0_i32 : i32, i32
  }
  func.func @transform_2(%arg0: i32) -> (i32, i32) {
    %c0_i32 = arith.constant 0 : i32
    %c0_i32_0 = arith.constant 0 : i32
    %c0_i32_1 = arith.constant 0 : i32
    return %c0_i32, %c0_i32_0 : i32, i32
  }
  func.func @transform_3(%arg0: i32) -> (i32, i32) {
    %c0_i32 = arith.constant 0 : i32
    %c0_i32_0 = arith.constant 0 : i32
    return %arg0, %c0_i32 : i32, i32
  }
}

module attributes {stable_mosaic.version = 11 : i64} {
  func.func @_aggregate_kernel(%arg0: i32, %arg1: i32, %arg2: memref<256x256xbf16, #tpu.memory_space<vmem>>, %arg3: memref<256x128xbf16, #tpu.memory_space<vmem>>, %arg4: memref<256x1xf32, #tpu.memory_space<vmem>>, %arg5: memref<1x128xf32, #tpu.memory_space<vmem>>, %arg6: memref<256x128xf32, #tpu.memory_space<vmem>>, %arg7: memref<256x128xf32, #tpu.memory_space<vmem>>) attributes {dimension_semantics = [#tpu.dimension_semantics<parallel>, #tpu.dimension_semantics<arbitrary>], iteration_bounds = array<i64: 2, 2>, scalar_prefetch = 0 : i64, scratch_operands = 1 : i64, tpu.core_type = #tpu.core_type<tc>, window_params = [{transform_indices = @transform_0, window_bounds = array<i64: 256, 256>}, {transform_indices = @transform_1, window_bounds = array<i64: 256, 128>}, {transform_indices = @transform_2, window_bounds = array<i64: 256, 1>}, {pipeline_mode = #tpu.pipeline_mode<synchronous>, transform_indices = @transform_3, window_bounds = array<i64: 1, 128>}, {transform_indices = @transform_4, window_bounds = array<i64: 256, 128>}]} {
    %c0_i32 = arith.constant 0 : i32
    %0 = arith.cmpi eq, %arg1, %c0_i32 : i32
    %1 = arith.extui %0 : i1 to i32
    %c0_i32_0 = arith.constant 0 : i32
    %2 = arith.cmpi ne, %1, %c0_i32_0 : i32
    scf.if %2 {
      %cst_9 = arith.constant 0.000000e+00 : f32
      %12 = vector.broadcast %cst_9 : f32 to vector<256x128xf32>
      %c0_10 = arith.constant 0 : index
      %c0_11 = arith.constant 0 : index
      %13 = vector.load %arg7[%c0_10, %c0_11] : memref<256x128xf32, #tpu.memory_space<vmem>>, vector<256x128xf32>
      tpu.vector_store %arg7[%c0_10, %c0_11], %12 {strides = array<i32>} : memref<256x128xf32, #tpu.memory_space<vmem>>, vector<256x128xf32>,
    } else {
    }
    %c0 = arith.constant 0 : index
    %c0_1 = arith.constant 0 : index
    %3 = vector.load %arg7[%c0, %c0_1] : memref<256x128xf32, #tpu.memory_space<vmem>>, vector<256x128xf32>
    %c0_2 = arith.constant 0 : index
    %c0_3 = arith.constant 0 : index
    %4 = vector.load %arg2[%c0_2, %c0_3] : memref<256x256xbf16, #tpu.memory_space<vmem>>, vector<256x256xbf16>
    %c0_4 = arith.constant 0 : index
    %c0_5 = arith.constant 0 : index
    %5 = vector.load %arg3[%c0_4, %c0_5] : memref<256x128xbf16, #tpu.memory_space<vmem>>, vector<256x128xbf16>
    %cst = arith.constant dense<0.000000e+00> : vector<256x128xf32>
    %6 = tpu.matmul %4, %5, %cst {dimension_numbers = #tpu.dot_dimension_numbers<[1], [0], [0], [1], [0, 0, 1, 1], [], []>} : vector<256x256xbf16>, vector<256x128xbf16>, vector<256x128xf32> -> vector<256x128xf32>
    %7 = arith.addf %3, %6 : vector<256x128xf32>
    %c0_6 = arith.constant 0 : index
    %c0_7 = arith.constant 0 : index
    %8 = vector.load %arg7[%c0_6, %c0_7] : memref<256x128xf32, #tpu.memory_space<vmem>>, vector<256x128xf32>
    tpu.vector_store %arg7[%c0_6, %c0_7], %7 {strides = array<i32>} : memref<256x128xf32, #tpu.memory_space<vmem>>, vector<256x128xf32>,
    %c1_i32 = arith.constant 1 : i32
    %9 = arith.cmpi eq, %arg1, %c1_i32 : i32
    %10 = arith.extui %9 : i1 to i32
    %c0_i32_8 = arith.constant 0 : i32
    %11 = arith.cmpi ne, %10, %c0_i32_8 : i32
    scf.if %11 {
      %c0_9 = arith.constant 0 : index
      %c0_10 = arith.constant 0 : index
      %12 = vector.load %arg7[%c0_9, %c0_10] : memref<256x128xf32, #tpu.memory_space<vmem>>, vector<256x128xf32>
      %c0_11 = arith.constant 0 : index
      %c0_12 = arith.constant 0 : index
      %13 = vector.load %arg4[%c0_11, %c0_12] : memref<256x1xf32, #tpu.memory_space<vmem>>, vector<256x1xf32>
      %14 = vector.broadcast %13 : vector<256x1xf32> to vector<256x128xf32>
      %15 = arith.mulf %12, %14 : vector<256x128xf32>
      %c0_13 = arith.constant 0 : index
      %c0_14 = arith.constant 0 : index
      %16 = vector.load %arg5[%c0_13, %c0_14] : memref<1x128xf32, #tpu.memory_space<vmem>>, vector<1x128xf32>
      %17 = vector.broadcast %16 : vector<1x128xf32> to vector<256x128xf32>
      %18 = arith.addf %15, %17 : vector<256x128xf32>
      %c0_15 = arith.constant 0 : index
      %c0_16 = arith.constant 0 : index
      %19 = vector.load %arg6[%c0_15, %c0_16] : memref<256x128xf32, #tpu.memory_space<vmem>>, vector<256x128xf32>
      tpu.vector_store %arg6[%c0_15, %c0_16], %18 {strides = array<i32>} : memref<256x128xf32, #tpu.memory_space<vmem>>, vector<256x128xf32>,
    } else {
    }
    return
  }
  func.func @transform_0(%arg0: i32, %arg1: i32) -> (i32, i32) {
    %c0_i32 = arith.constant 0 : i32
    return %arg0, %arg1 : i32, i32
  }
  func.func @transform_1(%arg0: i32, %arg1: i32) -> (i32, i32) {
    %c0_i32 = arith.constant 0 : i32
    %c0_i32_0 = arith.constant 0 : i32
    return %arg1, %c0_i32 : i32, i32
  }
  func.func @transform_2(%arg0: i32, %arg1: i32) -> (i32, i32) {
    %c0_i32 = arith.constant 0 : i32
    %c0_i32_0 = arith.constant 0 : i32
    return %arg0, %c0_i32 : i32, i32
  }
  func.func @transform_3(%arg0: i32, %arg1: i32) -> (i32, i32) {
    %c0_i32 = arith.constant 0 : i32
    %c0_i32_0 = arith.constant 0 : i32
    %c0_i32_1 = arith.constant 0 : i32
    return %c0_i32, %c0_i32_0 : i32, i32
  }
  func.func @transform_4(%arg0: i32, %arg1: i32) -> (i32, i32) {
    %c0_i32 = arith.constant 0 : i32
    %c0_i32_0 = arith.constant 0 : i32
    return %arg0, %c0_i32 : i32, i32
  }
}

</mosaic_0001>

<bundles_post_ra>
// kernel: gcn_node_classifier_forward.4
= control target key start
LH: loop header
LB: loop body
LE: loop exit
PB: predicated region body
PF: predicated region fallthrough
CT: control target
= control target key end

     0   :  { %s1354_s12 = smov 0   ;;  %s1512_s0 = inlined_call_operand.vmem [shape: f32[512,32], index: 0, kind: input, shape index: {}]   ;;  %s1513_s1 = inlined_call_operand.vmem [shape: f32[512,1], index: 1, kind: input, shape index: {}]   ;;  %s1514_s2 = inlined_call_operand.vmem [shape: f32[32,128], index: 2, kind: input, shape index: {}]   ;;  %s1515_s3 = inlined_call_operand.vmem [shape: bf16[512,128], index: 3, kind: output, shape index: {}]  }
   0x1 LB: > { %s1006_s13 = sadd.s32 4294967295, %s1331_s12   ;;  %p1010_p0 = scmp.ge.s32.totalorder %s1331_s12, 1  ;;  %s1331_s12 = sphi %s1354_s12, %s13_s12  }
   0x2   : > { %p149_p1 = scmp.lt.s32.totalorder %s1331_s12, 3 }
   0x4   : > { %p150_p2 = pnand %p1010_p0, %p149_p1 }
   0x5   : > { %s1011_s14 = sshll.u32 (!%p150_p2), %s1006_s13, 5  ;;  %v452_v0 = vld [vmem:[%s1514_s2] sm:$0xff] (!%p150_p2)  ;;  %v453_v1 = vld [vmem:[%s1514_s2 + $0x8] sm:$0xff] (!%p150_p2)  ;;  %v454_v2 = vld [vmem:[%s1514_s2 + $0x10] sm:$0xff] (!%p150_p2)  ;;  %v1333_v3 = vmov (!%p150_p2), 0   ;;  %vm456_vm0 = vcmask (!%p150_p2), 261120  }
   0x6   : > { %153 = sbr.rel (%p150_p2) target bundleno = 423 (0x1a7), region = 32  ;;  %1324 = vset.pattern.permute.xlu1 (!%p150_p2), %v1333_v3  ;;  %1323 = vset.pattern.permute.xlu0 (!%p150_p2), %v1333_v3  ;;  %p179_p3 = scmp.lt.s32.totalorder (!%p150_p2), %s1011_s14, 63  ;;  %v1302_v4 = vpack.c.bf16 (!%p150_p2), %v453_v1, %v452_v0  ;;  %v455_v5 = vld [vmem:[%s1514_s2 + $0x18] sm:$0xff] (!%p150_p2) }
   0x7   : > { %v1306_v6 = vpack.c.bf16 (!%p150_p2), %v455_v5, %v454_v2 }
   0x8   : > { %1303 = vmatprep.subr.bf16.mxu0 (!%p150_p2), %v1302_v4  ;;  %1310 = vmatprep.subr.bf16.mxu1 (!%p150_p2), %v1302_v4 }
   0x9   : > { %1305 = vmatpush3.bf16.msra.mxu0 (!%p150_p2), %v1302_v4  ;;  %1312 = vmatpush3.bf16.msra.mxu1 (!%p150_p2), %v1302_v4 }
   0xa   : > { %1307 = vmatprep.subr.bf16.mxu0 (!%p150_p2), %v1306_v6  ;;  %1311 = vmatprep.subr.bf16.mxu1 (!%p150_p2), %v1306_v6 }
   0xd   : > { %s1517_s14 = smov (!%p179_p3, %s1011_s14), 63  ;;  %1309 = vmatpush3.bf16.msra.mxu0 %v1306_v6  ;;  %1313 = vmatpush3.bf16.msra.mxu1 %v1306_v6 }
   0xe   : > { %s1012_s23 = sshll.u32 %s1517_s14, 3  ;;  %s1016_s30 = sshll.u32 %s1517_s14, 2 }
   0xf   : > { %s1382_s26 = scalar_lea.vmem %s1513_s1, %s1012_s23  ;;  %s1421_s29 = scalar_lea.vmem %s1512_s0, %s1012_s23 }
  0x10   : > { %v229_v7 = vld [vmem:[%s1382_s26 + $0x8] sm:$0xff]  ;;  %v228_v8 = vld [vmem:[%s1382_s26] sm:$0xff]  ;;  %v246_v11 = vld [vmem:[%s1382_s26 + $0x90] sm:$0xff]  ;;  %s1491_s6 = scalar_lea.vmem %s1515_s3, %s1016_s30 }
  0x11   : > { %267 = vperm.xlu1 %1324, %v229_v7   ;;  %262 = vperm.xlu0 %1323, %v228_v8   ;;  %v245_v9 = vld [vmem:[%s1382_s26 + $0x88] sm:$0xff]  ;;  %v244_v10 = vld [vmem:[%s1382_s26 + $0x80] sm:$0xff]  ;;  %v230_v12 = vld [vmem:[%s1382_s26 + $0x10] sm:$0xff] }
  0x12   : > { %v247_v13 = vld [vmem:[%s1382_s26 + $0x98] sm:$0xff]  ;;  %v248_v15 = vld [vmem:[%s1382_s26 + $0xa0] sm:$0xff]  ;;  %v249_v17 = vld [vmem:[%s1382_s26 + $0xa8] sm:$0xff] }
  0x13   : > { %v231_v14 = vld [vmem:[%s1382_s26 + $0x18] sm:$0xff]  ;;  %v232_v16 = vld [vmem:[%s1382_s26 + $0x20] sm:$0xff]  ;;  %v233_v18 = vld [vmem:[%s1382_s26 + $0x28] sm:$0xff] }
  0x14   : > { %v250_v19 = vld [vmem:[%s1382_s26 + $0xb0] sm:$0xff]  ;;  %v251_v21 = vld [vmem:[%s1382_s26 + $0xb8] sm:$0xff]  ;;  %v252_v23 = vld [vmem:[%s1382_s26 + $0xc0] sm:$0xff] }
  0x15   : > { %347 = vperm.xlu1 %1324, %v245_v9   ;;  %342 = vperm.xlu0 %1323, %v244_v10   ;;  %v234_v20 = vld [vmem:[%s1382_s26 + $0x30] sm:$0xff]  ;;  %v235_v22 = vld [vmem:[%s1382_s26 + $0x38] sm:$0xff]  ;;  %v236_v24 = vld [vmem:[%s1382_s26 + $0x40] sm:$0xff] }
  0x16   : > { %v253_v25 = vld [vmem:[%s1382_s26 + $0xc8] sm:$0xff]  ;;  %v254_v27 = vld [vmem:[%s1382_s26 + $0xd0] sm:$0xff]  ;;  %v255_v29 = vld [vmem:[%s1382_s26 + $0xd8] sm:$0xff] }
  0x17   : > { %v237_v26 = vld [vmem:[%s1382_s26 + $0x48] sm:$0xff]  ;;  %v238_v28 = vld [vmem:[%s1382_s26 + $0x50] sm:$0xff]  ;;  %v239_v30 = vld [vmem:[%s1382_s26 + $0x58] sm:$0xff] }
  0x18   : > { %v256_v31 = vld [vmem:[%s1382_s26 + $0xe0] sm:$0xff]  ;;  %v257_v33 = vld [vmem:[%s1382_s26 + $0xe8] sm:$0xff]  ;;  %v258_v35 = vld [vmem:[%s1382_s26 + $0xf0] sm:$0xff] }
  0x19   : > { %352 = vperm.xlu1 %1324, %v246_v11   ;;  %272 = vperm.xlu0 %1323, %v230_v12   ;;  %v240_v32 = vld [vmem:[%s1382_s26 + $0x60] sm:$0xff]  ;;  %v241_v34 = vld [vmem:[%s1382_s26 + $0x68] sm:$0xff]  ;;  %v242_v36 = vld [vmem:[%s1382_s26 + $0x70] sm:$0xff] }
  0x1a   : > { %v259_v37 = vld [vmem:[%s1382_s26 + $0xf8] sm:$0xff]  ;;  %v197_v39 = vld [vmem:[%s1421_s29 + $0x8] sm:$0xff]  ;;  %v196_v40 = vld [vmem:[%s1421_s29] sm:$0xff] }
  0x1b   : > { %v243_v38 = vld [vmem:[%s1382_s26 + $0x78] sm:$0xff]  ;;  %v213_v45 = vld [vmem:[%s1421_s29 + $0x88] sm:$0xff]  ;;  %v212_v46 = vld [vmem:[%s1421_s29 + $0x80] sm:$0xff] }
  0x1c   : > { %v214_v51 = vld [vmem:[%s1421_s29 + $0x90] sm:$0xff]  ;;  %v215_v57 = vld [vmem:[%s1421_s29 + $0x98] sm:$0xff]  ;;  %v216_v63 = vld [vmem:[%s1421_s29 + $0xa0] sm:$0xff] }
  0x1d   : > { %357 = vperm.xlu1 %1324, %v247_v13   ;;  %277 = vperm.xlu0 %1323, %v231_v14   ;;  %v198_v52 = vld [vmem:[%s1421_s29 + $0x10] sm:$0xff]  ;;  %v199_v58 = vld [vmem:[%s1421_s29 + $0x18] sm:$0xff]  ;;  %v200_v0 = vld [vmem:[%s1421_s29 + $0x20] sm:$0xff] }
  0x1e   : > { %v217_v5 = vld [vmem:[%s1421_s29 + $0xa8] sm:$0xff]  ;;  %v218_v11 = vld [vmem:[%s1421_s29 + $0xb0] sm:$0xff] }
  0x1f   : > { %v201_v6 = vld [vmem:[%s1421_s29 + $0x28] sm:$0xff]  ;;  %v202_v12 = vld [vmem:[%s1421_s29 + $0x30] sm:$0xff] }
  0x21   : > { %362 = vperm.xlu1 %1324, %v248_v15   ;;  %282 = vperm.xlu0 %1323, %v232_v16  }
  0x25   : > { %367 = vperm.xlu1 %1324, %v249_v17   ;;  %287 = vperm.xlu0 %1323, %v233_v18   ;;  %v219_v17 = vld [vmem:[%s1421_s29 + $0xb8] sm:$0xff] }
  0x26   : > { %v203_v18 = vld [vmem:[%s1421_s29 + $0x38] sm:$0xff] }
  0x29   : > { %372 = vperm.xlu1 %1324, %v250_v19   ;;  %292 = vperm.xlu0 %1323, %v234_v20  }
  0x2d   : > { %377 = vperm.xlu1 %1324, %v251_v21   ;;  %297 = vperm.xlu0 %1323, %v235_v22  }
  0x31   : > { %382 = vperm.xlu1 %1324, %v252_v23   ;;  %302 = vperm.xlu0 %1323, %v236_v24   ;;  %v220_v23 = vld [vmem:[%s1421_s29 + $0xc0] sm:$0xff] }
  0x32   : > { %v204_v24 = vld [vmem:[%s1421_s29 + $0x40] sm:$0xff] }
  0x35   : > { %387 = vperm.xlu1 %1324, %v253_v25   ;;  %307 = vperm.xlu0 %1323, %v237_v26  }
  0x39   : > { %392 = vperm.xlu1 %1324, %v254_v27   ;;  %312 = vperm.xlu0 %1323, %v238_v28  }
  0x3d   : > { %397 = vperm.xlu1 %1324, %v255_v29   ;;  %317 = vperm.xlu0 %1323, %v239_v30   ;;  %v221_v29 = vld [vmem:[%s1421_s29 + $0xc8] sm:$0xff] }
  0x3e   : > { %v205_v30 = vld [vmem:[%s1421_s29 + $0x48] sm:$0xff] }
  0x41   : > { %402 = vperm.xlu1 %1324, %v256_v31   ;;  %322 = vperm.xlu0 %1323, %v240_v32  }
  0x45   : > { %407 = vperm.xlu1 %1324, %v257_v33   ;;  %327 = vperm.xlu0 %1323, %v241_v34  }
  0x49   : > { %412 = vperm.xlu1 %1324, %v258_v35   ;;  %332 = vperm.xlu0 %1323, %v242_v36   ;;  %v222_v35 = vld [vmem:[%s1421_s29 + $0xd0] sm:$0xff] }
  0x4a   : > { %v206_v36 = vld [vmem:[%s1421_s29 + $0x50] sm:$0xff] }
  0x4d   : > { %417 = vperm.xlu1 %1324, %v259_v37   ;;  %337 = vperm.xlu0 %1323, %v243_v38  }
  0x90   : > { %v268_v41 = vpop.permute.xlu1 %267  ;;  %v263_v42 = vpop.permute.xlu0 %262 }
  0x91   : > { %v421_v43 = vmul.f32 %v268_v41, %v197_v39  ;;  %v420_v44 = vmul.f32 %v263_v42, %v196_v40  ;;  %v223_v41 = vld [vmem:[%s1421_s29 + $0xd8] sm:$0xff] }
  0x92   : > { %v207_v42 = vld [vmem:[%s1421_s29 + $0x58] sm:$0xff] }
  0x93   : > { %1254 = vmatprep.mubr.msk.f32.mxu0 %vm456_vm0, %v420_v44 }
  0x94   : > { %v348_v47 = vpop.permute.xlu1 %347  ;;  %v343_v48 = vpop.permute.xlu0 %342  ;;  %1255 = vmatmul.mubr.msk.f32.vlgmr.msra.gmra.mrb[0].mxu0 %vm456_vm0, %v421_v43 }
  0x95   : > { %v437_v49 = vmul.f32 %v348_v47, %v213_v45  ;;  %v436_v50 = vmul.f32 %v343_v48, %v212_v46  ;;  %v224_v47 = vld [vmem:[%s1421_s29 + $0xe0] sm:$0xff] }
  0x96   : > { %v208_v48 = vld [vmem:[%s1421_s29 + $0x60] sm:$0xff] }
  0x97   : > { %1278 = vmatprep.mubr.msk.f32.mxu1 %vm456_vm0, %v436_v50 }
  0x98   : > { %v353_v53 = vpop.permute.xlu1 %352  ;;  %v273_v54 = vpop.permute.xlu0 %272  ;;  %1279 = vmatmul.mubr.msk.f32.vlgmr.msra.gmra.mrb[0].mxu1 %vm456_vm0, %v437_v49 }
  0x99   : > { %v438_v55 = vmul.f32 %v353_v53, %v214_v51  ;;  %v422_v56 = vmul.f32 %v273_v54, %v198_v52  ;;  %v225_v53 = vld [vmem:[%s1421_s29 + $0xe8] sm:$0xff] }
  0x9a   : > { %v209_v54 = vld [vmem:[%s1421_s29 + $0x68] sm:$0xff] }
  0x9b   : > { %1257 = vmatprep.mubr.msk.f32.mxu0 %vm456_vm0, %v422_v56  ;;  %1281 = vmatprep.mubr.msk.f32.mxu1 %vm456_vm0, %v438_v55 }
  0x9c   : > { %v358_v59 = vpop.permute.xlu1 %357  ;;  %v278_v60 = vpop.permute.xlu0 %277 }
  0x9d   : > { %v439_v61 = vmul.f32 %v358_v59, %v215_v57  ;;  %v423_v62 = vmul.f32 %v278_v60, %v199_v58  ;;  %v226_v59 = vld [vmem:[%s1421_s29 + $0xf0] sm:$0xff] }
  0x9e   : > { %v210_v60 = vld [vmem:[%s1421_s29 + $0x70] sm:$0xff] }
  0x9f   : > { %1258 = vmatmul.mubr.msk.f32.gmra.mrb[2].mxu0 %vm456_vm0, %v423_v62  ;;  %1282 = vmatmul.mubr.msk.f32.gmra.mrb[2].mxu1 %vm456_vm0, %v439_v61 }
  0xa0   : > { %v363_v1 = vpop.permute.xlu1 %362  ;;  %v283_v2 = vpop.permute.xlu0 %282 }
  0xa1   : > { %v440_v3 = vmul.f32 %v363_v1, %v216_v63  ;;  %v424_v4 = vmul.f32 %v283_v2, %v200_v0  ;;  %v227_v1 = vld [vmem:[%s1421_s29 + $0xf8] sm:$0xff] }
  0xa2   : > { %v211_v2 = vld [vmem:[%s1421_s29 + $0x78] sm:$0xff] }
  0xa3   : > { %1260 = vmatprep.mubr.msk.f32.mxu0 %vm456_vm0, %v424_v4  ;;  %1284 = vmatprep.mubr.msk.f32.mxu1 %vm456_vm0, %v440_v3 }
  0xa4   : > { %v368_v7 = vpop.permute.xlu1 %367  ;;  %v288_v8 = vpop.permute.xlu0 %287 }
  0xa5   : > { %v441_v9 = vmul.f32 %v368_v7, %v217_v5  ;;  %v425_v10 = vmul.f32 %v288_v8, %v201_v6 }
  0xa7   : > { %1261 = vmatmul.mubr.msk.f32.gmra.mrb[4].mxu0 %vm456_vm0, %v425_v10  ;;  %1285 = vmatmul.mubr.msk.f32.gmra.mrb[4].mxu1 %vm456_vm0, %v441_v9 }
  0xa8   : > { %v373_v13 = vpop.permute.xlu1 %372  ;;  %v293_v14 = vpop.permute.xlu0 %292 }
  0xa9   : > { %v442_v15 = vmul.f32 %v373_v13, %v218_v11  ;;  %v426_v16 = vmul.f32 %v293_v14, %v202_v12 }
  0xab   : > { %1263 = vmatprep.mubr.msk.f32.mxu0 %vm456_vm0, %v426_v16  ;;  %1287 = vmatprep.mubr.msk.f32.mxu1 %vm456_vm0, %v442_v15 }
  0xac   : > { %v378_v19 = vpop.permute.xlu1 %377  ;;  %v298_v20 = vpop.permute.xlu0 %297 }
  0xad   : > { %v443_v21 = vmul.f32 %v378_v19, %v219_v17  ;;  %v427_v22 = vmul.f32 %v298_v20, %v203_v18 }
  0xaf   : > { %1264 = vmatmul.mubr.msk.f32.gmra.mrb[6].mxu0 %vm456_vm0, %v427_v22  ;;  %1288 = vmatmul.mubr.msk.f32.gmra.mrb[6].mxu1 %vm456_vm0, %v443_v21 }
  0xb0   : > { %v383_v25 = vpop.permute.xlu1 %382  ;;  %v303_v26 = vpop.permute.xlu0 %302 }
  0xb1   : > { %v444_v27 = vmul.f32 %v383_v25, %v220_v23  ;;  %v428_v28 = vmul.f32 %v303_v26, %v204_v24 }
  0xb3   : > { %1266 = vmatprep.mubr.msk.f32.mxu0 %vm456_vm0, %v428_v28  ;;  %1290 = vmatprep.mubr.msk.f32.mxu1 %vm456_vm0, %v444_v27 }
  0xb4   : > { %v388_v31 = vpop.permute.xlu1 %387  ;;  %v308_v32 = vpop.permute.xlu0 %307 }
  0xb5   : > { %v445_v33 = vmul.f32 %v388_v31, %v221_v29  ;;  %v429_v34 = vmul.f32 %v308_v32, %v205_v30 }
  0xb7   : > { %1267 = vmatmul.mubr.msk.f32.gmra.mrb[8].mxu0 %vm456_vm0, %v429_v34  ;;  %1291 = vmatmul.mubr.msk.f32.gmra.mrb[8].mxu1 %vm456_vm0, %v445_v33 }
  0xb8   : > { %v393_v37 = vpop.permute.xlu1 %392  ;;  %v313_v38 = vpop.permute.xlu0 %312 }
  0xb9   : > { %v446_v39 = vmul.f32 %v393_v37, %v222_v35  ;;  %v430_v40 = vmul.f32 %v313_v38, %v206_v36 }
  0xbb   : > { %1269 = vmatprep.mubr.msk.f32.mxu0 %vm456_vm0, %v430_v40  ;;  %1293 = vmatprep.mubr.msk.f32.mxu1 %vm456_vm0, %v446_v39 }
  0xbc   : > { %v398_v43 = vpop.permute.xlu1 %397  ;;  %v318_v44 = vpop.permute.xlu0 %317 }
  0xbd   : > { %v447_v45 = vmul.f32 %v398_v43, %v223_v41  ;;  %v431_v46 = vmul.f32 %v318_v44, %v207_v42 }
  0xbf   : > { %1270 = vmatmul.mubr.msk.f32.gmra.mrb[10].mxu0 %vm456_vm0, %v431_v46  ;;  %1294 = vmatmul.mubr.msk.f32.gmra.mrb[10].mxu1 %vm456_vm0, %v447_v45 }
  0xc0   : > { %v403_v49 = vpop.permute.xlu1 %402  ;;  %v323_v50 = vpop.permute.xlu0 %322 }
  0xc1   : > { %v448_v51 = vmul.f32 %v403_v49, %v224_v47  ;;  %v432_v52 = vmul.f32 %v323_v50, %v208_v48 }
  0xc3   : > { %1272 = vmatprep.mubr.msk.f32.mxu0 %vm456_vm0, %v432_v52  ;;  %1296 = vmatprep.mubr.msk.f32.mxu1 %vm456_vm0, %v448_v51 }
  0xc4   : > { %v408_v55 = vpop.permute.xlu1 %407  ;;  %v328_v56 = vpop.permute.xlu0 %327 }
  0xc5   : > { %v449_v57 = vmul.f32 %v408_v55, %v225_v53  ;;  %v433_v58 = vmul.f32 %v328_v56, %v209_v54 }
  0xc7   : > { %1273 = vmatmul.mubr.msk.f32.gmra.mrb[12].mxu0 %vm456_vm0, %v433_v58  ;;  %1297 = vmatmul.mubr.msk.f32.gmra.mrb[12].mxu1 %vm456_vm0, %v449_v57 }
  0xc8   : > { %v413_v61 = vpop.permute.xlu1 %412  ;;  %v333_v62 = vpop.permute.xlu0 %332 }
  0xc9   : > { %v450_v63 = vmul.f32 %v413_v61, %v226_v59  ;;  %v434_v0 = vmul.f32 %v333_v62, %v210_v60 }
  0xcb   : > { %1275 = vmatprep.mubr.msk.f32.mxu0 %vm456_vm0, %v434_v0  ;;  %1299 = vmatprep.mubr.msk.f32.mxu1 %vm456_vm0, %v450_v63 }
  0xcc   : > { %v418_v3 = vpop.permute.xlu1 %417  ;;  %v338_v4 = vpop.permute.xlu0 %337 }
  0xcd   : > { %v451_v5 = vmul.f32 %v418_v3, %v227_v1  ;;  %v435_v6 = vmul.f32 %v338_v4, %v211_v2 }
  0xcf   : > { %1276 = vmatmul.mubr.msk.f32.gmra.mrb[14].mxu0 %vm456_vm0, %v435_v6  ;;  %1300 = vmatmul.mubr.msk.f32.gmra.mrb[14].mxu1 %vm456_vm0, %v451_v5 }
 0x167   : > { %v1256_v7 = vpop.f32.mrb[0].mxu0 }
 0x168   : > { %v619_v8 = vpop.f32.mrb[1].mxu0 }
 0x169   : > { %v1118_v9 = vpack.c.bf16 %v1256_v7, %v619_v8 }
 0x16b   : > { %1119 = vst [vmem:[%s1491_s6] sm:$0xff] %v1118_v9   ;;  %v1280_v10 = vpop.f32.mrb[0].mxu1 }
 0x16c   : > { %v699_v11 = vpop.f32.mrb[1].mxu1 }
 0x16d   : > { %v1158_v12 = vpack.c.bf16 %v1280_v10, %v699_v11 }
 0x16f   : > { %1202 = vst [vmem:[%s1491_s6 + $0x40] sm:$0xff] %v1158_v12  }
 0x172   : > { %v1259_v13 = vpop.f32.mrb[2].mxu0  ;;  %v1283_v14 = vpop.f32.mrb[2].mxu1 }
 0x173   : > { %v629_v15 = vpop.f32.mrb[3].mxu0  ;;  %v709_v16 = vpop.f32.mrb[3].mxu1 }
 0x174   : > { %v1123_v17 = vpack.c.bf16 %v1259_v13, %v629_v15  ;;  %v1163_v18 = vpack.c.bf16 %v1283_v14, %v709_v16 }
 0x176   : > { %1195 = vst [vmem:[%s1491_s6 + $0x8] sm:$0xff] %v1123_v17   ;;  %1203 = vst [vmem:[%s1491_s6 + $0x48] sm:$0xff] %v1163_v18  }
 0x17a   : > { %v1262_v19 = vpop.f32.mrb[4].mxu0  ;;  %v1286_v20 = vpop.f32.mrb[4].mxu1 }
 0x17b   : > { %v639_v21 = vpop.f32.mrb[5].mxu0  ;;  %v719_v22 = vpop.f32.mrb[5].mxu1 }
 0x17c   : > { %v1128_v23 = vpack.c.bf16 %v1262_v19, %v639_v21  ;;  %v1168_v24 = vpack.c.bf16 %v1286_v20, %v719_v22 }
 0x17e   : > { %1196 = vst [vmem:[%s1491_s6 + $0x10] sm:$0xff] %v1128_v23   ;;  %1204 = vst [vmem:[%s1491_s6 + $0x50] sm:$0xff] %v1168_v24  }
 0x182   : > { %v1265_v25 = vpop.f32.mrb[6].mxu0  ;;  %v1289_v26 = vpop.f32.mrb[6].mxu1 }
 0x183   : > { %v649_v27 = vpop.f32.mrb[7].mxu0  ;;  %v729_v28 = vpop.f32.mrb[7].mxu1 }
 0x184   : > { %v1133_v29 = vpack.c.bf16 %v1265_v25, %v649_v27  ;;  %v1173_v30 = vpack.c.bf16 %v1289_v26, %v729_v28 }
 0x186   : > { %1197 = vst [vmem:[%s1491_s6 + $0x18] sm:$0xff] %v1133_v29   ;;  %1205 = vst [vmem:[%s1491_s6 + $0x58] sm:$0xff] %v1173_v30  }
 0x18a   : > { %v1268_v31 = vpop.f32.mrb[8].mxu0  ;;  %v1292_v32 = vpop.f32.mrb[8].mxu1 }
 0x18b   : > { %v659_v33 = vpop.f32.mrb[9].mxu0  ;;  %v739_v34 = vpop.f32.mrb[9].mxu1 }
 0x18c   : > { %v1138_v35 = vpack.c.bf16 %v1268_v31, %v659_v33  ;;  %v1178_v36 = vpack.c.bf16 %v1292_v32, %v739_v34 }
 0x18e   : > { %1198 = vst [vmem:[%s1491_s6 + $0x20] sm:$0xff] %v1138_v35   ;;  %1206 = vst [vmem:[%s1491_s6 + $0x60] sm:$0xff] %v1178_v36  }
 0x192   : > { %v1271_v37 = vpop.f32.mrb[10].mxu0  ;;  %v1295_v38 = vpop.f32.mrb[10].mxu1 }
 0x193   : > { %v669_v39 = vpop.f32.mrb[11].mxu0  ;;  %v749_v40 = vpop.f32.mrb[11].mxu1 }
 0x194   : > { %v1143_v41 = vpack.c.bf16 %v1271_v37, %v669_v39  ;;  %v1183_v42 = vpack.c.bf16 %v1295_v38, %v749_v40 }
 0x196   : > { %1199 = vst [vmem:[%s1491_s6 + $0x28] sm:$0xff] %v1143_v41   ;;  %1207 = vst [vmem:[%s1491_s6 + $0x68] sm:$0xff] %v1183_v42  }
 0x19a   : > { %v1274_v43 = vpop.f32.mrb[12].mxu0  ;;  %v1298_v44 = vpop.f32.mrb[12].mxu1 }
 0x19b   : > { %v679_v45 = vpop.f32.mrb[13].mxu0  ;;  %v759_v46 = vpop.f32.mrb[13].mxu1 }
 0x19c   : > { %v1148_v47 = vpack.c.bf16 %v1274_v43, %v679_v45  ;;  %v1188_v48 = vpack.c.bf16 %v1298_v44, %v759_v46 }
 0x19e   : > { %1200 = vst [vmem:[%s1491_s6 + $0x30] sm:$0xff] %v1148_v47   ;;  %1208 = vst [vmem:[%s1491_s6 + $0x70] sm:$0xff] %v1188_v48  }
 0x1a2   : > { %v1277_v49 = vpop.f32.mrb[14].mxu0  ;;  %v1301_v50 = vpop.f32.mrb[14].mxu1 }
 0x1a3   : > { %v689_v51 = vpop.f32.mrb[15].mxu0  ;;  %v769_v52 = vpop.f32.mrb[15].mxu1 }
 0x1a4   : > { %v1153_v53 = vpack.c.bf16 %v1277_v49, %v689_v51  ;;  %v1193_v54 = vpack.c.bf16 %v1301_v50, %v769_v52 }
 0x1a6   : > { %1201 = vst [vmem:[%s1491_s6 + $0x38] sm:$0xff] %v1153_v53   ;;  %1209 = vst [vmem:[%s1491_s6 + $0x78] sm:$0xff] %v1193_v54  }
 0x1a7 PF: > { %s13_s12 = sadd.s32 1, %s1331_s12  }
 0x1a8   : > { %p10_p4 = scmp.ge.s32.totalorder %s13_s12, 4  }
 0x1aa   :  { %12 = sbr.rel (!%p10_p4) target bundleno = 1 (0x1), region = 65 }

// kernel: gcn_node_classifier_forward.6
= control target key start
LH: loop header
LB: loop body
LE: loop exit
PB: predicated region body
PF: predicated region fallthrough
CT: control target
= control target key end

     0   :  { %s1340_s12 = smov 0   ;;  %s1492_s0 = inlined_call_operand.vmem [shape: f32[512,16], index: 0, kind: input, shape index: {}]   ;;  %s1493_s1 = inlined_call_operand.vmem [shape: f32[512,1], index: 1, kind: input, shape index: {}]   ;;  %s1494_s2 = inlined_call_operand.vmem [shape: f32[16,128], index: 2, kind: input, shape index: {}]   ;;  %s1495_s3 = inlined_call_operand.vmem [shape: bf16[512,128], index: 3, kind: output, shape index: {}]  }
   0x1 LB: > { %s1004_s13 = sadd.s32 4294967295, %s1317_s12   ;;  %p1008_p0 = scmp.ge.s32.totalorder %s1317_s12, 1  ;;  %s1317_s12 = sphi %s1340_s12, %s13_s12  }
   0x2   : > { %p149_p1 = scmp.lt.s32.totalorder %s1317_s12, 3 }
   0x4   : > { %p150_p2 = pnand %p1008_p0, %p149_p1 }
   0x5   : > { %s1009_s14 = sshll.u32 (!%p150_p2), %s1004_s13, 5  ;;  %v452_v0 = vld [vmem:[%s1494_s2] sm:$0xff] (!%p150_p2)  ;;  %v453_v1 = vld [vmem:[%s1494_s2 + $0x8] sm:$0xff] (!%p150_p2)  ;;  %v1319_v2 = vmov (!%p150_p2), 0   ;;  %vm454_vm0 = vcmask (!%p150_p2), 130048  }
   0x6   : > { %153 = sbr.rel (%p150_p2) target bundleno = 423 (0x1a7), region = 32  ;;  %1310 = vset.pattern.permute.xlu1 (!%p150_p2), %v1319_v2  ;;  %1309 = vset.pattern.permute.xlu0 (!%p150_p2), %v1319_v2  ;;  %p179_p3 = scmp.lt.s32.totalorder (!%p150_p2), %s1009_s14, 63  ;;  %v1294_v3 = vpack.c.bf16 (!%p150_p2), %v453_v1, %v452_v0 }
   0x8   : > { %1295 = vmatprep.subr.bf16.mxu0 (!%p150_p2), %v1294_v3  ;;  %1298 = vmatprep.subr.bf16.mxu1 (!%p150_p2), %v1294_v3 }
   0x9   : > { %1297 = vmatpush3.bf16.msra.mxu0 (!%p150_p2), %v1294_v3  ;;  %1299 = vmatpush3.bf16.msra.mxu1 (!%p150_p2), %v1294_v3 }
   0xd   : > { %s1497_s14 = smov (!%p179_p3, %s1009_s14), 63 }
   0xe   : > { %s1010_s19 = sshll.u32 %s1497_s14, 3  ;;  %s1014_s26 = sshll.u32 %s1497_s14, 2 }
   0xf   : > { %s1362_s22 = scalar_lea.vmem %s1493_s1, %s1010_s19  ;;  %s1401_s25 = scalar_lea.vmem %s1492_s0, %s1010_s19 }
  0x10   : > { %v229_v4 = vld [vmem:[%s1362_s22 + $0x8] sm:$0xff]  ;;  %v228_v5 = vld [vmem:[%s1362_s22] sm:$0xff]  ;;  %v246_v8 = vld [vmem:[%s1362_s22 + $0x90] sm:$0xff]  ;;  %s1471_s29 = scalar_lea.vmem %s1495_s3, %s1014_s26 }
  0x11   : > { %267 = vperm.xlu1 %1310, %v229_v4   ;;  %262 = vperm.xlu0 %1309, %v228_v5   ;;  %v245_v6 = vld [vmem:[%s1362_s22 + $0x88] sm:$0xff]  ;;  %v244_v7 = vld [vmem:[%s1362_s22 + $0x80] sm:$0xff]  ;;  %v230_v9 = vld [vmem:[%s1362_s22 + $0x10] sm:$0xff] }
  0x12   : > { %v247_v10 = vld [vmem:[%s1362_s22 + $0x98] sm:$0xff]  ;;  %v248_v12 = vld [vmem:[%s1362_s22 + $0xa0] sm:$0xff]  ;;  %v249_v14 = vld [vmem:[%s1362_s22 + $0xa8] sm:$0xff] }
  0x13   : > { %v231_v11 = vld [vmem:[%s1362_s22 + $0x18] sm:$0xff]  ;;  %v232_v13 = vld [vmem:[%s1362_s22 + $0x20] sm:$0xff]  ;;  %v233_v15 = vld [vmem:[%s1362_s22 + $0x28] sm:$0xff] }
  0x14   : > { %v250_v16 = vld [vmem:[%s1362_s22 + $0xb0] sm:$0xff]  ;;  %v251_v18 = vld [vmem:[%s1362_s22 + $0xb8] sm:$0xff]  ;;  %v252_v20 = vld [vmem:[%s1362_s22 + $0xc0] sm:$0xff] }
  0x15   : > { %347 = vperm.xlu1 %1310, %v245_v6   ;;  %342 = vperm.xlu0 %1309, %v244_v7   ;;  %v234_v17 = vld [vmem:[%s1362_s22 + $0x30] sm:$0xff]  ;;  %v235_v19 = vld [vmem:[%s1362_s22 + $0x38] sm:$0xff]  ;;  %v236_v21 = vld [vmem:[%s1362_s22 + $0x40] sm:$0xff] }
  0x16   : > { %v253_v22 = vld [vmem:[%s1362_s22 + $0xc8] sm:$0xff]  ;;  %v254_v24 = vld [vmem:[%s1362_s22 + $0xd0] sm:$0xff]  ;;  %v255_v26 = vld [vmem:[%s1362_s22 + $0xd8] sm:$0xff] }
  0x17   : > { %v237_v23 = vld [vmem:[%s1362_s22 + $0x48] sm:$0xff]  ;;  %v238_v25 = vld [vmem:[%s1362_s22 + $0x50] sm:$0xff]  ;;  %v239_v27 = vld [vmem:[%s1362_s22 + $0x58] sm:$0xff] }
  0x18   : > { %v256_v28 = vld [vmem:[%s1362_s22 + $0xe0] sm:$0xff]  ;;  %v257_v30 = vld [vmem:[%s1362_s22 + $0xe8] sm:$0xff]  ;;  %v258_v32 = vld [vmem:[%s1362_s22 + $0xf0] sm:$0xff] }
  0x19   : > { %352 = vperm.xlu1 %1310, %v246_v8   ;;  %272 = vperm.xlu0 %1309, %v230_v9   ;;  %v240_v29 = vld [vmem:[%s1362_s22 + $0x60] sm:$0xff]  ;;  %v241_v31 = vld [vmem:[%s1362_s22 + $0x68] sm:$0xff]  ;;  %v242_v33 = vld [vmem:[%s1362_s22 + $0x70] sm:$0xff] }
  0x1a   : > { %v259_v34 = vld [vmem:[%s1362_s22 + $0xf8] sm:$0xff]  ;;  %v197_v36 = vld [vmem:[%s1401_s25 + $0x8] sm:$0xff]  ;;  %v196_v37 = vld [vmem:[%s1401_s25] sm:$0xff] }
  0x1b   : > { %v243_v35 = vld [vmem:[%s1362_s22 + $0x78] sm:$0xff]  ;;  %v213_v42 = vld [vmem:[%s1401_s25 + $0x88] sm:$0xff]  ;;  %v212_v43 = vld [vmem:[%s1401_s25 + $0x80] sm:$0xff] }
  0x1c   : > { %v214_v48 = vld [vmem:[%s1401_s25 + $0x90] sm:$0xff]  ;;  %v215_v54 = vld [vmem:[%s1401_s25 + $0x98] sm:$0xff]  ;;  %v216_v60 = vld [vmem:[%s1401_s25 + $0xa0] sm:$0xff] }
  0x1d   : > { %357 = vperm.xlu1 %1310, %v247_v10   ;;  %277 = vperm.xlu0 %1309, %v231_v11   ;;  %v198_v49 = vld [vmem:[%s1401_s25 + $0x10] sm:$0xff]  ;;  %v199_v55 = vld [vmem:[%s1401_s25 + $0x18] sm:$0xff]  ;;  %v200_v61 = vld [vmem:[%s1401_s25 + $0x20] sm:$0xff] }
  0x1e   : > { %v217_v2 = vld [vmem:[%s1401_s25 + $0xa8] sm:$0xff]  ;;  %v218_v8 = vld [vmem:[%s1401_s25 + $0xb0] sm:$0xff] }
  0x1f   : > { %v201_v3 = vld [vmem:[%s1401_s25 + $0x28] sm:$0xff]  ;;  %v202_v9 = vld [vmem:[%s1401_s25 + $0x30] sm:$0xff] }
  0x21   : > { %362 = vperm.xlu1 %1310, %v248_v12   ;;  %282 = vperm.xlu0 %1309, %v232_v13  }
  0x25   : > { %367 = vperm.xlu1 %1310, %v249_v14   ;;  %287 = vperm.xlu0 %1309, %v233_v15   ;;  %v219_v14 = vld [vmem:[%s1401_s25 + $0xb8] sm:$0xff] }
  0x26   : > { %v203_v15 = vld [vmem:[%s1401_s25 + $0x38] sm:$0xff] }
  0x29   : > { %372 = vperm.xlu1 %1310, %v250_v16   ;;  %292 = vperm.xlu0 %1309, %v234_v17  }
  0x2d   : > { %377 = vperm.xlu1 %1310, %v251_v18   ;;  %297 = vperm.xlu0 %1309, %v235_v19  }
  0x31   : > { %382 = vperm.xlu1 %1310, %v252_v20   ;;  %302 = vperm.xlu0 %1309, %v236_v21   ;;  %v220_v20 = vld [vmem:[%s1401_s25 + $0xc0] sm:$0xff] }
  0x32   : > { %v204_v21 = vld [vmem:[%s1401_s25 + $0x40] sm:$0xff] }
  0x35   : > { %387 = vperm.xlu1 %1310, %v253_v22   ;;  %307 = vperm.xlu0 %1309, %v237_v23  }
  0x39   : > { %392 = vperm.xlu1 %1310, %v254_v24   ;;  %312 = vperm.xlu0 %1309, %v238_v25  }
  0x3d   : > { %397 = vperm.xlu1 %1310, %v255_v26   ;;  %317 = vperm.xlu0 %1309, %v239_v27   ;;  %v221_v26 = vld [vmem:[%s1401_s25 + $0xc8] sm:$0xff] }
  0x3e   : > { %v205_v27 = vld [vmem:[%s1401_s25 + $0x48] sm:$0xff] }
  0x41   : > { %402 = vperm.xlu1 %1310, %v256_v28   ;;  %322 = vperm.xlu0 %1309, %v240_v29  }
  0x45   : > { %407 = vperm.xlu1 %1310, %v257_v30   ;;  %327 = vperm.xlu0 %1309, %v241_v31  }
  0x49   : > { %412 = vperm.xlu1 %1310, %v258_v32   ;;  %332 = vperm.xlu0 %1309, %v242_v33   ;;  %v222_v32 = vld [vmem:[%s1401_s25 + $0xd0] sm:$0xff] }
  0x4a   : > { %v206_v33 = vld [vmem:[%s1401_s25 + $0x50] sm:$0xff] }
  0x4d   : > { %417 = vperm.xlu1 %1310, %v259_v34   ;;  %337 = vperm.xlu0 %1309, %v243_v35  }
  0x90   : > { %v268_v38 = vpop.permute.xlu1 %267  ;;  %v263_v39 = vpop.permute.xlu0 %262 }
  0x91   : > { %v421_v40 = vmul.f32 %v268_v38, %v197_v36  ;;  %v420_v41 = vmul.f32 %v263_v39, %v196_v37  ;;  %v223_v38 = vld [vmem:[%s1401_s25 + $0xd8] sm:$0xff] }
  0x92   : > { %v207_v39 = vld [vmem:[%s1401_s25 + $0x58] sm:$0xff] }
  0x93   : > { %1246 = vmatprep.mubr.msk.f32.mxu0 %vm454_vm0, %v420_v41 }
  0x94   : > { %v348_v44 = vpop.permute.xlu1 %347  ;;  %v343_v45 = vpop.permute.xlu0 %342  ;;  %1247 = vmatmul.mubr.msk.f32.vlgmr.msra.gmra.mrb[0].mxu0 %vm454_vm0, %v421_v40 }
  0x95   : > { %v437_v46 = vmul.f32 %v348_v44, %v213_v42  ;;  %v436_v47 = vmul.f32 %v343_v45, %v212_v43  ;;  %v224_v44 = vld [vmem:[%s1401_s25 + $0xe0] sm:$0xff] }
  0x96   : > { %v208_v45 = vld [vmem:[%s1401_s25 + $0x60] sm:$0xff] }
  0x97   : > { %1270 = vmatprep.mubr.msk.f32.mxu1 %vm454_vm0, %v436_v47 }
  0x98   : > { %v353_v50 = vpop.permute.xlu1 %352  ;;  %v273_v51 = vpop.permute.xlu0 %272  ;;  %1271 = vmatmul.mubr.msk.f32.vlgmr.msra.gmra.mrb[0].mxu1 %vm454_vm0, %v437_v46 }
  0x99   : > { %v438_v52 = vmul.f32 %v353_v50, %v214_v48  ;;  %v422_v53 = vmul.f32 %v273_v51, %v198_v49  ;;  %v225_v50 = vld [vmem:[%s1401_s25 + $0xe8] sm:$0xff] }
  0x9a   : > { %v209_v51 = vld [vmem:[%s1401_s25 + $0x68] sm:$0xff] }
  0x9b   : > { %1249 = vmatprep.mubr.msk.f32.mxu0 %vm454_vm0, %v422_v53  ;;  %1273 = vmatprep.mubr.msk.f32.mxu1 %vm454_vm0, %v438_v52 }
  0x9c   : > { %v358_v56 = vpop.permute.xlu1 %357  ;;  %v278_v57 = vpop.permute.xlu0 %277 }
  0x9d   : > { %v439_v58 = vmul.f32 %v358_v56, %v215_v54  ;;  %v423_v59 = vmul.f32 %v278_v57, %v199_v55  ;;  %v226_v56 = vld [vmem:[%s1401_s25 + $0xf0] sm:$0xff] }
  0x9e   : > { %v210_v57 = vld [vmem:[%s1401_s25 + $0x70] sm:$0xff] }
  0x9f   : > { %1250 = vmatmul.mubr.msk.f32.gmra.mrb[2].mxu0 %vm454_vm0, %v423_v59  ;;  %1274 = vmatmul.mubr.msk.f32.gmra.mrb[2].mxu1 %vm454_vm0, %v439_v58 }
  0xa0   : > { %v363_v62 = vpop.permute.xlu1 %362  ;;  %v283_v63 = vpop.permute.xlu0 %282 }
  0xa1   : > { %v440_v0 = vmul.f32 %v363_v62, %v216_v60  ;;  %v424_v1 = vmul.f32 %v283_v63, %v200_v61  ;;  %v227_v62 = vld [vmem:[%s1401_s25 + $0xf8] sm:$0xff] }
  0xa2   : > { %v211_v63 = vld [vmem:[%s1401_s25 + $0x78] sm:$0xff] }
  0xa3   : > { %1252 = vmatprep.mubr.msk.f32.mxu0 %vm454_vm0, %v424_v1  ;;  %1276 = vmatprep.mubr.msk.f32.mxu1 %vm454_vm0, %v440_v0 }
  0xa4   : > { %v368_v4 = vpop.permute.xlu1 %367  ;;  %v288_v5 = vpop.permute.xlu0 %287 }
  0xa5   : > { %v441_v6 = vmul.f32 %v368_v4, %v217_v2  ;;  %v425_v7 = vmul.f32 %v288_v5, %v201_v3 }
  0xa7   : > { %1253 = vmatmul.mubr.msk.f32.gmra.mrb[4].mxu0 %vm454_vm0, %v425_v7  ;;  %1277 = vmatmul.mubr.msk.f32.gmra.mrb[4].mxu1 %vm454_vm0, %v441_v6 }
  0xa8   : > { %v373_v10 = vpop.permute.xlu1 %372  ;;  %v293_v11 = vpop.permute.xlu0 %292 }
  0xa9   : > { %v442_v12 = vmul.f32 %v373_v10, %v218_v8  ;;  %v426_v13 = vmul.f32 %v293_v11, %v202_v9 }
  0xab   : > { %1255 = vmatprep.mubr.msk.f32.mxu0 %vm454_vm0, %v426_v13  ;;  %1279 = vmatprep.mubr.msk.f32.mxu1 %vm454_vm0, %v442_v12 }
  0xac   : > { %v378_v16 = vpop.permute.xlu1 %377  ;;  %v298_v17 = vpop.permute.xlu0 %297 }
  0xad   : > { %v443_v18 = vmul.f32 %v378_v16, %v219_v14  ;;  %v427_v19 = vmul.f32 %v298_v17, %v203_v15 }
  0xaf   : > { %1256 = vmatmul.mubr.msk.f32.gmra.mrb[6].mxu0 %vm454_vm0, %v427_v19  ;;  %1280 = vmatmul.mubr.msk.f32.gmra.mrb[6].mxu1 %vm454_vm0, %v443_v18 }
  0xb0   : > { %v383_v22 = vpop.permute.xlu1 %382  ;;  %v303_v23 = vpop.permute.xlu0 %302 }
  0xb1   : > { %v444_v24 = vmul.f32 %v383_v22, %v220_v20  ;;  %v428_v25 = vmul.f32 %v303_v23, %v204_v21 }
  0xb3   : > { %1258 = vmatprep.mubr.msk.f32.mxu0 %vm454_vm0, %v428_v25  ;;  %1282 = vmatprep.mubr.msk.f32.mxu1 %vm454_vm0, %v444_v24 }
  0xb4   : > { %v388_v28 = vpop.permute.xlu1 %387  ;;  %v308_v29 = vpop.permute.xlu0 %307 }
  0xb5   : > { %v445_v30 = vmul.f32 %v388_v28, %v221_v26  ;;  %v429_v31 = vmul.f32 %v308_v29, %v205_v27 }
  0xb7   : > { %1259 = vmatmul.mubr.msk.f32.gmra.mrb[8].mxu0 %vm454_vm0, %v429_v31  ;;  %1283 = vmatmul.mubr.msk.f32.gmra.mrb[8].mxu1 %vm454_vm0, %v445_v30 }
  0xb8   : > { %v393_v34 = vpop.permute.xlu1 %392  ;;  %v313_v35 = vpop.permute.xlu0 %312 }
  0xb9   : > { %v446_v36 = vmul.f32 %v393_v34, %v222_v32  ;;  %v430_v37 = vmul.f32 %v313_v35, %v206_v33 }
  0xbb   : > { %1261 = vmatprep.mubr.msk.f32.mxu0 %vm454_vm0, %v430_v37  ;;  %1285 = vmatprep.mubr.msk.f32.mxu1 %vm454_vm0, %v446_v36 }
  0xbc   : > { %v398_v40 = vpop.permute.xlu1 %397  ;;  %v318_v41 = vpop.permute.xlu0 %317 }
  0xbd   : > { %v447_v42 = vmul.f32 %v398_v40, %v223_v38  ;;  %v431_v43 = vmul.f32 %v318_v41, %v207_v39 }
  0xbf   : > { %1262 = vmatmul.mubr.msk.f32.gmra.mrb[10].mxu0 %vm454_vm0, %v431_v43  ;;  %1286 = vmatmul.mubr.msk.f32.gmra.mrb[10].mxu1 %vm454_vm0, %v447_v42 }
  0xc0   : > { %v403_v46 = vpop.permute.xlu1 %402  ;;  %v323_v47 = vpop.permute.xlu0 %322 }
  0xc1   : > { %v448_v48 = vmul.f32 %v403_v46, %v224_v44  ;;  %v432_v49 = vmul.f32 %v323_v47, %v208_v45 }
  0xc3   : > { %1264 = vmatprep.mubr.msk.f32.mxu0 %vm454_vm0, %v432_v49  ;;  %1288 = vmatprep.mubr.msk.f32.mxu1 %vm454_vm0, %v448_v48 }
  0xc4   : > { %v408_v52 = vpop.permute.xlu1 %407  ;;  %v328_v53 = vpop.permute.xlu0 %327 }
  0xc5   : > { %v449_v54 = vmul.f32 %v408_v52, %v225_v50  ;;  %v433_v55 = vmul.f32 %v328_v53, %v209_v51 }
  0xc7   : > { %1265 = vmatmul.mubr.msk.f32.gmra.mrb[12].mxu0 %vm454_vm0, %v433_v55  ;;  %1289 = vmatmul.mubr.msk.f32.gmra.mrb[12].mxu1 %vm454_vm0, %v449_v54 }
  0xc8   : > { %v413_v58 = vpop.permute.xlu1 %412  ;;  %v333_v59 = vpop.permute.xlu0 %332 }
  0xc9   : > { %v450_v60 = vmul.f32 %v413_v58, %v226_v56  ;;  %v434_v61 = vmul.f32 %v333_v59, %v210_v57 }
  0xcb   : > { %1267 = vmatprep.mubr.msk.f32.mxu0 %vm454_vm0, %v434_v61  ;;  %1291 = vmatprep.mubr.msk.f32.mxu1 %vm454_vm0, %v450_v60 }
  0xcc   : > { %v418_v0 = vpop.permute.xlu1 %417  ;;  %v338_v1 = vpop.permute.xlu0 %337 }
  0xcd   : > { %v451_v2 = vmul.f32 %v418_v0, %v227_v62  ;;  %v435_v3 = vmul.f32 %v338_v1, %v211_v63 }
  0xcf   : > { %1268 = vmatmul.mubr.msk.f32.gmra.mrb[14].mxu0 %vm454_vm0, %v435_v3  ;;  %1292 = vmatmul.mubr.msk.f32.gmra.mrb[14].mxu1 %vm454_vm0, %v451_v2 }
 0x167   : > { %v1248_v4 = vpop.f32.mrb[0].mxu0 }
 0x168   : > { %v617_v5 = vpop.f32.mrb[1].mxu0 }
 0x169   : > { %v1116_v6 = vpack.c.bf16 %v1248_v4, %v617_v5 }
 0x16b   : > { %1117 = vst [vmem:[%s1471_s29] sm:$0xff] %v1116_v6   ;;  %v1272_v7 = vpop.f32.mrb[0].mxu1 }
 0x16c   : > { %v697_v8 = vpop.f32.mrb[1].mxu1 }
 0x16d   : > { %v1156_v9 = vpack.c.bf16 %v1272_v7, %v697_v8 }
 0x16f   : > { %1200 = vst [vmem:[%s1471_s29 + $0x40] sm:$0xff] %v1156_v9  }
 0x172   : > { %v1251_v10 = vpop.f32.mrb[2].mxu0  ;;  %v1275_v11 = vpop.f32.mrb[2].mxu1 }
 0x173   : > { %v627_v12 = vpop.f32.mrb[3].mxu0  ;;  %v707_v13 = vpop.f32.mrb[3].mxu1 }
 0x174   : > { %v1121_v14 = vpack.c.bf16 %v1251_v10, %v627_v12  ;;  %v1161_v15 = vpack.c.bf16 %v1275_v11, %v707_v13 }
 0x176   : > { %1193 = vst [vmem:[%s1471_s29 + $0x8] sm:$0xff] %v1121_v14   ;;  %1201 = vst [vmem:[%s1471_s29 + $0x48] sm:$0xff] %v1161_v15  }
 0x17a   : > { %v1254_v16 = vpop.f32.mrb[4].mxu0  ;;  %v1278_v17 = vpop.f32.mrb[4].mxu1 }
 0x17b   : > { %v637_v18 = vpop.f32.mrb[5].mxu0  ;;  %v717_v19 = vpop.f32.mrb[5].mxu1 }
 0x17c   : > { %v1126_v20 = vpack.c.bf16 %v1254_v16, %v637_v18  ;;  %v1166_v21 = vpack.c.bf16 %v1278_v17, %v717_v19 }
 0x17e   : > { %1194 = vst [vmem:[%s1471_s29 + $0x10] sm:$0xff] %v1126_v20   ;;  %1202 = vst [vmem:[%s1471_s29 + $0x50] sm:$0xff] %v1166_v21  }
 0x182   : > { %v1257_v22 = vpop.f32.mrb[6].mxu0  ;;  %v1281_v23 = vpop.f32.mrb[6].mxu1 }
 0x183   : > { %v647_v24 = vpop.f32.mrb[7].mxu0  ;;  %v727_v25 = vpop.f32.mrb[7].mxu1 }
 0x184   : > { %v1131_v26 = vpack.c.bf16 %v1257_v22, %v647_v24  ;;  %v1171_v27 = vpack.c.bf16 %v1281_v23, %v727_v25 }
 0x186   : > { %1195 = vst [vmem:[%s1471_s29 + $0x18] sm:$0xff] %v1131_v26   ;;  %1203 = vst [vmem:[%s1471_s29 + $0x58] sm:$0xff] %v1171_v27  }
 0x18a   : > { %v1260_v28 = vpop.f32.mrb[8].mxu0  ;;  %v1284_v29 = vpop.f32.mrb[8].mxu1 }
 0x18b   : > { %v657_v30 = vpop.f32.mrb[9].mxu0  ;;  %v737_v31 = vpop.f32.mrb[9].mxu1 }
 0x18c   : > { %v1136_v32 = vpack.c.bf16 %v1260_v28, %v657_v30  ;;  %v1176_v33 = vpack.c.bf16 %v1284_v29, %v737_v31 }
 0x18e   : > { %1196 = vst [vmem:[%s1471_s29 + $0x20] sm:$0xff] %v1136_v32   ;;  %1204 = vst [vmem:[%s1471_s29 + $0x60] sm:$0xff] %v1176_v33  }
 0x192   : > { %v1263_v34 = vpop.f32.mrb[10].mxu0  ;;  %v1287_v35 = vpop.f32.mrb[10].mxu1 }
 0x193   : > { %v667_v36 = vpop.f32.mrb[11].mxu0  ;;  %v747_v37 = vpop.f32.mrb[11].mxu1 }
 0x194   : > { %v1141_v38 = vpack.c.bf16 %v1263_v34, %v667_v36  ;;  %v1181_v39 = vpack.c.bf16 %v1287_v35, %v747_v37 }
 0x196   : > { %1197 = vst [vmem:[%s1471_s29 + $0x28] sm:$0xff] %v1141_v38   ;;  %1205 = vst [vmem:[%s1471_s29 + $0x68] sm:$0xff] %v1181_v39  }
 0x19a   : > { %v1266_v40 = vpop.f32.mrb[12].mxu0  ;;  %v1290_v41 = vpop.f32.mrb[12].mxu1 }
 0x19b   : > { %v677_v42 = vpop.f32.mrb[13].mxu0  ;;  %v757_v43 = vpop.f32.mrb[13].mxu1 }
 0x19c   : > { %v1146_v44 = vpack.c.bf16 %v1266_v40, %v677_v42  ;;  %v1186_v45 = vpack.c.bf16 %v1290_v41, %v757_v43 }
 0x19e   : > { %1198 = vst [vmem:[%s1471_s29 + $0x30] sm:$0xff] %v1146_v44   ;;  %1206 = vst [vmem:[%s1471_s29 + $0x70] sm:$0xff] %v1186_v45  }
 0x1a2   : > { %v1269_v46 = vpop.f32.mrb[14].mxu0  ;;  %v1293_v47 = vpop.f32.mrb[14].mxu1 }
 0x1a3   : > { %v687_v48 = vpop.f32.mrb[15].mxu0  ;;  %v767_v49 = vpop.f32.mrb[15].mxu1 }
 0x1a4   : > { %v1151_v50 = vpack.c.bf16 %v1269_v46, %v687_v48  ;;  %v1191_v51 = vpack.c.bf16 %v1293_v47, %v767_v49 }
 0x1a6   : > { %1199 = vst [vmem:[%s1471_s29 + $0x38] sm:$0xff] %v1151_v50   ;;  %1207 = vst [vmem:[%s1471_s29 + $0x78] sm:$0xff] %v1191_v51  }
 0x1a7 PF: > { %s13_s12 = sadd.s32 1, %s1317_s12  }
 0x1a8   : > { %p10_p4 = scmp.ge.s32.totalorder %s13_s12, 4  }
 0x1aa   :  { %12 = sbr.rel (!%p10_p4) target bundleno = 1 (0x1), region = 65 }

// kernel: gcn_node_classifier_forward.5
= control target key start
LH: loop header
LB: loop body
LE: loop exit
PB: predicated region body
PF: predicated region fallthrough
CT: control target
= control target key end

     0   :  { %s1905_s15 = smov 0   ;;  %s1907_s16 = smov 0   ;;  %s2227_s0 = inlined_call_operand.vmem [shape: bf16[512,512], index: 0, kind: input, shape index: {}]   ;;  %s2228_s1 = inlined_call_operand.vmem [shape: bf16[512,128], index: 1, kind: input, shape index: {}]   ;;  %s2229_s2 = inlined_call_operand.vmem [shape: f32[512,1], index: 2, kind: input, shape index: {}]   ;;  %s2230_s3 = inlined_call_operand.vmem [shape: f32[1,128], index: 3, kind: input, shape index: {}]   ;;  %s2231_s4 = inlined_call_operand.vmem [shape: f32[512,128], index: 4, kind: output, shape index: {}]  }
   0x1   :  { %s1909_s17 = smov 0   ;;  %s1911_s18 = smov 0  }
   0x2   :  { %s1913_s19 = smov 0   ;;  %s1915_s20 = smov 0  }
   0x3   :  { %s1917_s21 = smov 0  }
   0x4 LB: > { %s23_s22 = sadd.s32 1, %s1868_s19  ;;  %s26_s23 = sadd.s32 1, %s1872_s20  ;;  %s1876_s21 = sphi %s1917_s21, %s14_s21   ;;  %s1872_s20 = sphi %s1915_s20, %s2237_s20   ;;  %s1868_s19 = sphi %s1913_s19, %s2236_s19   ;;  %s1864_s18 = sphi %s1911_s18, %s2235_s18   ;;  %s1860_s17 = sphi %s1909_s17, %s2234_s17   ;;  %s1856_s16 = sphi %s1907_s16, %s2233_s16   ;;  %s1852_s15 = sphi %s1905_s15, %s2232_s15  }
   0x5   : > { %p24_p0 = scmp.ge.s32.totalorder %s23_s22, 2  ;;  %p42_p1 = scmp.ne.s32.totalorder %s1856_s16, %s1852_s15 }
   0x6   : > { %p43_p2 = scmp.eq.s32.totalorder %s1876_s21, 0  ;;  %s35_s27 = sadd.s32 1, %s1856_s16 }
   0x7   : > { %s2239_s22 = smov (%p24_p0, %s23_s22), 0  ;;  %s2241_s23 = smov (!%p24_p0, %s26_s23), %s1872_s20 }
   0x8   : > { %p44_p3 = por %p43_p2, %p42_p1  ;;  %p28_p4 = scmp.ge.s32.totalorder %s2241_s23, 2 }
   0x9   : > { %s31_s24 = ssub.s32 %s1868_s19, %s2239_s22  ;;  %p1502_p6 = scmp.ge.s32.totalorder %s1876_s21, 4 }
   0xa   : > { %s2243_s23 = smov (%p28_p4, %s2241_s23), 0 }
   0xb   : > { %s30_s25 = ssub.s32 %s1872_s20, %s2243_s23  ;;  %170 = sbr.rel (%p1502_p6) target bundleno = 41 (0x29), region = 20 }
   0xc   : > { %s32_s26 = sor.u32 %s31_s24, %s30_s25 }
   0xd   : > { %p33_p5 = scmp.eq.s32.totalorder %s32_s26, 0 }
   0xf   : > { %s1956_s28 = scalar_select %p33_p5, %s1856_s16, %s35_s27  }
  0x12   : > { %173 = sbr.rel (!%p44_p3) target bundleno = 41 (0x29), region = 24  ;;  %s175_s29 = sand.u32 (%p44_p3), 1, %s1856_s16  }
  0x13   : > { %s1505_s30 = sshll.u32 (%p44_p3), %s1868_s19, 1  ;;  %s1503_s5 = sshll.u32 (%p44_p3), %s175_s29, 8 }
  0x14   : > { %s1569_s6 = sshll.u32 (%p44_p3), %s1872_s20, 7  ;;  %s1970_s12 = scalar_lea.vmem (%p44_p3), [#allocation3], %s1503_s5 }
  0x15   : > { %s181_s7 = sadd.s32 (%p44_p3), %s1569_s6, %s1505_s30 }
  0x16   : > { %s1507_s8 = sshll.u32 (%p44_p3), %s181_s7, 2 }
  0x17   : > { %s1965_s11 = scalar_lea.vmem (%p44_p3), %s2227_s0, %s1507_s8 }
  0x18   : > { %v273_v0 = vld [vmem:[%s1965_s11] sm:$0xff] (%p44_p3)  ;;  %v275_v1 = vld [vmem:[%s1965_s11 + $0x10] sm:$0xff] (%p44_p3) }
  0x19   : > { %v277_v2 = vld [vmem:[%s1965_s11 + $0x20] sm:$0xff]  ;;  %274 = vst [vmem:[%s1970_s12] sm:$0xff] %v273_v0  ;;  %276 = vst [vmem:[%s1970_s12 + $0x8] sm:$0xff] %v275_v1  ;;  %v279_v3 = vld [vmem:[%s1965_s11 + $0x30] sm:$0xff] }
  0x1a   : > { %278 = vst [vmem:[%s1970_s12 + $0x10] sm:$0xff] %v277_v2  ;;  %v281_v4 = vld [vmem:[%s1965_s11 + $0x40] sm:$0xff]  ;;  %v283_v5 = vld [vmem:[%s1965_s11 + $0x50] sm:$0xff]  ;;  %280 = vst [vmem:[%s1970_s12 + $0x18] sm:$0xff] %v279_v3 }
  0x1b   : > { %282 = vst [vmem:[%s1970_s12 + $0x20] sm:$0xff] %v281_v4  ;;  %284 = vst [vmem:[%s1970_s12 + $0x28] sm:$0xff] %v283_v5  ;;  %v285_v6 = vld [vmem:[%s1965_s11 + $0x60] sm:$0xff]  ;;  %v287_v7 = vld [vmem:[%s1965_s11 + $0x70] sm:$0xff] }
  0x1c   : > { %v289_v8 = vld [vmem:[%s1965_s11 + $0x80] sm:$0xff]  ;;  %286 = vst [vmem:[%s1970_s12 + $0x30] sm:$0xff] %v285_v6  ;;  %288 = vst [vmem:[%s1970_s12 + $0x38] sm:$0xff] %v287_v7  ;;  %v291_v9 = vld [vmem:[%s1965_s11 + $0x90] sm:$0xff] }
  0x1d   : > { %290 = vst [vmem:[%s1970_s12 + $0x40] sm:$0xff] %v289_v8  ;;  %v293_v10 = vld [vmem:[%s1965_s11 + $0xa0] sm:$0xff]  ;;  %v295_v11 = vld [vmem:[%s1965_s11 + $0xb0] sm:$0xff]  ;;  %292 = vst [vmem:[%s1970_s12 + $0x48] sm:$0xff] %v291_v9 }
  0x1e   : > { %294 = vst [vmem:[%s1970_s12 + $0x50] sm:$0xff] %v293_v10  ;;  %296 = vst [vmem:[%s1970_s12 + $0x58] sm:$0xff] %v295_v11  ;;  %v297_v12 = vld [vmem:[%s1965_s11 + $0xc0] sm:$0xff]  ;;  %v299_v13 = vld [vmem:[%s1965_s11 + $0xd0] sm:$0xff] }
  0x1f   : > { %v301_v14 = vld [vmem:[%s1965_s11 + $0xe0] sm:$0xff]  ;;  %298 = vst [vmem:[%s1970_s12 + $0x60] sm:$0xff] %v297_v12  ;;  %300 = vst [vmem:[%s1970_s12 + $0x68] sm:$0xff] %v299_v13  ;;  %v303_v15 = vld [vmem:[%s1965_s11 + $0xf0] sm:$0xff] }
  0x20   : > { %302 = vst [vmem:[%s1970_s12 + $0x70] sm:$0xff] %v301_v14  ;;  %v305_v16 = vld [vmem:[%s1965_s11 + $0x100] sm:$0xff]  ;;  %v307_v17 = vld [vmem:[%s1965_s11 + $0x110] sm:$0xff]  ;;  %304 = vst [vmem:[%s1970_s12 + $0x78] sm:$0xff] %v303_v15 }
  0x21   : > { %306 = vst [vmem:[%s1970_s12 + $0x80] sm:$0xff] %v305_v16  ;;  %308 = vst [vmem:[%s1970_s12 + $0x88] sm:$0xff] %v307_v17  ;;  %v309_v18 = vld [vmem:[%s1965_s11 + $0x120] sm:$0xff]  ;;  %v311_v19 = vld [vmem:[%s1965_s11 + $0x130] sm:$0xff] }
  0x22   : > { %v313_v20 = vld [vmem:[%s1965_s11 + $0x140] sm:$0xff]  ;;  %310 = vst [vmem:[%s1970_s12 + $0x90] sm:$0xff] %v309_v18  ;;  %312 = vst [vmem:[%s1970_s12 + $0x98] sm:$0xff] %v311_v19  ;;  %v315_v21 = vld [vmem:[%s1965_s11 + $0x150] sm:$0xff] }
  0x23   : > { %314 = vst [vmem:[%s1970_s12 + $0xa0] sm:$0xff] %v313_v20  ;;  %v317_v22 = vld [vmem:[%s1965_s11 + $0x160] sm:$0xff]  ;;  %v319_v23 = vld [vmem:[%s1965_s11 + $0x170] sm:$0xff]  ;;  %316 = vst [vmem:[%s1970_s12 + $0xa8] sm:$0xff] %v315_v21 }
  0x24   : > { %318 = vst [vmem:[%s1970_s12 + $0xb0] sm:$0xff] %v317_v22  ;;  %320 = vst [vmem:[%s1970_s12 + $0xb8] sm:$0xff] %v319_v23  ;;  %v321_v24 = vld [vmem:[%s1965_s11 + $0x180] sm:$0xff]  ;;  %v323_v25 = vld [vmem:[%s1965_s11 + $0x190] sm:$0xff] }
  0x25   : > { %v325_v26 = vld [vmem:[%s1965_s11 + $0x1a0] sm:$0xff]  ;;  %322 = vst [vmem:[%s1970_s12 + $0xc0] sm:$0xff] %v321_v24  ;;  %324 = vst [vmem:[%s1970_s12 + $0xc8] sm:$0xff] %v323_v25  ;;  %v327_v27 = vld [vmem:[%s1965_s11 + $0x1b0] sm:$0xff] }
  0x26   : > { %326 = vst [vmem:[%s1970_s12 + $0xd0] sm:$0xff] %v325_v26  ;;  %v329_v28 = vld [vmem:[%s1965_s11 + $0x1c0] sm:$0xff]  ;;  %v331_v29 = vld [vmem:[%s1965_s11 + $0x1d0] sm:$0xff]  ;;  %328 = vst [vmem:[%s1970_s12 + $0xd8] sm:$0xff] %v327_v27 }
  0x27   : > { %330 = vst [vmem:[%s1970_s12 + $0xe0] sm:$0xff] %v329_v28  ;;  %332 = vst [vmem:[%s1970_s12 + $0xe8] sm:$0xff] %v331_v29  ;;  %v333_v30 = vld [vmem:[%s1965_s11 + $0x1e0] sm:$0xff]  ;;  %v335_v31 = vld [vmem:[%s1965_s11 + $0x1f0] sm:$0xff] }
  0x28   : > { %334 = vst [vmem:[%s1970_s12 + $0xf0] sm:$0xff] %v333_v30  ;;  %336 = vst [vmem:[%s1970_s12 + $0xf8] sm:$0xff] %v335_v31 }
  0x29 PF: > { %p1508_p7 = scmp.ge.s32.totalorder %s1876_s21, 1  ;;  %p359_p8 = scmp.lt.s32.totalorder %s1876_s21, 5 }
  0x2b   : > { %p360_p9 = pnand %p1508_p7, %p359_p8 }
  0x2c   : > { %s366_s13 = sand.u32 (!%p360_p9), 1, %s1852_s15   ;;  %s1510_s14 = sshll.u32 (!%p360_p9), %s1860_s17, 5 }
  0x2d   : > { %363 = sbr.rel (%p360_p9) target bundleno = 551 (0x227), region = 70  ;;  %s1509_s24 = sshll.u32 (!%p360_p9), %s366_s13, 8 }
  0x2e   : > { %p404_p10 = scmp.lt.s32.totalorder (!%p360_p9), %s1510_s14, 63  ;;  %s1512_s25 = sshll.u32 (!%p360_p9), %s1864_s18, 5 }
  0x2f   : > { %p410_p11 = scmp.lt.s32.totalorder (!%p360_p9), %s1512_s25, 63  ;;  %s2053_s18 = scalar_lea.vmem (!%p360_p9), [#allocation3], %s1509_s24 }
  0x30   : > { %p1516_p12 = scmp.ne.s32.totalorder (!%p360_p9), %s1860_s17, 0 }
  0x34   : > { %s2245_s14 = smov (!%p404_p10, %s1510_s14), 63  ;;  %s2247_s25 = smov (!%p410_p11, %s1512_s25), 63 }
  0x35   : > { %s1511_s26 = sshll.u32 %s2245_s14, 2  ;;  %s1513_s5 = sshll.u32 %s2247_s25, 3  ;;  %v1878_v32 = vmov (!%p1516_p12), 0.0  }
  0x36   : > { %s2041_s30 = scalar_lea.vmem %s2228_s1, %s1511_s26  ;;  %s2046_s8 = scalar_lea.vmem %s2229_s2, %s1513_s5  ;;  %426 = vst [vmem:[#allocation2] sm:$0xff] (!%p1516_p12), %v1878_v32  ;;  %427 = vst [vmem:[#allocation2 + $0x8] sm:$0xff] (!%p1516_p12), %v1878_v32 }
  0x37   : > { %s2051_s10 = scalar_lea.vmem %s2231_s4, %s1513_s5  ;;  %425 = sbr.rel (%p1516_p12) target bundleno = 70 (0x46), region = 78  ;;  %428 = vst [vmem:[#allocation2 + $0x10] sm:$0xff] (!%p1516_p12), %v1878_v32  ;;  %429 = vst [vmem:[#allocation2 + $0x18] sm:$0xff] (!%p1516_p12), %v1878_v32 }
  0x38   : > { %430 = vst [vmem:[#allocation2 + $0x20] sm:$0xff] (!%p1516_p12), %v1878_v32  ;;  %431 = vst [vmem:[#allocation2 + $0x28] sm:$0xff] (!%p1516_p12), %v1878_v32 }
  0x39   : > { %432 = vst [vmem:[#allocation2 + $0x30] sm:$0xff] (!%p1516_p12), %v1878_v32  ;;  %433 = vst [vmem:[#allocation2 + $0x38] sm:$0xff] (!%p1516_p12), %v1878_v32 }
  0x3a   : > { %434 = vst [vmem:[#allocation2 + $0x40] sm:$0xff] (!%p1516_p12), %v1878_v32  ;;  %435 = vst [vmem:[#allocation2 + $0x48] sm:$0xff] (!%p1516_p12), %v1878_v32 }
  0x3b   : > { %436 = vst [vmem:[#allocation2 + $0x50] sm:$0xff] (!%p1516_p12), %v1878_v32  ;;  %437 = vst [vmem:[#allocation2 + $0x58] sm:$0xff] (!%p1516_p12), %v1878_v32 }
  0x3c   : > { %438 = vst [vmem:[#allocation2 + $0x60] sm:$0xff] (!%p1516_p12), %v1878_v32  ;;  %439 = vst [vmem:[#allocation2 + $0x68] sm:$0xff] (!%p1516_p12), %v1878_v32 }
  0x3d   : > { %440 = vst [vmem:[#allocation2 + $0x70] sm:$0xff] (!%p1516_p12), %v1878_v32  ;;  %441 = vst [vmem:[#allocation2 + $0x78] sm:$0xff] (!%p1516_p12), %v1878_v32 }
  0x3e   : > { %442 = vst [vmem:[#allocation2 + $0x80] sm:$0xff] %v1878_v32  ;;  %443 = vst [vmem:[#allocation2 + $0x88] sm:$0xff] %v1878_v32 }
  0x3f   : > { %444 = vst [vmem:[#allocation2 + $0x90] sm:$0xff] %v1878_v32  ;;  %445 = vst [vmem:[#allocation2 + $0x98] sm:$0xff] %v1878_v32 }
  0x40   : > { %446 = vst [vmem:[#allocation2 + $0xa0] sm:$0xff] %v1878_v32  ;;  %447 = vst [vmem:[#allocation2 + $0xa8] sm:$0xff] %v1878_v32 }
  0x41   : > { %448 = vst [vmem:[#allocation2 + $0xb0] sm:$0xff] %v1878_v32  ;;  %449 = vst [vmem:[#allocation2 + $0xb8] sm:$0xff] %v1878_v32 }
  0x42   : > { %450 = vst [vmem:[#allocation2 + $0xc0] sm:$0xff] %v1878_v32  ;;  %451 = vst [vmem:[#allocation2 + $0xc8] sm:$0xff] %v1878_v32 }
  0x43   : > { %452 = vst [vmem:[#allocation2 + $0xd0] sm:$0xff] %v1878_v32  ;;  %453 = vst [vmem:[#allocation2 + $0xd8] sm:$0xff] %v1878_v32 }
  0x44   : > { %454 = vst [vmem:[#allocation2 + $0xe0] sm:$0xff] %v1878_v32  ;;  %455 = vst [vmem:[#allocation2 + $0xe8] sm:$0xff] %v1878_v32 }
  0x45   : > { %456 = vst [vmem:[#allocation2 + $0xf0] sm:$0xff] %v1878_v32  ;;  %457 = vst [vmem:[#allocation2 + $0xf8] sm:$0xff] %v1878_v32 }
  0x46 PF: > { %v1756_v33 = vld [vmem:[%s2041_s30 + $0x40] sm:$0xff]   ;;  %v1758_v35 = vld [vmem:[%s2041_s30 + $0x48] sm:$0xff]   ;;  %v1760_v37 = vld [vmem:[%s2041_s30 + $0x50] sm:$0xff]   ;;  %p1565_p13 = scmp.ne.s32.totalorder %s1860_s17, 1 }
  0x47   : > { %v1757_v34 = vld [vmem:[%s2041_s30] sm:$0xff]   ;;  %1570 = vmatprep.subr.bf16.mxu0 %v1756_v33  ;;  %1682 = vmatprep.subr.bf16.mxu1 %v1756_v33  ;;  %v1759_v36 = vld [vmem:[%s2041_s30 + $0x8] sm:$0xff]   ;;  %v1761_v38 = vld [vmem:[%s2041_s30 + $0x10] sm:$0xff]  }
  0x48   : > { %1571 = vmatpush3.bf16.msra.mxu0 %v1757_v34  ;;  %1690 = vmatpush3.bf16.msra.mxu1 %v1757_v34  ;;  %v1762_v39 = vld [vmem:[%s2041_s30 + $0x58] sm:$0xff]   ;;  %v1764_v41 = vld [vmem:[%s2041_s30 + $0x60] sm:$0xff]   ;;  %v1766_v43 = vld [vmem:[%s2041_s30 + $0x68] sm:$0xff]  }
  0x49   : > { %1572 = vmatprep.subr.bf16.mxu0 %v1758_v35  ;;  %1683 = vmatprep.subr.bf16.mxu1 %v1758_v35  ;;  %v1763_v40 = vld [vmem:[%s2041_s30 + $0x18] sm:$0xff]   ;;  %v1765_v42 = vld [vmem:[%s2041_s30 + $0x20] sm:$0xff]   ;;  %v1767_v46 = vld [vmem:[%s2041_s30 + $0x28] sm:$0xff]  }
  0x4a   : > { %v1774_v44 = vld [vmem:[%s2053_s18 + $0x4] ss:$8 sps:$4 sm:$0xff]   ;;  %v1768_v47 = vld [vmem:[%s2041_s30 + $0x70] sm:$0xff]   ;;  %v1770_v49 = vld [vmem:[%s2041_s30 + $0x78] sm:$0xff]  }
  0x4b   : > { %v1777_v45 = vld [vmem:[%s2053_s18 + $0x84] ss:$8 sps:$4 sm:$0xff]   ;;  %842 = vmatprep.mubr.bf16.mxu0 %v1774_v44  ;;  %v1769_v48 = vld [vmem:[%s2041_s30 + $0x30] sm:$0xff]   ;;  %v1771_v50 = vld [vmem:[%s2041_s30 + $0x38] sm:$0xff]  }
  0x4c   : > { %1573 = vmatpush3.bf16.msra.mxu0 %v1759_v36  ;;  %1691 = vmatpush3.bf16.msra.mxu1 %v1759_v36  ;;  %v1772_v51 = vld [vmem:[%s2053_s18] ss:$8 sps:$4 sm:$0xff]   ;;  %v1778_v53 = vld [vmem:[%s2053_s18 + $0x14] ss:$8 sps:$4 sm:$0xff]   ;;  %v1782_v55 = vld [vmem:[%s2053_s18 + $0x10] ss:$8 sps:$4 sm:$0xff]  }
  0x4d   : > { %1574 = vmatprep.subr.bf16.mxu0 %v1760_v37  ;;  %1684 = vmatprep.subr.bf16.mxu1 %v1760_v37  ;;  %v1775_v52 = vld [vmem:[%s2053_s18 + $0x80] ss:$8 sps:$4 sm:$0xff]   ;;  %v1780_v54 = vld [vmem:[%s2053_s18 + $0x94] ss:$8 sps:$4 sm:$0xff]   ;;  %v1783_v56 = vld [vmem:[%s2053_s18 + $0x90] ss:$8 sps:$4 sm:$0xff]  }
  0x4e   : > { %906 = vmatprep.mubr.bf16.mxu1 %v1777_v45  ;;  %v1784_v57 = vld [vmem:[%s2053_s18 + $0x24] ss:$8 sps:$4 sm:$0xff]   ;;  %v1788_v59 = vld [vmem:[%s2053_s18 + $0x20] ss:$8 sps:$4 sm:$0xff]   ;;  %v1790_v61 = vld [vmem:[%s2053_s18 + $0x34] ss:$8 sps:$4 sm:$0xff]  }
  0x4f   : > { %v1786_v58 = vld [vmem:[%s2053_s18 + $0xa4] ss:$8 sps:$4 sm:$0xff]   ;;  %v1789_v60 = vld [vmem:[%s2053_s18 + $0xa0] ss:$8 sps:$4 sm:$0xff]   ;;  %v1792_v62 = vld [vmem:[%s2053_s18 + $0xb4] ss:$8 sps:$4 sm:$0xff]  }
  0x50   : > { %1575 = vmatpush3.bf16.msra.mxu0 %v1761_v38  ;;  %1692 = vmatpush3.bf16.msra.mxu1 %v1761_v38  ;;  %v1794_v63 = vld [vmem:[%s2053_s18 + $0x30] ss:$8 sps:$4 sm:$0xff]   ;;  %v1796_v1 = vld [vmem:[%s2053_s18 + $0x44] ss:$8 sps:$4 sm:$0xff]   ;;  %v1800_v3 = vld [vmem:[%s2053_s18 + $0x40] ss:$8 sps:$4 sm:$0xff]  }
  0x51   : > { %1576 = vmatprep.subr.bf16.mxu0 %v1762_v39  ;;  %1685 = vmatprep.subr.bf16.mxu1 %v1762_v39  ;;  %v1795_v0 = vld [vmem:[%s2053_s18 + $0xb0] ss:$8 sps:$4 sm:$0xff]   ;;  %v1798_v2 = vld [vmem:[%s2053_s18 + $0xc4] ss:$8 sps:$4 sm:$0xff]   ;;  %v1801_v4 = vld [vmem:[%s2053_s18 + $0xc0] ss:$8 sps:$4 sm:$0xff]  }
  0x52   : > { %v1802_v5 = vld [vmem:[%s2053_s18 + $0x54] ss:$8 sps:$4 sm:$0xff]   ;;  %v1806_v7 = vld [vmem:[%s2053_s18 + $0x50] ss:$8 sps:$4 sm:$0xff]   ;;  %v1808_v9 = vld [vmem:[%s2053_s18 + $0x64] ss:$8 sps:$4 sm:$0xff]  }
  0x53   : > { %v1804_v6 = vld [vmem:[%s2053_s18 + $0xd4] ss:$8 sps:$4 sm:$0xff]   ;;  %v1807_v8 = vld [vmem:[%s2053_s18 + $0xd0] ss:$8 sps:$4 sm:$0xff]   ;;  %v1810_v10 = vld [vmem:[%s2053_s18 + $0xe4] ss:$8 sps:$4 sm:$0xff]  }
  0x54   : > { %1577 = vmatpush3.bf16.msra.mxu0 %v1763_v40  ;;  %1693 = vmatpush3.bf16.msra.mxu1 %v1763_v40  ;;  %v1812_v11 = vld [vmem:[%s2053_s18 + $0x60] ss:$8 sps:$4 sm:$0xff]   ;;  %v1814_v13 = vld [vmem:[%s2053_s18 + $0x74] ss:$8 sps:$4 sm:$0xff]   ;;  %v1818_v15 = vld [vmem:[%s2053_s18 + $0x70] ss:$8 sps:$4 sm:$0xff]  }
  0x55   : > { %1578 = vmatprep.subr.bf16.mxu0 %v1764_v41  ;;  %1686 = vmatprep.subr.bf16.mxu1 %v1764_v41  ;;  %v1813_v12 = vld [vmem:[%s2053_s18 + $0xe0] ss:$8 sps:$4 sm:$0xff]   ;;  %v1816_v14 = vld [vmem:[%s2053_s18 + $0xf4] ss:$8 sps:$4 sm:$0xff]   ;;  %v1819_v16 = vld [vmem:[%s2053_s18 + $0xf0] ss:$8 sps:$4 sm:$0xff]  }
  0x56   : > { %v458_v19 = vld [vmem:[#allocation2] sm:$0xff]  ;;  %v459_v27 = vld [vmem:[#allocation2 + $0x8] sm:$0xff]  ;;  %v460_v39 = vld [vmem:[#allocation2 + $0x10] sm:$0xff] }
  0x57   : > { %v474_v21 = vld [vmem:[#allocation2 + $0x80] sm:$0xff]  ;;  %v475_v29 = vld [vmem:[#allocation2 + $0x88] sm:$0xff]  ;;  %v476_v41 = vld [vmem:[#allocation2 + $0x90] sm:$0xff] }
  0x58   : > { %1579 = vmatpush3.bf16.msra.mxu0 %v1765_v42  ;;  %1694 = vmatpush3.bf16.msra.mxu1 %v1765_v42 }
  0x59   : > { %1580 = vmatprep.subr.bf16.mxu0 %v1766_v43  ;;  %1687 = vmatprep.subr.bf16.mxu1 %v1766_v43 }
  0x5c   : > { %1581 = vmatpush3.bf16.msra.mxu0 %v1767_v46  ;;  %1695 = vmatpush3.bf16.msra.mxu1 %v1767_v46 }
  0x5d   : > { %1582 = vmatprep.subr.bf16.mxu0 %v1768_v47  ;;  %1688 = vmatprep.subr.bf16.mxu1 %v1768_v47  ;;  %v461_v47 = vld [vmem:[#allocation2 + $0x18] sm:$0xff] }
  0x60   : > { %1583 = vmatpush3.bf16.msra.mxu0 %v1769_v48  ;;  %1696 = vmatpush3.bf16.msra.mxu1 %v1769_v48 }
  0x61   : > { %1584 = vmatprep.subr.bf16.mxu0 %v1770_v49  ;;  %1689 = vmatprep.subr.bf16.mxu1 %v1770_v49  ;;  %v477_v49 = vld [vmem:[#allocation2 + $0x98] sm:$0xff] }
  0x64   : > { %1585 = vmatpush3.bf16.msra.mxu0 %v1771_v50  ;;  %1697 = vmatpush3.bf16.msra.mxu1 %v1771_v50 }
  0x67   : > { %843 = vmatmul.mubr.bf16.vlgmr.msra.gmra.mrb[0].mxu0 %v1772_v51  ;;  %907 = vmatmul.mubr.bf16.vlgmr.msra.gmra.mrb[0].mxu1 %v1775_v52 }
  0x68   : > { %850 = vmatprep.mubr.bf16.mxu0 %v1778_v53  ;;  %914 = vmatprep.mubr.bf16.mxu1 %v1780_v54 }
  0x6f   : > { %851 = vmatmul.mubr.bf16.gmra.mrb[4].mxu0 %v1782_v55  ;;  %915 = vmatmul.mubr.bf16.gmra.mrb[4].mxu1 %v1783_v56 }
  0x70   : > { %858 = vmatprep.mubr.bf16.mxu0 %v1784_v57  ;;  %922 = vmatprep.mubr.bf16.mxu1 %v1786_v58 }
  0x77   : > { %859 = vmatmul.mubr.bf16.gmra.mrb[8].mxu0 %v1788_v59  ;;  %923 = vmatmul.mubr.bf16.gmra.mrb[8].mxu1 %v1789_v60  ;;  %v462_v59 = vld [vmem:[#allocation2 + $0x20] sm:$0xff] }
  0x78   : > { %866 = vmatprep.mubr.bf16.mxu0 %v1790_v61  ;;  %930 = vmatprep.mubr.bf16.mxu1 %v1792_v62  ;;  %v478_v61 = vld [vmem:[#allocation2 + $0xa0] sm:$0xff] }
  0x7f   : > { %867 = vmatmul.mubr.bf16.gmra.mrb[12].mxu0 %v1794_v63  ;;  %931 = vmatmul.mubr.bf16.gmra.mrb[12].mxu1 %v1795_v0 }
  0x80   : > { %874 = vmatprep.mubr.bf16.mxu0 %v1796_v1  ;;  %938 = vmatprep.mubr.bf16.mxu1 %v1798_v2 }
  0x87   : > { %875 = vmatmul.mubr.bf16.gmra.mrb[16].mxu0 %v1800_v3  ;;  %939 = vmatmul.mubr.bf16.gmra.mrb[16].mxu1 %v1801_v4  ;;  %v463_v3 = vld [vmem:[#allocation2 + $0x28] sm:$0xff] }
  0x88   : > { %882 = vmatprep.mubr.bf16.mxu0 %v1802_v5  ;;  %946 = vmatprep.mubr.bf16.mxu1 %v1804_v6  ;;  %v479_v5 = vld [vmem:[#allocation2 + $0xa8] sm:$0xff] }
  0x8f   : > { %883 = vmatmul.mubr.bf16.gmra.mrb[20].mxu0 %v1806_v7  ;;  %947 = vmatmul.mubr.bf16.gmra.mrb[20].mxu1 %v1807_v8 }
  0x90   : > { %890 = vmatprep.mubr.bf16.mxu0 %v1808_v9  ;;  %954 = vmatprep.mubr.bf16.mxu1 %v1810_v10 }
  0x97   : > { %891 = vmatmul.mubr.bf16.gmra.mrb[24].mxu0 %v1812_v11  ;;  %955 = vmatmul.mubr.bf16.gmra.mrb[24].mxu1 %v1813_v12 }
  0x98   : > { %898 = vmatprep.mubr.bf16.mxu0 %v1814_v13  ;;  %962 = vmatprep.mubr.bf16.mxu1 %v1816_v14 }
  0x9f   : > { %899 = vmatmul.mubr.bf16.gmra.mrb[28].mxu0 %v1818_v15  ;;  %963 = vmatmul.mubr.bf16.gmra.mrb[28].mxu1 %v1819_v16  ;;  %v464_v15 = vld [vmem:[#allocation2 + $0x30] sm:$0xff] }
 0x13a   : > { %v1586_v17 = vpop.f32.mrb[0].mxu0  ;;  %v1634_v18 = vpop.f32.mrb[0].mxu1 }
 0x13b   : > { %v1587_v20 = vpop.f32.mrb[1].mxu0  ;;  %v1635_v22 = vpop.f32.mrb[1].mxu1 }
 0x13c   : > { %v1588_v23 = vadd.f32 %v1587_v20, %v1586_v17  ;;  %v1636_v24 = vadd.f32 %v1635_v22, %v1634_v18  ;;  %v1589_v25 = vpop.f32.mrb[2].mxu0  ;;  %v1637_v26 = vpop.f32.mrb[2].mxu1  ;;  %v480_v17 = vld [vmem:[#allocation2 + $0xb0] sm:$0xff] }
 0x13d   : > { %v1590_v28 = vpop.f32.mrb[3].mxu0  ;;  %v1638_v30 = vpop.f32.mrb[3].mxu1 }
 0x13e   : > { %v971_v31 = vadd.f32 %v1588_v23, %v458_v19  ;;  %v987_v32 = vadd.f32 %v1636_v24, %v474_v21  ;;  %v1591_v33 = vadd.f32 %v1590_v28, %v1589_v25  ;;  %v1639_v34 = vadd.f32 %v1638_v30, %v1637_v26  ;;  %v465_v23 = vld [vmem:[#allocation2 + $0x38] sm:$0xff] }
 0x13f   : > { %v481_v25 = vld [vmem:[#allocation2 + $0xb8] sm:$0xff] }
 0x140   : > { %1003 = vst [vmem:[#allocation2] sm:$0xff] %v971_v31  ;;  %1019 = vst [vmem:[#allocation2 + $0x80] sm:$0xff] %v987_v32  ;;  %v972_v35 = vadd.f32 %v1591_v33, %v459_v27  ;;  %v988_v36 = vadd.f32 %v1639_v34, %v475_v29 }
 0x142   : > { %1004 = vst [vmem:[#allocation2 + $0x8] sm:$0xff] %v972_v35  ;;  %1020 = vst [vmem:[#allocation2 + $0x88] sm:$0xff] %v988_v36  ;;  %v1592_v37 = vpop.f32.mrb[4].mxu0  ;;  %v1640_v38 = vpop.f32.mrb[4].mxu1  ;;  %v466_v35 = vld [vmem:[#allocation2 + $0x40] sm:$0xff] }
 0x143   : > { %v1593_v40 = vpop.f32.mrb[5].mxu0  ;;  %v1641_v42 = vpop.f32.mrb[5].mxu1 }
 0x144   : > { %v1594_v43 = vadd.f32 %v1593_v40, %v1592_v37  ;;  %v1642_v44 = vadd.f32 %v1641_v42, %v1640_v38  ;;  %v1595_v45 = vpop.f32.mrb[6].mxu0  ;;  %v1643_v46 = vpop.f32.mrb[6].mxu1  ;;  %v482_v37 = vld [vmem:[#allocation2 + $0xc0] sm:$0xff] }
 0x145   : > { %v1596_v48 = vpop.f32.mrb[7].mxu0  ;;  %v1644_v50 = vpop.f32.mrb[7].mxu1 }
 0x146   : > { %v973_v51 = vadd.f32 %v1594_v43, %v460_v39  ;;  %v989_v52 = vadd.f32 %v1642_v44, %v476_v41  ;;  %v1597_v53 = vadd.f32 %v1596_v48, %v1595_v45  ;;  %v1645_v54 = vadd.f32 %v1644_v50, %v1643_v46  ;;  %v467_v43 = vld [vmem:[#allocation2 + $0x48] sm:$0xff] }
 0x147   : > { %v483_v45 = vld [vmem:[#allocation2 + $0xc8] sm:$0xff] }
 0x148   : > { %1005 = vst [vmem:[#allocation2 + $0x10] sm:$0xff] %v973_v51  ;;  %1021 = vst [vmem:[#allocation2 + $0x90] sm:$0xff] %v989_v52  ;;  %v974_v55 = vadd.f32 %v1597_v53, %v461_v47  ;;  %v990_v56 = vadd.f32 %v1645_v54, %v477_v49 }
 0x14a   : > { %1006 = vst [vmem:[#allocation2 + $0x18] sm:$0xff] %v974_v55  ;;  %1022 = vst [vmem:[#allocation2 + $0x98] sm:$0xff] %v990_v56  ;;  %v1598_v57 = vpop.f32.mrb[8].mxu0  ;;  %v1646_v58 = vpop.f32.mrb[8].mxu1  ;;  %v468_v55 = vld [vmem:[#allocation2 + $0x50] sm:$0xff] }
 0x14b   : > { %v1599_v60 = vpop.f32.mrb[9].mxu0  ;;  %v1647_v62 = vpop.f32.mrb[9].mxu1 }
 0x14c   : > { %v1600_v63 = vadd.f32 %v1599_v60, %v1598_v57  ;;  %v1648_v0 = vadd.f32 %v1647_v62, %v1646_v58  ;;  %v1601_v1 = vpop.f32.mrb[10].mxu0  ;;  %v1649_v2 = vpop.f32.mrb[10].mxu1  ;;  %v484_v57 = vld [vmem:[#allocation2 + $0xd0] sm:$0xff] }
 0x14d   : > { %v1602_v4 = vpop.f32.mrb[11].mxu0  ;;  %v1650_v6 = vpop.f32.mrb[11].mxu1 }
 0x14e   : > { %v975_v7 = vadd.f32 %v1600_v63, %v462_v59  ;;  %v991_v8 = vadd.f32 %v1648_v0, %v478_v61  ;;  %v1603_v9 = vadd.f32 %v1602_v4, %v1601_v1  ;;  %v1651_v10 = vadd.f32 %v1650_v6, %v1649_v2  ;;  %v469_v63 = vld [vmem:[#allocation2 + $0x58] sm:$0xff] }
 0x14f   : > { %v485_v1 = vld [vmem:[#allocation2 + $0xd8] sm:$0xff] }
 0x150   : > { %1007 = vst [vmem:[#allocation2 + $0x20] sm:$0xff] %v975_v7  ;;  %1023 = vst [vmem:[#allocation2 + $0xa0] sm:$0xff] %v991_v8  ;;  %v976_v11 = vadd.f32 %v1603_v9, %v463_v3  ;;  %v992_v12 = vadd.f32 %v1651_v10, %v479_v5 }
 0x152   : > { %1008 = vst [vmem:[#allocation2 + $0x28] sm:$0xff] %v976_v11  ;;  %1024 = vst [vmem:[#allocation2 + $0xa8] sm:$0xff] %v992_v12  ;;  %v1604_v13 = vpop.f32.mrb[12].mxu0  ;;  %v1652_v14 = vpop.f32.mrb[12].mxu1  ;;  %v470_v11 = vld [vmem:[#allocation2 + $0x60] sm:$0xff] }
 0x153   : > { %v1605_v16 = vpop.f32.mrb[13].mxu0  ;;  %v1653_v18 = vpop.f32.mrb[13].mxu1 }
 0x154   : > { %v1606_v19 = vadd.f32 %v1605_v16, %v1604_v13  ;;  %v1654_v20 = vadd.f32 %v1653_v18, %v1652_v14  ;;  %v1607_v21 = vpop.f32.mrb[14].mxu0  ;;  %v1655_v22 = vpop.f32.mrb[14].mxu1  ;;  %v486_v13 = vld [vmem:[#allocation2 + $0xe0] sm:$0xff] }
 0x155   : > { %v1608_v24 = vpop.f32.mrb[15].mxu0  ;;  %v1656_v26 = vpop.f32.mrb[15].mxu1 }
 0x156   : > { %v977_v27 = vadd.f32 %v1606_v19, %v464_v15  ;;  %v993_v28 = vadd.f32 %v1654_v20, %v480_v17  ;;  %v1609_v29 = vadd.f32 %v1608_v24, %v1607_v21  ;;  %v1657_v30 = vadd.f32 %v1656_v26, %v1655_v22  ;;  %v471_v19 = vld [vmem:[#allocation2 + $0x68] sm:$0xff] }
 0x157   : > { %v487_v21 = vld [vmem:[#allocation2 + $0xe8] sm:$0xff] }
 0x158   : > { %1009 = vst [vmem:[#allocation2 + $0x30] sm:$0xff] %v977_v27  ;;  %1025 = vst [vmem:[#allocation2 + $0xb0] sm:$0xff] %v993_v28  ;;  %v978_v31 = vadd.f32 %v1609_v29, %v465_v23  ;;  %v994_v32 = vadd.f32 %v1657_v30, %v481_v25 }
 0x15a   : > { %1010 = vst [vmem:[#allocation2 + $0x38] sm:$0xff] %v978_v31  ;;  %1026 = vst [vmem:[#allocation2 + $0xb8] sm:$0xff] %v994_v32  ;;  %v1610_v33 = vpop.f32.mrb[16].mxu0  ;;  %v1658_v34 = vpop.f32.mrb[16].mxu1  ;;  %v472_v31 = vld [vmem:[#allocation2 + $0x70] sm:$0xff] }
 0x15b   : > { %v1611_v36 = vpop.f32.mrb[17].mxu0  ;;  %v1659_v38 = vpop.f32.mrb[17].mxu1 }
 0x15c   : > { %v1612_v39 = vadd.f32 %v1611_v36, %v1610_v33  ;;  %v1660_v40 = vadd.f32 %v1659_v38, %v1658_v34  ;;  %v1613_v41 = vpop.f32.mrb[18].mxu0  ;;  %v1661_v42 = vpop.f32.mrb[18].mxu1  ;;  %v488_v33 = vld [vmem:[#allocation2 + $0xf0] sm:$0xff] }
 0x15d   : > { %v1614_v44 = vpop.f32.mrb[19].mxu0  ;;  %v1662_v46 = vpop.f32.mrb[19].mxu1 }
 0x15e   : > { %v979_v47 = vadd.f32 %v1612_v39, %v466_v35  ;;  %v995_v48 = vadd.f32 %v1660_v40, %v482_v37  ;;  %v1615_v49 = vadd.f32 %v1614_v44, %v1613_v41  ;;  %v1663_v50 = vadd.f32 %v1662_v46, %v1661_v42  ;;  %v473_v39 = vld [vmem:[#allocation2 + $0x78] sm:$0xff] }
 0x15f   : > { %v489_v41 = vld [vmem:[#allocation2 + $0xf8] sm:$0xff] }
 0x160   : > { %1011 = vst [vmem:[#allocation2 + $0x40] sm:$0xff] %v979_v47  ;;  %1027 = vst [vmem:[#allocation2 + $0xc0] sm:$0xff] %v995_v48  ;;  %v980_v51 = vadd.f32 %v1615_v49, %v467_v43  ;;  %v996_v52 = vadd.f32 %v1663_v50, %v483_v45  ;;  %v1073_v49 = vld [vmem:[%s2046_s8 + $0x10] sm:$0xff] (!%p1565_p13)  ;;  %v1071_v50 = vld [vmem:[%s2046_s8] sm:$0xff] (!%p1565_p13) }
 0x162   : > { %1012 = vst [vmem:[#allocation2 + $0x48] sm:$0xff] %v980_v51  ;;  %1028 = vst [vmem:[#allocation2 + $0xc8] sm:$0xff] %v996_v52  ;;  %v1616_v53 = vpop.f32.mrb[20].mxu0  ;;  %v1664_v54 = vpop.f32.mrb[20].mxu1  ;;  %v1879_v51 = vmov (!%p1565_p13), 0   ;;  %v1074_v52 = vld [vmem:[%s2046_s8 + $0x18] sm:$0xff] (!%p1565_p13) }
 0x163   : > { %v1617_v56 = vpop.f32.mrb[21].mxu0  ;;  %v1665_v58 = vpop.f32.mrb[21].mxu1  ;;  %1821 = vset.pattern.permute.xlu1 (!%p1565_p13), %v1879_v51  ;;  %1820 = vset.pattern.permute.xlu0 (!%p1565_p13), %v1879_v51 }
 0x164   : > { %v1618_v59 = vadd.f32 %v1617_v56, %v1616_v53  ;;  %v1666_v60 = vadd.f32 %v1665_v58, %v1664_v54  ;;  %v1619_v61 = vpop.f32.mrb[22].mxu0  ;;  %v1667_v62 = vpop.f32.mrb[22].mxu1  ;;  %1115 = vperm.xlu1 (!%p1565_p13), %1821, %v1073_v49   ;;  %1105 = vperm.xlu0 (!%p1565_p13), %1820, %v1071_v50   ;;  %v1072_v53 = vld [vmem:[%s2046_s8 + $0x8] sm:$0xff] (!%p1565_p13)  ;;  %v1078_v56 = vld [vmem:[%s2046_s8 + $0x38] sm:$0xff] (!%p1565_p13) }
 0x165   : > { %v1620_v0 = vpop.f32.mrb[23].mxu0  ;;  %v1668_v2 = vpop.f32.mrb[23].mxu1  ;;  %v1076_v54 = vld [vmem:[%s2046_s8 + $0x28] sm:$0xff] (!%p1565_p13) }
 0x166   : > { %v981_v3 = vadd.f32 %v1618_v59, %v468_v55  ;;  %v997_v4 = vadd.f32 %v1666_v60, %v484_v57  ;;  %v1621_v5 = vadd.f32 %v1620_v0, %v1619_v61  ;;  %v1669_v6 = vadd.f32 %v1668_v2, %v1667_v62  ;;  %v1075_v55 = vld [vmem:[%s2046_s8 + $0x20] sm:$0xff] (!%p1565_p13)  ;;  %v1077_v57 = vld [vmem:[%s2046_s8 + $0x30] sm:$0xff] (!%p1565_p13)  ;;  %v1080_v58 = vld [vmem:[%s2046_s8 + $0x48] sm:$0xff] (!%p1565_p13) }
 0x167   : > { %v1079_v59 = vld [vmem:[%s2046_s8 + $0x40] sm:$0xff] (!%p1565_p13)  ;;  %v1082_v60 = vld [vmem:[%s2046_s8 + $0x58] sm:$0xff] (!%p1565_p13)  ;;  %v1081_v61 = vld [vmem:[%s2046_s8 + $0x50] sm:$0xff] (!%p1565_p13) }
 0x168   : > { %1013 = vst [vmem:[#allocation2 + $0x50] sm:$0xff] %v981_v3  ;;  %1029 = vst [vmem:[#allocation2 + $0xd0] sm:$0xff] %v997_v4  ;;  %v982_v7 = vadd.f32 %v1621_v5, %v469_v63  ;;  %v998_v8 = vadd.f32 %v1669_v6, %v485_v1  ;;  %1120 = vperm.xlu1 (!%p1565_p13), %1821, %v1074_v52   ;;  %1110 = vperm.xlu0 (!%p1565_p13), %1820, %v1072_v53   ;;  %v1084_v62 = vld [vmem:[%s2046_s8 + $0x68] sm:$0xff] (!%p1565_p13)  ;;  %v1083_v63 = vld [vmem:[%s2046_s8 + $0x60] sm:$0xff] (!%p1565_p13) }
 0x169   : > { %v1086_v0 = vld [vmem:[%s2046_s8 + $0x78] sm:$0xff] (!%p1565_p13)  ;;  %v1085_v1 = vld [vmem:[%s2046_s8 + $0x70] sm:$0xff] (!%p1565_p13)  ;;  %v1088_v2 = vld [vmem:[%s2046_s8 + $0x88] sm:$0xff] (!%p1565_p13) }
 0x16a   : > { %1014 = vst [vmem:[#allocation2 + $0x58] sm:$0xff] %v982_v7  ;;  %1030 = vst [vmem:[#allocation2 + $0xd8] sm:$0xff] %v998_v8  ;;  %v1622_v9 = vpop.f32.mrb[24].mxu0  ;;  %v1670_v10 = vpop.f32.mrb[24].mxu1  ;;  %v1087_v3 = vld [vmem:[%s2046_s8 + $0x80] sm:$0xff] (!%p1565_p13)  ;;  %v1090_v4 = vld [vmem:[%s2046_s8 + $0x98] sm:$0xff] (!%p1565_p13) }
 0x16b   : > { %v1623_v12 = vpop.f32.mrb[25].mxu0  ;;  %v1671_v14 = vpop.f32.mrb[25].mxu1  ;;  %v1089_v5 = vld [vmem:[%s2046_s8 + $0x90] sm:$0xff] (!%p1565_p13)  ;;  %v1092_v6 = vld [vmem:[%s2046_s8 + $0xa8] sm:$0xff] (!%p1565_p13)  ;;  %v1091_v7 = vld [vmem:[%s2046_s8 + $0xa0] sm:$0xff] (!%p1565_p13) }
 0x16c   : > { %v1624_v15 = vadd.f32 %v1623_v12, %v1622_v9  ;;  %v1672_v16 = vadd.f32 %v1671_v14, %v1670_v10  ;;  %v1625_v17 = vpop.f32.mrb[26].mxu0  ;;  %v1673_v18 = vpop.f32.mrb[26].mxu1  ;;  %1130 = vperm.xlu1 (!%p1565_p13), %1821, %v1076_v54   ;;  %1125 = vperm.xlu0 (!%p1565_p13), %1820, %v1075_v55   ;;  %v1094_v8 = vld [vmem:[%s2046_s8 + $0xb8] sm:$0xff] (!%p1565_p13)  ;;  %v1093_v9 = vld [vmem:[%s2046_s8 + $0xb0] sm:$0xff] (!%p1565_p13)  ;;  %v1096_v10 = vld [vmem:[%s2046_s8 + $0xc8] sm:$0xff] (!%p1565_p13) }
 0x16d   : > { %v1626_v20 = vpop.f32.mrb[27].mxu0  ;;  %v1674_v22 = vpop.f32.mrb[27].mxu1  ;;  %v1098_v12 = vld [vmem:[%s2046_s8 + $0xd8] sm:$0xff] (!%p1565_p13)  ;;  %v1100_v14 = vld [vmem:[%s2046_s8 + $0xe8] sm:$0xff] (!%p1565_p13) }
 0x16e   : > { %v983_v23 = vadd.f32 %v1624_v15, %v470_v11  ;;  %v999_v24 = vadd.f32 %v1672_v16, %v486_v13  ;;  %v1627_v25 = vadd.f32 %v1626_v20, %v1625_v17  ;;  %v1675_v26 = vadd.f32 %v1674_v22, %v1673_v18  ;;  %v1095_v11 = vld [vmem:[%s2046_s8 + $0xc0] sm:$0xff] (!%p1565_p13)  ;;  %v1097_v13 = vld [vmem:[%s2046_s8 + $0xd0] sm:$0xff] (!%p1565_p13)  ;;  %v1102_v16 = vld [vmem:[%s2046_s8 + $0xf8] sm:$0xff] (!%p1565_p13) }
 0x16f   : > { %v1099_v15 = vld [vmem:[%s2046_s8 + $0xe0] sm:$0xff] (!%p1565_p13)  ;;  %v1101_v17 = vld [vmem:[%s2046_s8 + $0xf0] sm:$0xff] (!%p1565_p13)  ;;  %v1048_v55 = vld [vmem:[#allocation2 + $0x48] sm:$0xff] (!%p1565_p13) }
 0x170   : > { %1015 = vst [vmem:[#allocation2 + $0x60] sm:$0xff] %v983_v23  ;;  %1031 = vst [vmem:[#allocation2 + $0xe0] sm:$0xff] %v999_v24  ;;  %v984_v27 = vadd.f32 %v1627_v25, %v471_v19  ;;  %v1000_v28 = vadd.f32 %v1675_v26, %v487_v21  ;;  %1140 = vperm.xlu1 (!%p1565_p13), %1821, %v1078_v56   ;;  %1135 = vperm.xlu0 (!%p1565_p13), %1820, %v1077_v57   ;;  %v1041_v18 = vld [vmem:[#allocation2 + $0x10] sm:$0xff] (!%p1565_p13)  ;;  %v1039_v19 = vld [vmem:[#allocation2] sm:$0xff] (!%p1565_p13) }
 0x171   : > { %v2140_v20 = vld [vmem:[%s2230_s3] ss:$0 sm:$0xff] (!%p1565_p13)  ;;  %v1042_v25 = vld [vmem:[#allocation2 + $0x18] sm:$0xff] (!%p1565_p13)  ;;  %v1040_v26 = vld [vmem:[#allocation2 + $0x8] sm:$0xff] (!%p1565_p13) }
 0x172   : > { %1016 = vst [vmem:[#allocation2 + $0x68] sm:$0xff] %v984_v27  ;;  %1032 = vst [vmem:[#allocation2 + $0xe8] sm:$0xff] %v1000_v28  ;;  %v1628_v29 = vpop.f32.mrb[28].mxu0  ;;  %v1676_v30 = vpop.f32.mrb[28].mxu1  ;;  %v1047_v56 = vld [vmem:[#allocation2 + $0x40] sm:$0xff] (!%p1565_p13) }
 0x173   : > { %v1629_v32 = vpop.f32.mrb[29].mxu0  ;;  %v1677_v34 = vpop.f32.mrb[29].mxu1 }
 0x174   : > { %v1630_v35 = vadd.f32 %v1629_v32, %v1628_v29  ;;  %v1678_v36 = vadd.f32 %v1677_v34, %v1676_v30  ;;  %v1631_v37 = vpop.f32.mrb[30].mxu0  ;;  %v1679_v38 = vpop.f32.mrb[30].mxu1  ;;  %1038 = sbr.rel (%p1565_p13) target bundleno = 551 (0x227), region = 82  ;;  %1150 = vperm.xlu1 (!%p1565_p13), %1821, %v1080_v58   ;;  %1145 = vperm.xlu0 (!%p1565_p13), %1820, %v1079_v59  }
 0x175   : > { %v1632_v40 = vpop.f32.mrb[31].mxu0  ;;  %v1680_v42 = vpop.f32.mrb[31].mxu1 }
 0x176   : > { %v985_v43 = vadd.f32 %v1630_v35, %v472_v31  ;;  %v1001_v44 = vadd.f32 %v1678_v36, %v488_v33  ;;  %v1633_v45 = vadd.f32 %v1632_v40, %v1631_v37  ;;  %v1681_v46 = vadd.f32 %v1680_v42, %v1679_v38  ;;  %v1044_v35 = vld [vmem:[#allocation2 + $0x28] sm:$0xff] (!%p1565_p13)  ;;  %v1043_v36 = vld [vmem:[#allocation2 + $0x20] sm:$0xff] (!%p1565_p13) }
 0x178   : > { %1017 = vst [vmem:[#allocation2 + $0x70] sm:$0xff] %v985_v43  ;;  %1033 = vst [vmem:[#allocation2 + $0xf0] sm:$0xff] %v1001_v44  ;;  %v986_v47 = vadd.f32 %v1633_v45, %v473_v39  ;;  %v1002_v48 = vadd.f32 %v1681_v46, %v489_v41  ;;  %1160 = vperm.xlu1 (!%p1565_p13), %1821, %v1082_v60   ;;  %1155 = vperm.xlu0 (!%p1565_p13), %1820, %v1081_v61   ;;  %v1046_v45 = vld [vmem:[#allocation2 + $0x38] sm:$0xff] (!%p1565_p13)  ;;  %v1045_v46 = vld [vmem:[#allocation2 + $0x30] sm:$0xff] (!%p1565_p13) }
 0x17a   : > { %1018 = vst [vmem:[#allocation2 + $0x78] sm:$0xff] %v986_v47  ;;  %1034 = vst [vmem:[#allocation2 + $0xf8] sm:$0xff] %v1002_v48 }
 0x17c   : > { %1170 = vperm.xlu1 %1821, %v1084_v62   ;;  %1165 = vperm.xlu0 %1820, %v1083_v63  }
 0x180   : > { %1180 = vperm.xlu1 %1821, %v1086_v0   ;;  %1175 = vperm.xlu0 %1820, %v1085_v1   ;;  %v1050_v1 = vld [vmem:[#allocation2 + $0x58] sm:$0xff] }
 0x184   : > { %1190 = vperm.xlu1 %1821, %v1088_v2   ;;  %1185 = vperm.xlu0 %1820, %v1087_v3   ;;  %v1049_v2 = vld [vmem:[#allocation2 + $0x50] sm:$0xff] }
 0x188   : > { %1200 = vperm.xlu1 %1821, %v1090_v4   ;;  %1195 = vperm.xlu0 %1820, %v1089_v5  }
 0x18c   : > { %1210 = vperm.xlu1 %1821, %v1092_v6   ;;  %1205 = vperm.xlu0 %1820, %v1091_v7  }
 0x190   : > { %1220 = vperm.xlu1 %1821, %v1094_v8   ;;  %1215 = vperm.xlu0 %1820, %v1093_v9  }
 0x194   : > { %1230 = vperm.xlu1 %1821, %v1096_v10   ;;  %1225 = vperm.xlu0 %1820, %v1095_v11   ;;  %v1052_v11 = vld [vmem:[#allocation2 + $0x68] sm:$0xff] }
 0x198   : > { %1240 = vperm.xlu1 %1821, %v1098_v12   ;;  %1235 = vperm.xlu0 %1820, %v1097_v13   ;;  %v1051_v12 = vld [vmem:[#allocation2 + $0x60] sm:$0xff] }
 0x19c   : > { %1250 = vperm.xlu1 %1821, %v1100_v14   ;;  %1245 = vperm.xlu0 %1820, %v1099_v15  }
 0x1a0   : > { %1260 = vperm.xlu1 %1821, %v1102_v16   ;;  %1255 = vperm.xlu0 %1820, %v1101_v17  }
 0x1e3   : > { %v1116_v21 = vpop.permute.xlu1 %1115  ;;  %v1106_v22 = vpop.permute.xlu0 %1105 }
 0x1e4   : > { %v1265_v23 = vmul.f32 %v1116_v21, %v1041_v18  ;;  %v1263_v24 = vmul.f32 %v1106_v22, %v1039_v19  ;;  %v1054_v22 = vld [vmem:[#allocation2 + $0x78] sm:$0xff] }
 0x1e6   : > { %v1304_v27 = vadd.f32 %v2140_v20, %v1265_v23  ;;  %v1302_v28 = vadd.f32 %v2140_v20, %v1263_v24  ;;  %v1053_v23 = vld [vmem:[#allocation2 + $0x70] sm:$0xff] }
 0x1e7   : > { %v1121_v29 = vpop.permute.xlu1 %1120  ;;  %v1111_v30 = vpop.permute.xlu0 %1110 }
 0x1e8   : > { %v1336_v31 = vmax.f32 %v1304_v27, 0.0  ;;  %v1334_v32 = vmax.f32 %v1302_v28, 0.0  ;;  %v1266_v33 = vmul.f32 %v1121_v29, %v1042_v25  ;;  %v1264_v34 = vmul.f32 %v1111_v30, %v1040_v26 }
 0x1ea   : > { %1368 = vst [vmem:[%s2051_s10 + $0x10] sm:$0xff] %v1336_v31  ;;  %1366 = vst [vmem:[%s2051_s10] sm:$0xff] %v1334_v32  ;;  %v1305_v37 = vadd.f32 %v2140_v20, %v1266_v33  ;;  %v1303_v38 = vadd.f32 %v2140_v20, %v1264_v34  ;;  %v1056_v32 = vld [vmem:[#allocation2 + $0x88] sm:$0xff]  ;;  %v1055_v33 = vld [vmem:[#allocation2 + $0x80] sm:$0xff] }
 0x1eb   : > { %v1131_v39 = vpop.permute.xlu1 %1130  ;;  %v1126_v40 = vpop.permute.xlu0 %1125 }
 0x1ec   : > { %v1337_v41 = vmax.f32 %v1305_v37, 0.0  ;;  %v1335_v42 = vmax.f32 %v1303_v38, 0.0  ;;  %v1268_v43 = vmul.f32 %v1131_v39, %v1044_v35  ;;  %v1267_v44 = vmul.f32 %v1126_v40, %v1043_v36 }
 0x1ee   : > { %1369 = vst [vmem:[%s2051_s10 + $0x18] sm:$0xff] %v1337_v41  ;;  %1367 = vst [vmem:[%s2051_s10 + $0x8] sm:$0xff] %v1335_v42  ;;  %v1307_v47 = vadd.f32 %v2140_v20, %v1268_v43  ;;  %v1306_v48 = vadd.f32 %v2140_v20, %v1267_v44  ;;  %v1058_v42 = vld [vmem:[#allocation2 + $0x98] sm:$0xff]  ;;  %v1057_v43 = vld [vmem:[#allocation2 + $0x90] sm:$0xff] }
 0x1ef   : > { %v1141_v49 = vpop.permute.xlu1 %1140  ;;  %v1136_v50 = vpop.permute.xlu0 %1135 }
 0x1f0   : > { %v1339_v51 = vmax.f32 %v1307_v47, 0.0  ;;  %v1338_v52 = vmax.f32 %v1306_v48, 0.0  ;;  %v1270_v53 = vmul.f32 %v1141_v49, %v1046_v45  ;;  %v1269_v54 = vmul.f32 %v1136_v50, %v1045_v46 }
 0x1f2   : > { %1371 = vst [vmem:[%s2051_s10 + $0x28] sm:$0xff] %v1339_v51  ;;  %1370 = vst [vmem:[%s2051_s10 + $0x20] sm:$0xff] %v1338_v52  ;;  %v1309_v57 = vadd.f32 %v2140_v20, %v1270_v53  ;;  %v1308_v58 = vadd.f32 %v2140_v20, %v1269_v54  ;;  %v1060_v52 = vld [vmem:[#allocation2 + $0xa8] sm:$0xff]  ;;  %v1059_v53 = vld [vmem:[#allocation2 + $0xa0] sm:$0xff] }
 0x1f3   : > { %v1151_v59 = vpop.permute.xlu1 %1150  ;;  %v1146_v60 = vpop.permute.xlu0 %1145 }
 0x1f4   : > { %v1341_v61 = vmax.f32 %v1309_v57, 0.0  ;;  %v1340_v62 = vmax.f32 %v1308_v58, 0.0  ;;  %v1272_v63 = vmul.f32 %v1151_v59, %v1048_v55  ;;  %v1271_v0 = vmul.f32 %v1146_v60, %v1047_v56 }
 0x1f6   : > { %1373 = vst [vmem:[%s2051_s10 + $0x38] sm:$0xff] %v1341_v61  ;;  %1372 = vst [vmem:[%s2051_s10 + $0x30] sm:$0xff] %v1340_v62  ;;  %v1311_v3 = vadd.f32 %v2140_v20, %v1272_v63  ;;  %v1310_v4 = vadd.f32 %v2140_v20, %v1271_v0  ;;  %v1062_v62 = vld [vmem:[#allocation2 + $0xb8] sm:$0xff]  ;;  %v1061_v63 = vld [vmem:[#allocation2 + $0xb0] sm:$0xff] }
 0x1f7   : > { %v1161_v5 = vpop.permute.xlu1 %1160  ;;  %v1156_v6 = vpop.permute.xlu0 %1155 }
 0x1f8   : > { %v1343_v7 = vmax.f32 %v1311_v3, 0.0  ;;  %v1342_v8 = vmax.f32 %v1310_v4, 0.0  ;;  %v1274_v9 = vmul.f32 %v1161_v5, %v1050_v1  ;;  %v1273_v10 = vmul.f32 %v1156_v6, %v1049_v2 }
 0x1fa   : > { %1375 = vst [vmem:[%s2051_s10 + $0x48] sm:$0xff] %v1343_v7  ;;  %1374 = vst [vmem:[%s2051_s10 + $0x40] sm:$0xff] %v1342_v8  ;;  %v1313_v13 = vadd.f32 %v2140_v20, %v1274_v9  ;;  %v1312_v14 = vadd.f32 %v2140_v20, %v1273_v10  ;;  %v1064_v8 = vld [vmem:[#allocation2 + $0xc8] sm:$0xff]  ;;  %v1063_v9 = vld [vmem:[#allocation2 + $0xc0] sm:$0xff] }
 0x1fb   : > { %v1171_v15 = vpop.permute.xlu1 %1170  ;;  %v1166_v16 = vpop.permute.xlu0 %1165 }
 0x1fc   : > { %v1345_v17 = vmax.f32 %v1313_v13, 0.0  ;;  %v1344_v18 = vmax.f32 %v1312_v14, 0.0  ;;  %v1276_v19 = vmul.f32 %v1171_v15, %v1052_v11  ;;  %v1275_v21 = vmul.f32 %v1166_v16, %v1051_v12 }
 0x1fe   : > { %1377 = vst [vmem:[%s2051_s10 + $0x58] sm:$0xff] %v1345_v17  ;;  %1376 = vst [vmem:[%s2051_s10 + $0x50] sm:$0xff] %v1344_v18  ;;  %v1315_v24 = vadd.f32 %v2140_v20, %v1276_v19  ;;  %v1314_v25 = vadd.f32 %v2140_v20, %v1275_v21  ;;  %v1066_v18 = vld [vmem:[#allocation2 + $0xd8] sm:$0xff]  ;;  %v1065_v19 = vld [vmem:[#allocation2 + $0xd0] sm:$0xff] }
 0x1ff   : > { %v1181_v26 = vpop.permute.xlu1 %1180  ;;  %v1176_v27 = vpop.permute.xlu0 %1175 }
 0x200   : > { %v1347_v28 = vmax.f32 %v1315_v24, 0.0  ;;  %v1346_v29 = vmax.f32 %v1314_v25, 0.0  ;;  %v1278_v30 = vmul.f32 %v1181_v26, %v1054_v22  ;;  %v1277_v31 = vmul.f32 %v1176_v27, %v1053_v23 }
 0x202   : > { %1379 = vst [vmem:[%s2051_s10 + $0x68] sm:$0xff] %v1347_v28  ;;  %1378 = vst [vmem:[%s2051_s10 + $0x60] sm:$0xff] %v1346_v29  ;;  %v1317_v34 = vadd.f32 %v2140_v20, %v1278_v30  ;;  %v1316_v35 = vadd.f32 %v2140_v20, %v1277_v31  ;;  %v1068_v29 = vld [vmem:[#allocation2 + $0xe8] sm:$0xff]  ;;  %v1067_v30 = vld [vmem:[#allocation2 + $0xe0] sm:$0xff] }
 0x203   : > { %v1191_v36 = vpop.permute.xlu1 %1190  ;;  %v1186_v37 = vpop.permute.xlu0 %1185 }
 0x204   : > { %v1349_v38 = vmax.f32 %v1317_v34, 0.0  ;;  %v1348_v39 = vmax.f32 %v1316_v35, 0.0  ;;  %v1280_v40 = vmul.f32 %v1191_v36, %v1056_v32  ;;  %v1279_v41 = vmul.f32 %v1186_v37, %v1055_v33 }
 0x206   : > { %1381 = vst [vmem:[%s2051_s10 + $0x78] sm:$0xff] %v1349_v38  ;;  %1380 = vst [vmem:[%s2051_s10 + $0x70] sm:$0xff] %v1348_v39  ;;  %v1319_v44 = vadd.f32 %v2140_v20, %v1280_v40  ;;  %v1318_v45 = vadd.f32 %v2140_v20, %v1279_v41  ;;  %v1070_v39 = vld [vmem:[#allocation2 + $0xf8] sm:$0xff]  ;;  %v1069_v40 = vld [vmem:[#allocation2 + $0xf0] sm:$0xff] }
 0x207   : > { %v1201_v46 = vpop.permute.xlu1 %1200  ;;  %v1196_v47 = vpop.permute.xlu0 %1195 }
 0x208   : > { %v1351_v48 = vmax.f32 %v1319_v44, 0.0  ;;  %v1350_v49 = vmax.f32 %v1318_v45, 0.0  ;;  %v1282_v50 = vmul.f32 %v1201_v46, %v1058_v42  ;;  %v1281_v51 = vmul.f32 %v1196_v47, %v1057_v43 }
 0x20a   : > { %1383 = vst [vmem:[%s2051_s10 + $0x88] sm:$0xff] %v1351_v48  ;;  %1382 = vst [vmem:[%s2051_s10 + $0x80] sm:$0xff] %v1350_v49  ;;  %v1321_v54 = vadd.f32 %v2140_v20, %v1282_v50  ;;  %v1320_v55 = vadd.f32 %v2140_v20, %v1281_v51 }
 0x20b   : > { %v1211_v56 = vpop.permute.xlu1 %1210  ;;  %v1206_v57 = vpop.permute.xlu0 %1205 }
 0x20c   : > { %v1353_v58 = vmax.f32 %v1321_v54, 0.0  ;;  %v1352_v59 = vmax.f32 %v1320_v55, 0.0  ;;  %v1284_v60 = vmul.f32 %v1211_v56, %v1060_v52  ;;  %v1283_v61 = vmul.f32 %v1206_v57, %v1059_v53 }
 0x20e   : > { %1385 = vst [vmem:[%s2051_s10 + $0x98] sm:$0xff] %v1353_v58  ;;  %1384 = vst [vmem:[%s2051_s10 + $0x90] sm:$0xff] %v1352_v59  ;;  %v1323_v0 = vadd.f32 %v2140_v20, %v1284_v60  ;;  %v1322_v1 = vadd.f32 %v2140_v20, %v1283_v61 }
 0x20f   : > { %v1221_v2 = vpop.permute.xlu1 %1220  ;;  %v1216_v3 = vpop.permute.xlu0 %1215 }
 0x210   : > { %v1355_v4 = vmax.f32 %v1323_v0, 0.0  ;;  %v1354_v5 = vmax.f32 %v1322_v1, 0.0  ;;  %v1286_v6 = vmul.f32 %v1221_v2, %v1062_v62  ;;  %v1285_v7 = vmul.f32 %v1216_v3, %v1061_v63 }
 0x212   : > { %1387 = vst [vmem:[%s2051_s10 + $0xa8] sm:$0xff] %v1355_v4  ;;  %1386 = vst [vmem:[%s2051_s10 + $0xa0] sm:$0xff] %v1354_v5  ;;  %v1325_v10 = vadd.f32 %v2140_v20, %v1286_v6  ;;  %v1324_v11 = vadd.f32 %v2140_v20, %v1285_v7 }
 0x213   : > { %v1231_v12 = vpop.permute.xlu1 %1230  ;;  %v1226_v13 = vpop.permute.xlu0 %1225 }
 0x214   : > { %v1357_v14 = vmax.f32 %v1325_v10, 0.0  ;;  %v1356_v15 = vmax.f32 %v1324_v11, 0.0  ;;  %v1288_v16 = vmul.f32 %v1231_v12, %v1064_v8  ;;  %v1287_v17 = vmul.f32 %v1226_v13, %v1063_v9 }
 0x216   : > { %1389 = vst [vmem:[%s2051_s10 + $0xb8] sm:$0xff] %v1357_v14  ;;  %1388 = vst [vmem:[%s2051_s10 + $0xb0] sm:$0xff] %v1356_v15  ;;  %v1327_v21 = vadd.f32 %v2140_v20, %v1288_v16  ;;  %v1326_v22 = vadd.f32 %v2140_v20, %v1287_v17 }
 0x217   : > { %v1241_v23 = vpop.permute.xlu1 %1240  ;;  %v1236_v24 = vpop.permute.xlu0 %1235 }
 0x218   : > { %v1359_v25 = vmax.f32 %v1327_v21, 0.0  ;;  %v1358_v26 = vmax.f32 %v1326_v22, 0.0  ;;  %v1290_v27 = vmul.f32 %v1241_v23, %v1066_v18  ;;  %v1289_v28 = vmul.f32 %v1236_v24, %v1065_v19 }
 0x21a   : > { %1391 = vst [vmem:[%s2051_s10 + $0xc8] sm:$0xff] %v1359_v25  ;;  %1390 = vst [vmem:[%s2051_s10 + $0xc0] sm:$0xff] %v1358_v26  ;;  %v1329_v31 = vadd.f32 %v2140_v20, %v1290_v27  ;;  %v1328_v32 = vadd.f32 %v2140_v20, %v1289_v28 }
 0x21b   : > { %v1251_v33 = vpop.permute.xlu1 %1250  ;;  %v1246_v34 = vpop.permute.xlu0 %1245 }
 0x21c   : > { %v1361_v35 = vmax.f32 %v1329_v31, 0.0  ;;  %v1360_v36 = vmax.f32 %v1328_v32, 0.0  ;;  %v1292_v37 = vmul.f32 %v1251_v33, %v1068_v29  ;;  %v1291_v38 = vmul.f32 %v1246_v34, %v1067_v30 }
 0x21e   : > { %1393 = vst [vmem:[%s2051_s10 + $0xd8] sm:$0xff] %v1361_v35  ;;  %1392 = vst [vmem:[%s2051_s10 + $0xd0] sm:$0xff] %v1360_v36  ;;  %v1331_v41 = vadd.f32 %v2140_v20, %v1292_v37  ;;  %v1330_v42 = vadd.f32 %v2140_v20, %v1291_v38 }
 0x21f   : > { %v1261_v43 = vpop.permute.xlu1 %1260  ;;  %v1256_v44 = vpop.permute.xlu0 %1255 }
 0x220   : > { %v1363_v45 = vmax.f32 %v1331_v41, 0.0  ;;  %v1362_v46 = vmax.f32 %v1330_v42, 0.0  ;;  %v1294_v47 = vmul.f32 %v1261_v43, %v1070_v39  ;;  %v1293_v48 = vmul.f32 %v1256_v44, %v1069_v40 }
 0x222   : > { %1395 = vst [vmem:[%s2051_s10 + $0xe8] sm:$0xff] %v1363_v45  ;;  %1394 = vst [vmem:[%s2051_s10 + $0xe0] sm:$0xff] %v1362_v46  ;;  %v1333_v49 = vadd.f32 %v2140_v20, %v1294_v47  ;;  %v1332_v50 = vadd.f32 %v2140_v20, %v1293_v48 }
 0x224   : > { %v1365_v51 = vmax.f32 %v1333_v49, 0.0  ;;  %v1364_v52 = vmax.f32 %v1332_v50, 0.0 }
 0x226   : > { %1397 = vst [vmem:[%s2051_s10 + $0xf8] sm:$0xff] %v1365_v51  ;;  %1396 = vst [vmem:[%s2051_s10 + $0xf0] sm:$0xff] %v1364_v52 }
 0x227 PF: > { %s14_s21 = sadd.s32 1, %s1876_s21   ;;  %s2232_s15 = smov %s1856_s16 }
 0x228   : > { %p11_p0 = scmp.ge.s32.totalorder %s14_s21, 6   ;;  %s2233_s16 = smov %s1956_s28 }
 0x229   : > { %s2234_s17 = smov %s1868_s19  ;;  %s2235_s18 = smov %s1872_s20 }
 0x22a   : > { %s2236_s19 = smov %s2239_s22  ;;  %s2237_s20 = smov %s2243_s23 }
 0x22b   :  { %13 = sbr.rel (!%p11_p0) target bundleno = 4 (0x4), region = 123 }

// kernel: gcn_node_classifier_forward.7
= control target key start
LH: loop header
LB: loop body
LE: loop exit
PB: predicated region body
PF: predicated region fallthrough
CT: control target
= control target key end

     0   :  { %s1873_s15 = smov 0   ;;  %s1875_s16 = smov 0   ;;  %s2195_s0 = inlined_call_operand.vmem [shape: bf16[512,512], index: 0, kind: input, shape index: {}]   ;;  %s2196_s1 = inlined_call_operand.vmem [shape: bf16[512,128], index: 1, kind: input, shape index: {}]   ;;  %s2197_s2 = inlined_call_operand.vmem [shape: f32[512,1], index: 2, kind: input, shape index: {}]   ;;  %s2198_s3 = inlined_call_operand.vmem [shape: f32[1,128], index: 3, kind: input, shape index: {}]   ;;  %s2199_s4 = inlined_call_operand.vmem [shape: f32[512,128], index: 4, kind: output, shape index: {}]  }
   0x1   :  { %s1877_s17 = smov 0   ;;  %s1879_s18 = smov 0  }
   0x2   :  { %s1881_s19 = smov 0   ;;  %s1883_s20 = smov 0  }
   0x3   :  { %s1885_s21 = smov 0  }
   0x4 LB: > { %s23_s22 = sadd.s32 1, %s1836_s19  ;;  %s26_s23 = sadd.s32 1, %s1840_s20  ;;  %s1844_s21 = sphi %s1885_s21, %s14_s21   ;;  %s1840_s20 = sphi %s1883_s20, %s2205_s20   ;;  %s1836_s19 = sphi %s1881_s19, %s2204_s19   ;;  %s1832_s18 = sphi %s1879_s18, %s2203_s18   ;;  %s1828_s17 = sphi %s1877_s17, %s2202_s17   ;;  %s1824_s16 = sphi %s1875_s16, %s2201_s16   ;;  %s1820_s15 = sphi %s1873_s15, %s2200_s15  }
   0x5   : > { %p24_p0 = scmp.ge.s32.totalorder %s23_s22, 2  ;;  %p42_p1 = scmp.ne.s32.totalorder %s1824_s16, %s1820_s15 }
   0x6   : > { %p43_p2 = scmp.eq.s32.totalorder %s1844_s21, 0  ;;  %s35_s27 = sadd.s32 1, %s1824_s16 }
   0x7   : > { %s2207_s22 = smov (%p24_p0, %s23_s22), 0  ;;  %s2209_s23 = smov (!%p24_p0, %s26_s23), %s1840_s20 }
   0x8   : > { %p44_p3 = por %p43_p2, %p42_p1  ;;  %p28_p4 = scmp.ge.s32.totalorder %s2209_s23, 2 }
   0x9   : > { %s31_s24 = ssub.s32 %s1836_s19, %s2207_s22  ;;  %p1470_p6 = scmp.ge.s32.totalorder %s1844_s21, 4 }
   0xa   : > { %s2211_s23 = smov (%p28_p4, %s2209_s23), 0 }
   0xb   : > { %s30_s25 = ssub.s32 %s1840_s20, %s2211_s23  ;;  %170 = sbr.rel (%p1470_p6) target bundleno = 41 (0x29), region = 20 }
   0xc   : > { %s32_s26 = sor.u32 %s31_s24, %s30_s25 }
   0xd   : > { %p33_p5 = scmp.eq.s32.totalorder %s32_s26, 0 }
   0xf   : > { %s1924_s28 = scalar_select %p33_p5, %s1824_s16, %s35_s27  }
  0x12   : > { %173 = sbr.rel (!%p44_p3) target bundleno = 41 (0x29), region = 24  ;;  %s175_s29 = sand.u32 (%p44_p3), 1, %s1824_s16  }
  0x13   : > { %s1473_s30 = sshll.u32 (%p44_p3), %s1836_s19, 1  ;;  %s1471_s5 = sshll.u32 (%p44_p3), %s175_s29, 8 }
  0x14   : > { %s1537_s6 = sshll.u32 (%p44_p3), %s1840_s20, 7  ;;  %s1938_s12 = scalar_lea.vmem (%p44_p3), [#allocation3], %s1471_s5 }
  0x15   : > { %s181_s7 = sadd.s32 (%p44_p3), %s1537_s6, %s1473_s30 }
  0x16   : > { %s1475_s8 = sshll.u32 (%p44_p3), %s181_s7, 2 }
  0x17   : > { %s1933_s11 = scalar_lea.vmem (%p44_p3), %s2195_s0, %s1475_s8 }
  0x18   : > { %v273_v0 = vld [vmem:[%s1933_s11] sm:$0xff] (%p44_p3)  ;;  %v275_v1 = vld [vmem:[%s1933_s11 + $0x10] sm:$0xff] (%p44_p3) }
  0x19   : > { %v277_v2 = vld [vmem:[%s1933_s11 + $0x20] sm:$0xff]  ;;  %274 = vst [vmem:[%s1938_s12] sm:$0xff] %v273_v0  ;;  %276 = vst [vmem:[%s1938_s12 + $0x8] sm:$0xff] %v275_v1  ;;  %v279_v3 = vld [vmem:[%s1933_s11 + $0x30] sm:$0xff] }
  0x1a   : > { %278 = vst [vmem:[%s1938_s12 + $0x10] sm:$0xff] %v277_v2  ;;  %v281_v4 = vld [vmem:[%s1933_s11 + $0x40] sm:$0xff]  ;;  %v283_v5 = vld [vmem:[%s1933_s11 + $0x50] sm:$0xff]  ;;  %280 = vst [vmem:[%s1938_s12 + $0x18] sm:$0xff] %v279_v3 }
  0x1b   : > { %282 = vst [vmem:[%s1938_s12 + $0x20] sm:$0xff] %v281_v4  ;;  %284 = vst [vmem:[%s1938_s12 + $0x28] sm:$0xff] %v283_v5  ;;  %v285_v6 = vld [vmem:[%s1933_s11 + $0x60] sm:$0xff]  ;;  %v287_v7 = vld [vmem:[%s1933_s11 + $0x70] sm:$0xff] }
  0x1c   : > { %v289_v8 = vld [vmem:[%s1933_s11 + $0x80] sm:$0xff]  ;;  %286 = vst [vmem:[%s1938_s12 + $0x30] sm:$0xff] %v285_v6  ;;  %288 = vst [vmem:[%s1938_s12 + $0x38] sm:$0xff] %v287_v7  ;;  %v291_v9 = vld [vmem:[%s1933_s11 + $0x90] sm:$0xff] }
  0x1d   : > { %290 = vst [vmem:[%s1938_s12 + $0x40] sm:$0xff] %v289_v8  ;;  %v293_v10 = vld [vmem:[%s1933_s11 + $0xa0] sm:$0xff]  ;;  %v295_v11 = vld [vmem:[%s1933_s11 + $0xb0] sm:$0xff]  ;;  %292 = vst [vmem:[%s1938_s12 + $0x48] sm:$0xff] %v291_v9 }
  0x1e   : > { %294 = vst [vmem:[%s1938_s12 + $0x50] sm:$0xff] %v293_v10  ;;  %296 = vst [vmem:[%s1938_s12 + $0x58] sm:$0xff] %v295_v11  ;;  %v297_v12 = vld [vmem:[%s1933_s11 + $0xc0] sm:$0xff]  ;;  %v299_v13 = vld [vmem:[%s1933_s11 + $0xd0] sm:$0xff] }
  0x1f   : > { %v301_v14 = vld [vmem:[%s1933_s11 + $0xe0] sm:$0xff]  ;;  %298 = vst [vmem:[%s1938_s12 + $0x60] sm:$0xff] %v297_v12  ;;  %300 = vst [vmem:[%s1938_s12 + $0x68] sm:$0xff] %v299_v13  ;;  %v303_v15 = vld [vmem:[%s1933_s11 + $0xf0] sm:$0xff] }
  0x20   : > { %302 = vst [vmem:[%s1938_s12 + $0x70] sm:$0xff] %v301_v14  ;;  %v305_v16 = vld [vmem:[%s1933_s11 + $0x100] sm:$0xff]  ;;  %v307_v17 = vld [vmem:[%s1933_s11 + $0x110] sm:$0xff]  ;;  %304 = vst [vmem:[%s1938_s12 + $0x78] sm:$0xff] %v303_v15 }
  0x21   : > { %306 = vst [vmem:[%s1938_s12 + $0x80] sm:$0xff] %v305_v16  ;;  %308 = vst [vmem:[%s1938_s12 + $0x88] sm:$0xff] %v307_v17  ;;  %v309_v18 = vld [vmem:[%s1933_s11 + $0x120] sm:$0xff]  ;;  %v311_v19 = vld [vmem:[%s1933_s11 + $0x130] sm:$0xff] }
  0x22   : > { %v313_v20 = vld [vmem:[%s1933_s11 + $0x140] sm:$0xff]  ;;  %310 = vst [vmem:[%s1938_s12 + $0x90] sm:$0xff] %v309_v18  ;;  %312 = vst [vmem:[%s1938_s12 + $0x98] sm:$0xff] %v311_v19  ;;  %v315_v21 = vld [vmem:[%s1933_s11 + $0x150] sm:$0xff] }
  0x23   : > { %314 = vst [vmem:[%s1938_s12 + $0xa0] sm:$0xff] %v313_v20  ;;  %v317_v22 = vld [vmem:[%s1933_s11 + $0x160] sm:$0xff]  ;;  %v319_v23 = vld [vmem:[%s1933_s11 + $0x170] sm:$0xff]  ;;  %316 = vst [vmem:[%s1938_s12 + $0xa8] sm:$0xff] %v315_v21 }
  0x24   : > { %318 = vst [vmem:[%s1938_s12 + $0xb0] sm:$0xff] %v317_v22  ;;  %320 = vst [vmem:[%s1938_s12 + $0xb8] sm:$0xff] %v319_v23  ;;  %v321_v24 = vld [vmem:[%s1933_s11 + $0x180] sm:$0xff]  ;;  %v323_v25 = vld [vmem:[%s1933_s11 + $0x190] sm:$0xff] }
  0x25   : > { %v325_v26 = vld [vmem:[%s1933_s11 + $0x1a0] sm:$0xff]  ;;  %322 = vst [vmem:[%s1938_s12 + $0xc0] sm:$0xff] %v321_v24  ;;  %324 = vst [vmem:[%s1938_s12 + $0xc8] sm:$0xff] %v323_v25  ;;  %v327_v27 = vld [vmem:[%s1933_s11 + $0x1b0] sm:$0xff] }
  0x26   : > { %326 = vst [vmem:[%s1938_s12 + $0xd0] sm:$0xff] %v325_v26  ;;  %v329_v28 = vld [vmem:[%s1933_s11 + $0x1c0] sm:$0xff]  ;;  %v331_v29 = vld [vmem:[%s1933_s11 + $0x1d0] sm:$0xff]  ;;  %328 = vst [vmem:[%s1938_s12 + $0xd8] sm:$0xff] %v327_v27 }
  0x27   : > { %330 = vst [vmem:[%s1938_s12 + $0xe0] sm:$0xff] %v329_v28  ;;  %332 = vst [vmem:[%s1938_s12 + $0xe8] sm:$0xff] %v331_v29  ;;  %v333_v30 = vld [vmem:[%s1933_s11 + $0x1e0] sm:$0xff]  ;;  %v335_v31 = vld [vmem:[%s1933_s11 + $0x1f0] sm:$0xff] }
  0x28   : > { %334 = vst [vmem:[%s1938_s12 + $0xf0] sm:$0xff] %v333_v30  ;;  %336 = vst [vmem:[%s1938_s12 + $0xf8] sm:$0xff] %v335_v31 }
  0x29 PF: > { %p1476_p7 = scmp.ge.s32.totalorder %s1844_s21, 1  ;;  %p359_p8 = scmp.lt.s32.totalorder %s1844_s21, 5 }
  0x2b   : > { %p360_p9 = pnand %p1476_p7, %p359_p8 }
  0x2c   : > { %s366_s13 = sand.u32 (!%p360_p9), 1, %s1820_s15   ;;  %s1478_s14 = sshll.u32 (!%p360_p9), %s1828_s17, 5 }
  0x2d   : > { %363 = sbr.rel (%p360_p9) target bundleno = 549 (0x225), region = 70  ;;  %s1477_s24 = sshll.u32 (!%p360_p9), %s366_s13, 8 }
  0x2e   : > { %p404_p10 = scmp.lt.s32.totalorder (!%p360_p9), %s1478_s14, 63  ;;  %s1480_s25 = sshll.u32 (!%p360_p9), %s1832_s18, 5 }
  0x2f   : > { %p410_p11 = scmp.lt.s32.totalorder (!%p360_p9), %s1480_s25, 63  ;;  %s2021_s18 = scalar_lea.vmem (!%p360_p9), [#allocation3], %s1477_s24 }
  0x30   : > { %p1484_p12 = scmp.ne.s32.totalorder (!%p360_p9), %s1828_s17, 0 }
  0x34   : > { %s2213_s14 = smov (!%p404_p10, %s1478_s14), 63  ;;  %s2215_s25 = smov (!%p410_p11, %s1480_s25), 63 }
  0x35   : > { %s1479_s26 = sshll.u32 %s2213_s14, 2  ;;  %s1481_s5 = sshll.u32 %s2215_s25, 3  ;;  %v1846_v32 = vmov (!%p1484_p12), 0.0  }
  0x36   : > { %s2009_s30 = scalar_lea.vmem %s2196_s1, %s1479_s26  ;;  %s2014_s8 = scalar_lea.vmem %s2197_s2, %s1481_s5  ;;  %426 = vst [vmem:[#allocation2] sm:$0xff] (!%p1484_p12), %v1846_v32  ;;  %427 = vst [vmem:[#allocation2 + $0x8] sm:$0xff] (!%p1484_p12), %v1846_v32 }
  0x37   : > { %s2019_s10 = scalar_lea.vmem %s2199_s4, %s1481_s5  ;;  %425 = sbr.rel (%p1484_p12) target bundleno = 70 (0x46), region = 78  ;;  %428 = vst [vmem:[#allocation2 + $0x10] sm:$0xff] (!%p1484_p12), %v1846_v32  ;;  %429 = vst [vmem:[#allocation2 + $0x18] sm:$0xff] (!%p1484_p12), %v1846_v32 }
  0x38   : > { %430 = vst [vmem:[#allocation2 + $0x20] sm:$0xff] (!%p1484_p12), %v1846_v32  ;;  %431 = vst [vmem:[#allocation2 + $0x28] sm:$0xff] (!%p1484_p12), %v1846_v32 }
  0x39   : > { %432 = vst [vmem:[#allocation2 + $0x30] sm:$0xff] (!%p1484_p12), %v1846_v32  ;;  %433 = vst [vmem:[#allocation2 + $0x38] sm:$0xff] (!%p1484_p12), %v1846_v32 }
  0x3a   : > { %434 = vst [vmem:[#allocation2 + $0x40] sm:$0xff] (!%p1484_p12), %v1846_v32  ;;  %435 = vst [vmem:[#allocation2 + $0x48] sm:$0xff] (!%p1484_p12), %v1846_v32 }
  0x3b   : > { %436 = vst [vmem:[#allocation2 + $0x50] sm:$0xff] (!%p1484_p12), %v1846_v32  ;;  %437 = vst [vmem:[#allocation2 + $0x58] sm:$0xff] (!%p1484_p12), %v1846_v32 }
  0x3c   : > { %438 = vst [vmem:[#allocation2 + $0x60] sm:$0xff] (!%p1484_p12), %v1846_v32  ;;  %439 = vst [vmem:[#allocation2 + $0x68] sm:$0xff] (!%p1484_p12), %v1846_v32 }
  0x3d   : > { %440 = vst [vmem:[#allocation2 + $0x70] sm:$0xff] (!%p1484_p12), %v1846_v32  ;;  %441 = vst [vmem:[#allocation2 + $0x78] sm:$0xff] (!%p1484_p12), %v1846_v32 }
  0x3e   : > { %442 = vst [vmem:[#allocation2 + $0x80] sm:$0xff] %v1846_v32  ;;  %443 = vst [vmem:[#allocation2 + $0x88] sm:$0xff] %v1846_v32 }
  0x3f   : > { %444 = vst [vmem:[#allocation2 + $0x90] sm:$0xff] %v1846_v32  ;;  %445 = vst [vmem:[#allocation2 + $0x98] sm:$0xff] %v1846_v32 }
  0x40   : > { %446 = vst [vmem:[#allocation2 + $0xa0] sm:$0xff] %v1846_v32  ;;  %447 = vst [vmem:[#allocation2 + $0xa8] sm:$0xff] %v1846_v32 }
  0x41   : > { %448 = vst [vmem:[#allocation2 + $0xb0] sm:$0xff] %v1846_v32  ;;  %449 = vst [vmem:[#allocation2 + $0xb8] sm:$0xff] %v1846_v32 }
  0x42   : > { %450 = vst [vmem:[#allocation2 + $0xc0] sm:$0xff] %v1846_v32  ;;  %451 = vst [vmem:[#allocation2 + $0xc8] sm:$0xff] %v1846_v32 }
  0x43   : > { %452 = vst [vmem:[#allocation2 + $0xd0] sm:$0xff] %v1846_v32  ;;  %453 = vst [vmem:[#allocation2 + $0xd8] sm:$0xff] %v1846_v32 }
  0x44   : > { %454 = vst [vmem:[#allocation2 + $0xe0] sm:$0xff] %v1846_v32  ;;  %455 = vst [vmem:[#allocation2 + $0xe8] sm:$0xff] %v1846_v32 }
  0x45   : > { %456 = vst [vmem:[#allocation2 + $0xf0] sm:$0xff] %v1846_v32  ;;  %457 = vst [vmem:[#allocation2 + $0xf8] sm:$0xff] %v1846_v32 }
  0x46 PF: > { %v1724_v33 = vld [vmem:[%s2009_s30 + $0x40] sm:$0xff]   ;;  %v1726_v35 = vld [vmem:[%s2009_s30 + $0x48] sm:$0xff]   ;;  %v1728_v37 = vld [vmem:[%s2009_s30 + $0x50] sm:$0xff]   ;;  %p1533_p13 = scmp.ne.s32.totalorder %s1828_s17, 1 }
  0x47   : > { %v1725_v34 = vld [vmem:[%s2009_s30] sm:$0xff]   ;;  %1538 = vmatprep.subr.bf16.mxu0 %v1724_v33  ;;  %1650 = vmatprep.subr.bf16.mxu1 %v1724_v33  ;;  %v1727_v36 = vld [vmem:[%s2009_s30 + $0x8] sm:$0xff]   ;;  %v1729_v38 = vld [vmem:[%s2009_s30 + $0x10] sm:$0xff]  }
  0x48   : > { %1539 = vmatpush3.bf16.msra.mxu0 %v1725_v34  ;;  %1658 = vmatpush3.bf16.msra.mxu1 %v1725_v34  ;;  %v1730_v39 = vld [vmem:[%s2009_s30 + $0x58] sm:$0xff]   ;;  %v1732_v41 = vld [vmem:[%s2009_s30 + $0x60] sm:$0xff]   ;;  %v1734_v43 = vld [vmem:[%s2009_s30 + $0x68] sm:$0xff]  }
  0x49   : > { %1540 = vmatprep.subr.bf16.mxu0 %v1726_v35  ;;  %1651 = vmatprep.subr.bf16.mxu1 %v1726_v35  ;;  %v1731_v40 = vld [vmem:[%s2009_s30 + $0x18] sm:$0xff]   ;;  %v1733_v42 = vld [vmem:[%s2009_s30 + $0x20] sm:$0xff]   ;;  %v1735_v46 = vld [vmem:[%s2009_s30 + $0x28] sm:$0xff]  }
  0x4a   : > { %v1742_v44 = vld [vmem:[%s2021_s18 + $0x4] ss:$8 sps:$4 sm:$0xff]   ;;  %v1736_v47 = vld [vmem:[%s2009_s30 + $0x70] sm:$0xff]   ;;  %v1738_v49 = vld [vmem:[%s2009_s30 + $0x78] sm:$0xff]  }
  0x4b   : > { %v1745_v45 = vld [vmem:[%s2021_s18 + $0x84] ss:$8 sps:$4 sm:$0xff]   ;;  %842 = vmatprep.mubr.bf16.mxu0 %v1742_v44  ;;  %v1737_v48 = vld [vmem:[%s2009_s30 + $0x30] sm:$0xff]   ;;  %v1739_v50 = vld [vmem:[%s2009_s30 + $0x38] sm:$0xff]  }
  0x4c   : > { %1541 = vmatpush3.bf16.msra.mxu0 %v1727_v36  ;;  %1659 = vmatpush3.bf16.msra.mxu1 %v1727_v36  ;;  %v1740_v51 = vld [vmem:[%s2021_s18] ss:$8 sps:$4 sm:$0xff]   ;;  %v1746_v53 = vld [vmem:[%s2021_s18 + $0x14] ss:$8 sps:$4 sm:$0xff]   ;;  %v1750_v55 = vld [vmem:[%s2021_s18 + $0x10] ss:$8 sps:$4 sm:$0xff]  }
  0x4d   : > { %1542 = vmatprep.subr.bf16.mxu0 %v1728_v37  ;;  %1652 = vmatprep.subr.bf16.mxu1 %v1728_v37  ;;  %v1743_v52 = vld [vmem:[%s2021_s18 + $0x80] ss:$8 sps:$4 sm:$0xff]   ;;  %v1748_v54 = vld [vmem:[%s2021_s18 + $0x94] ss:$8 sps:$4 sm:$0xff]   ;;  %v1751_v56 = vld [vmem:[%s2021_s18 + $0x90] ss:$8 sps:$4 sm:$0xff]  }
  0x4e   : > { %906 = vmatprep.mubr.bf16.mxu1 %v1745_v45  ;;  %v1752_v57 = vld [vmem:[%s2021_s18 + $0x24] ss:$8 sps:$4 sm:$0xff]   ;;  %v1756_v59 = vld [vmem:[%s2021_s18 + $0x20] ss:$8 sps:$4 sm:$0xff]   ;;  %v1758_v61 = vld [vmem:[%s2021_s18 + $0x34] ss:$8 sps:$4 sm:$0xff]  }
  0x4f   : > { %v1754_v58 = vld [vmem:[%s2021_s18 + $0xa4] ss:$8 sps:$4 sm:$0xff]   ;;  %v1757_v60 = vld [vmem:[%s2021_s18 + $0xa0] ss:$8 sps:$4 sm:$0xff]   ;;  %v1760_v62 = vld [vmem:[%s2021_s18 + $0xb4] ss:$8 sps:$4 sm:$0xff]  }
  0x50   : > { %1543 = vmatpush3.bf16.msra.mxu0 %v1729_v38  ;;  %1660 = vmatpush3.bf16.msra.mxu1 %v1729_v38  ;;  %v1762_v63 = vld [vmem:[%s2021_s18 + $0x30] ss:$8 sps:$4 sm:$0xff]   ;;  %v1764_v1 = vld [vmem:[%s2021_s18 + $0x44] ss:$8 sps:$4 sm:$0xff]   ;;  %v1768_v3 = vld [vmem:[%s2021_s18 + $0x40] ss:$8 sps:$4 sm:$0xff]  }
  0x51   : > { %1544 = vmatprep.subr.bf16.mxu0 %v1730_v39  ;;  %1653 = vmatprep.subr.bf16.mxu1 %v1730_v39  ;;  %v1763_v0 = vld [vmem:[%s2021_s18 + $0xb0] ss:$8 sps:$4 sm:$0xff]   ;;  %v1766_v2 = vld [vmem:[%s2021_s18 + $0xc4] ss:$8 sps:$4 sm:$0xff]   ;;  %v1769_v4 = vld [vmem:[%s2021_s18 + $0xc0] ss:$8 sps:$4 sm:$0xff]  }
  0x52   : > { %v1770_v5 = vld [vmem:[%s2021_s18 + $0x54] ss:$8 sps:$4 sm:$0xff]   ;;  %v1774_v7 = vld [vmem:[%s2021_s18 + $0x50] ss:$8 sps:$4 sm:$0xff]   ;;  %v1776_v9 = vld [vmem:[%s2021_s18 + $0x64] ss:$8 sps:$4 sm:$0xff]  }
  0x53   : > { %v1772_v6 = vld [vmem:[%s2021_s18 + $0xd4] ss:$8 sps:$4 sm:$0xff]   ;;  %v1775_v8 = vld [vmem:[%s2021_s18 + $0xd0] ss:$8 sps:$4 sm:$0xff]   ;;  %v1778_v10 = vld [vmem:[%s2021_s18 + $0xe4] ss:$8 sps:$4 sm:$0xff]  }
  0x54   : > { %1545 = vmatpush3.bf16.msra.mxu0 %v1731_v40  ;;  %1661 = vmatpush3.bf16.msra.mxu1 %v1731_v40  ;;  %v1780_v11 = vld [vmem:[%s2021_s18 + $0x60] ss:$8 sps:$4 sm:$0xff]   ;;  %v1782_v13 = vld [vmem:[%s2021_s18 + $0x74] ss:$8 sps:$4 sm:$0xff]   ;;  %v1786_v15 = vld [vmem:[%s2021_s18 + $0x70] ss:$8 sps:$4 sm:$0xff]  }
  0x55   : > { %1546 = vmatprep.subr.bf16.mxu0 %v1732_v41  ;;  %1654 = vmatprep.subr.bf16.mxu1 %v1732_v41  ;;  %v1781_v12 = vld [vmem:[%s2021_s18 + $0xe0] ss:$8 sps:$4 sm:$0xff]   ;;  %v1784_v14 = vld [vmem:[%s2021_s18 + $0xf4] ss:$8 sps:$4 sm:$0xff]   ;;  %v1787_v16 = vld [vmem:[%s2021_s18 + $0xf0] ss:$8 sps:$4 sm:$0xff]  }
  0x56   : > { %v458_v19 = vld [vmem:[#allocation2] sm:$0xff]  ;;  %v459_v27 = vld [vmem:[#allocation2 + $0x8] sm:$0xff]  ;;  %v460_v39 = vld [vmem:[#allocation2 + $0x10] sm:$0xff] }
  0x57   : > { %v474_v21 = vld [vmem:[#allocation2 + $0x80] sm:$0xff]  ;;  %v475_v29 = vld [vmem:[#allocation2 + $0x88] sm:$0xff]  ;;  %v476_v41 = vld [vmem:[#allocation2 + $0x90] sm:$0xff] }
  0x58   : > { %1547 = vmatpush3.bf16.msra.mxu0 %v1733_v42  ;;  %1662 = vmatpush3.bf16.msra.mxu1 %v1733_v42 }
  0x59   : > { %1548 = vmatprep.subr.bf16.mxu0 %v1734_v43  ;;  %1655 = vmatprep.subr.bf16.mxu1 %v1734_v43 }
  0x5c   : > { %1549 = vmatpush3.bf16.msra.mxu0 %v1735_v46  ;;  %1663 = vmatpush3.bf16.msra.mxu1 %v1735_v46 }
  0x5d   : > { %1550 = vmatprep.subr.bf16.mxu0 %v1736_v47  ;;  %1656 = vmatprep.subr.bf16.mxu1 %v1736_v47  ;;  %v461_v47 = vld [vmem:[#allocation2 + $0x18] sm:$0xff] }
  0x60   : > { %1551 = vmatpush3.bf16.msra.mxu0 %v1737_v48  ;;  %1664 = vmatpush3.bf16.msra.mxu1 %v1737_v48 }
  0x61   : > { %1552 = vmatprep.subr.bf16.mxu0 %v1738_v49  ;;  %1657 = vmatprep.subr.bf16.mxu1 %v1738_v49  ;;  %v477_v49 = vld [vmem:[#allocation2 + $0x98] sm:$0xff] }
  0x64   : > { %1553 = vmatpush3.bf16.msra.mxu0 %v1739_v50  ;;  %1665 = vmatpush3.bf16.msra.mxu1 %v1739_v50 }
  0x67   : > { %843 = vmatmul.mubr.bf16.vlgmr.msra.gmra.mrb[0].mxu0 %v1740_v51  ;;  %907 = vmatmul.mubr.bf16.vlgmr.msra.gmra.mrb[0].mxu1 %v1743_v52 }
  0x68   : > { %850 = vmatprep.mubr.bf16.mxu0 %v1746_v53  ;;  %914 = vmatprep.mubr.bf16.mxu1 %v1748_v54 }
  0x6f   : > { %851 = vmatmul.mubr.bf16.gmra.mrb[4].mxu0 %v1750_v55  ;;  %915 = vmatmul.mubr.bf16.gmra.mrb[4].mxu1 %v1751_v56 }
  0x70   : > { %858 = vmatprep.mubr.bf16.mxu0 %v1752_v57  ;;  %922 = vmatprep.mubr.bf16.mxu1 %v1754_v58 }
  0x77   : > { %859 = vmatmul.mubr.bf16.gmra.mrb[8].mxu0 %v1756_v59  ;;  %923 = vmatmul.mubr.bf16.gmra.mrb[8].mxu1 %v1757_v60  ;;  %v462_v59 = vld [vmem:[#allocation2 + $0x20] sm:$0xff] }
  0x78   : > { %866 = vmatprep.mubr.bf16.mxu0 %v1758_v61  ;;  %930 = vmatprep.mubr.bf16.mxu1 %v1760_v62  ;;  %v478_v61 = vld [vmem:[#allocation2 + $0xa0] sm:$0xff] }
  0x7f   : > { %867 = vmatmul.mubr.bf16.gmra.mrb[12].mxu0 %v1762_v63  ;;  %931 = vmatmul.mubr.bf16.gmra.mrb[12].mxu1 %v1763_v0 }
  0x80   : > { %874 = vmatprep.mubr.bf16.mxu0 %v1764_v1  ;;  %938 = vmatprep.mubr.bf16.mxu1 %v1766_v2 }
  0x87   : > { %875 = vmatmul.mubr.bf16.gmra.mrb[16].mxu0 %v1768_v3  ;;  %939 = vmatmul.mubr.bf16.gmra.mrb[16].mxu1 %v1769_v4  ;;  %v463_v3 = vld [vmem:[#allocation2 + $0x28] sm:$0xff] }
  0x88   : > { %882 = vmatprep.mubr.bf16.mxu0 %v1770_v5  ;;  %946 = vmatprep.mubr.bf16.mxu1 %v1772_v6  ;;  %v479_v5 = vld [vmem:[#allocation2 + $0xa8] sm:$0xff] }
  0x8f   : > { %883 = vmatmul.mubr.bf16.gmra.mrb[20].mxu0 %v1774_v7  ;;  %947 = vmatmul.mubr.bf16.gmra.mrb[20].mxu1 %v1775_v8 }
  0x90   : > { %890 = vmatprep.mubr.bf16.mxu0 %v1776_v9  ;;  %954 = vmatprep.mubr.bf16.mxu1 %v1778_v10 }
  0x97   : > { %891 = vmatmul.mubr.bf16.gmra.mrb[24].mxu0 %v1780_v11  ;;  %955 = vmatmul.mubr.bf16.gmra.mrb[24].mxu1 %v1781_v12 }
  0x98   : > { %898 = vmatprep.mubr.bf16.mxu0 %v1782_v13  ;;  %962 = vmatprep.mubr.bf16.mxu1 %v1784_v14 }
  0x9f   : > { %899 = vmatmul.mubr.bf16.gmra.mrb[28].mxu0 %v1786_v15  ;;  %963 = vmatmul.mubr.bf16.gmra.mrb[28].mxu1 %v1787_v16  ;;  %v464_v15 = vld [vmem:[#allocation2 + $0x30] sm:$0xff] }
 0x13a   : > { %v1554_v17 = vpop.f32.mrb[0].mxu0  ;;  %v1602_v18 = vpop.f32.mrb[0].mxu1 }
 0x13b   : > { %v1555_v20 = vpop.f32.mrb[1].mxu0  ;;  %v1603_v22 = vpop.f32.mrb[1].mxu1 }
 0x13c   : > { %v1556_v23 = vadd.f32 %v1555_v20, %v1554_v17  ;;  %v1604_v24 = vadd.f32 %v1603_v22, %v1602_v18  ;;  %v1557_v25 = vpop.f32.mrb[2].mxu0  ;;  %v1605_v26 = vpop.f32.mrb[2].mxu1  ;;  %v480_v17 = vld [vmem:[#allocation2 + $0xb0] sm:$0xff] }
 0x13d   : > { %v1558_v28 = vpop.f32.mrb[3].mxu0  ;;  %v1606_v30 = vpop.f32.mrb[3].mxu1 }
 0x13e   : > { %v971_v31 = vadd.f32 %v1556_v23, %v458_v19  ;;  %v987_v32 = vadd.f32 %v1604_v24, %v474_v21  ;;  %v1559_v33 = vadd.f32 %v1558_v28, %v1557_v25  ;;  %v1607_v34 = vadd.f32 %v1606_v30, %v1605_v26  ;;  %v465_v23 = vld [vmem:[#allocation2 + $0x38] sm:$0xff] }
 0x13f   : > { %v481_v25 = vld [vmem:[#allocation2 + $0xb8] sm:$0xff] }
 0x140   : > { %1003 = vst [vmem:[#allocation2] sm:$0xff] %v971_v31  ;;  %1019 = vst [vmem:[#allocation2 + $0x80] sm:$0xff] %v987_v32  ;;  %v972_v35 = vadd.f32 %v1559_v33, %v459_v27  ;;  %v988_v36 = vadd.f32 %v1607_v34, %v475_v29 }
 0x142   : > { %1004 = vst [vmem:[#allocation2 + $0x8] sm:$0xff] %v972_v35  ;;  %1020 = vst [vmem:[#allocation2 + $0x88] sm:$0xff] %v988_v36  ;;  %v1560_v37 = vpop.f32.mrb[4].mxu0  ;;  %v1608_v38 = vpop.f32.mrb[4].mxu1  ;;  %v466_v35 = vld [vmem:[#allocation2 + $0x40] sm:$0xff] }
 0x143   : > { %v1561_v40 = vpop.f32.mrb[5].mxu0  ;;  %v1609_v42 = vpop.f32.mrb[5].mxu1 }
 0x144   : > { %v1562_v43 = vadd.f32 %v1561_v40, %v1560_v37  ;;  %v1610_v44 = vadd.f32 %v1609_v42, %v1608_v38  ;;  %v1563_v45 = vpop.f32.mrb[6].mxu0  ;;  %v1611_v46 = vpop.f32.mrb[6].mxu1  ;;  %v482_v37 = vld [vmem:[#allocation2 + $0xc0] sm:$0xff] }
 0x145   : > { %v1564_v48 = vpop.f32.mrb[7].mxu0  ;;  %v1612_v50 = vpop.f32.mrb[7].mxu1 }
 0x146   : > { %v973_v51 = vadd.f32 %v1562_v43, %v460_v39  ;;  %v989_v52 = vadd.f32 %v1610_v44, %v476_v41  ;;  %v1565_v53 = vadd.f32 %v1564_v48, %v1563_v45  ;;  %v1613_v54 = vadd.f32 %v1612_v50, %v1611_v46  ;;  %v467_v43 = vld [vmem:[#allocation2 + $0x48] sm:$0xff] }
 0x147   : > { %v483_v45 = vld [vmem:[#allocation2 + $0xc8] sm:$0xff] }
 0x148   : > { %1005 = vst [vmem:[#allocation2 + $0x10] sm:$0xff] %v973_v51  ;;  %1021 = vst [vmem:[#allocation2 + $0x90] sm:$0xff] %v989_v52  ;;  %v974_v55 = vadd.f32 %v1565_v53, %v461_v47  ;;  %v990_v56 = vadd.f32 %v1613_v54, %v477_v49 }
 0x14a   : > { %1006 = vst [vmem:[#allocation2 + $0x18] sm:$0xff] %v974_v55  ;;  %1022 = vst [vmem:[#allocation2 + $0x98] sm:$0xff] %v990_v56  ;;  %v1566_v57 = vpop.f32.mrb[8].mxu0  ;;  %v1614_v58 = vpop.f32.mrb[8].mxu1  ;;  %v468_v55 = vld [vmem:[#allocation2 + $0x50] sm:$0xff] }
 0x14b   : > { %v1567_v60 = vpop.f32.mrb[9].mxu0  ;;  %v1615_v62 = vpop.f32.mrb[9].mxu1 }
 0x14c   : > { %v1568_v63 = vadd.f32 %v1567_v60, %v1566_v57  ;;  %v1616_v0 = vadd.f32 %v1615_v62, %v1614_v58  ;;  %v1569_v1 = vpop.f32.mrb[10].mxu0  ;;  %v1617_v2 = vpop.f32.mrb[10].mxu1  ;;  %v484_v57 = vld [vmem:[#allocation2 + $0xd0] sm:$0xff] }
 0x14d   : > { %v1570_v4 = vpop.f32.mrb[11].mxu0  ;;  %v1618_v6 = vpop.f32.mrb[11].mxu1 }
 0x14e   : > { %v975_v7 = vadd.f32 %v1568_v63, %v462_v59  ;;  %v991_v8 = vadd.f32 %v1616_v0, %v478_v61  ;;  %v1571_v9 = vadd.f32 %v1570_v4, %v1569_v1  ;;  %v1619_v10 = vadd.f32 %v1618_v6, %v1617_v2  ;;  %v469_v63 = vld [vmem:[#allocation2 + $0x58] sm:$0xff] }
 0x14f   : > { %v485_v1 = vld [vmem:[#allocation2 + $0xd8] sm:$0xff] }
 0x150   : > { %1007 = vst [vmem:[#allocation2 + $0x20] sm:$0xff] %v975_v7  ;;  %1023 = vst [vmem:[#allocation2 + $0xa0] sm:$0xff] %v991_v8  ;;  %v976_v11 = vadd.f32 %v1571_v9, %v463_v3  ;;  %v992_v12 = vadd.f32 %v1619_v10, %v479_v5 }
 0x152   : > { %1008 = vst [vmem:[#allocation2 + $0x28] sm:$0xff] %v976_v11  ;;  %1024 = vst [vmem:[#allocation2 + $0xa8] sm:$0xff] %v992_v12  ;;  %v1572_v13 = vpop.f32.mrb[12].mxu0  ;;  %v1620_v14 = vpop.f32.mrb[12].mxu1  ;;  %v470_v11 = vld [vmem:[#allocation2 + $0x60] sm:$0xff] }
 0x153   : > { %v1573_v16 = vpop.f32.mrb[13].mxu0  ;;  %v1621_v18 = vpop.f32.mrb[13].mxu1 }
 0x154   : > { %v1574_v19 = vadd.f32 %v1573_v16, %v1572_v13  ;;  %v1622_v20 = vadd.f32 %v1621_v18, %v1620_v14  ;;  %v1575_v21 = vpop.f32.mrb[14].mxu0  ;;  %v1623_v22 = vpop.f32.mrb[14].mxu1  ;;  %v486_v13 = vld [vmem:[#allocation2 + $0xe0] sm:$0xff] }
 0x155   : > { %v1576_v24 = vpop.f32.mrb[15].mxu0  ;;  %v1624_v26 = vpop.f32.mrb[15].mxu1 }
 0x156   : > { %v977_v27 = vadd.f32 %v1574_v19, %v464_v15  ;;  %v993_v28 = vadd.f32 %v1622_v20, %v480_v17  ;;  %v1577_v29 = vadd.f32 %v1576_v24, %v1575_v21  ;;  %v1625_v30 = vadd.f32 %v1624_v26, %v1623_v22  ;;  %v471_v19 = vld [vmem:[#allocation2 + $0x68] sm:$0xff] }
 0x157   : > { %v487_v21 = vld [vmem:[#allocation2 + $0xe8] sm:$0xff] }
 0x158   : > { %1009 = vst [vmem:[#allocation2 + $0x30] sm:$0xff] %v977_v27  ;;  %1025 = vst [vmem:[#allocation2 + $0xb0] sm:$0xff] %v993_v28  ;;  %v978_v31 = vadd.f32 %v1577_v29, %v465_v23  ;;  %v994_v32 = vadd.f32 %v1625_v30, %v481_v25 }
 0x15a   : > { %1010 = vst [vmem:[#allocation2 + $0x38] sm:$0xff] %v978_v31  ;;  %1026 = vst [vmem:[#allocation2 + $0xb8] sm:$0xff] %v994_v32  ;;  %v1578_v33 = vpop.f32.mrb[16].mxu0  ;;  %v1626_v34 = vpop.f32.mrb[16].mxu1  ;;  %v472_v31 = vld [vmem:[#allocation2 + $0x70] sm:$0xff] }
 0x15b   : > { %v1579_v36 = vpop.f32.mrb[17].mxu0  ;;  %v1627_v38 = vpop.f32.mrb[17].mxu1 }
 0x15c   : > { %v1580_v39 = vadd.f32 %v1579_v36, %v1578_v33  ;;  %v1628_v40 = vadd.f32 %v1627_v38, %v1626_v34  ;;  %v1581_v41 = vpop.f32.mrb[18].mxu0  ;;  %v1629_v42 = vpop.f32.mrb[18].mxu1  ;;  %v488_v33 = vld [vmem:[#allocation2 + $0xf0] sm:$0xff] }
 0x15d   : > { %v1582_v44 = vpop.f32.mrb[19].mxu0  ;;  %v1630_v46 = vpop.f32.mrb[19].mxu1 }
 0x15e   : > { %v979_v47 = vadd.f32 %v1580_v39, %v466_v35  ;;  %v995_v48 = vadd.f32 %v1628_v40, %v482_v37  ;;  %v1583_v49 = vadd.f32 %v1582_v44, %v1581_v41  ;;  %v1631_v50 = vadd.f32 %v1630_v46, %v1629_v42  ;;  %v473_v39 = vld [vmem:[#allocation2 + $0x78] sm:$0xff] }
 0x15f   : > { %v489_v41 = vld [vmem:[#allocation2 + $0xf8] sm:$0xff] }
 0x160   : > { %1011 = vst [vmem:[#allocation2 + $0x40] sm:$0xff] %v979_v47  ;;  %1027 = vst [vmem:[#allocation2 + $0xc0] sm:$0xff] %v995_v48  ;;  %v980_v51 = vadd.f32 %v1583_v49, %v467_v43  ;;  %v996_v52 = vadd.f32 %v1631_v50, %v483_v45  ;;  %v1073_v49 = vld [vmem:[%s2014_s8 + $0x10] sm:$0xff] (!%p1533_p13)  ;;  %v1071_v50 = vld [vmem:[%s2014_s8] sm:$0xff] (!%p1533_p13) }
 0x162   : > { %1012 = vst [vmem:[#allocation2 + $0x48] sm:$0xff] %v980_v51  ;;  %1028 = vst [vmem:[#allocation2 + $0xc8] sm:$0xff] %v996_v52  ;;  %v1584_v53 = vpop.f32.mrb[20].mxu0  ;;  %v1632_v54 = vpop.f32.mrb[20].mxu1  ;;  %v1847_v51 = vmov (!%p1533_p13), 0   ;;  %v1074_v52 = vld [vmem:[%s2014_s8 + $0x18] sm:$0xff] (!%p1533_p13) }
 0x163   : > { %v1585_v56 = vpop.f32.mrb[21].mxu0  ;;  %v1633_v58 = vpop.f32.mrb[21].mxu1  ;;  %1789 = vset.pattern.permute.xlu1 (!%p1533_p13), %v1847_v51  ;;  %1788 = vset.pattern.permute.xlu0 (!%p1533_p13), %v1847_v51 }
 0x164   : > { %v1586_v59 = vadd.f32 %v1585_v56, %v1584_v53  ;;  %v1634_v60 = vadd.f32 %v1633_v58, %v1632_v54  ;;  %v1587_v61 = vpop.f32.mrb[22].mxu0  ;;  %v1635_v62 = vpop.f32.mrb[22].mxu1  ;;  %1115 = vperm.xlu1 (!%p1533_p13), %1789, %v1073_v49   ;;  %1105 = vperm.xlu0 (!%p1533_p13), %1788, %v1071_v50   ;;  %v1072_v53 = vld [vmem:[%s2014_s8 + $0x8] sm:$0xff] (!%p1533_p13)  ;;  %v1078_v56 = vld [vmem:[%s2014_s8 + $0x38] sm:$0xff] (!%p1533_p13) }
 0x165   : > { %v1588_v0 = vpop.f32.mrb[23].mxu0  ;;  %v1636_v2 = vpop.f32.mrb[23].mxu1  ;;  %v1076_v54 = vld [vmem:[%s2014_s8 + $0x28] sm:$0xff] (!%p1533_p13) }
 0x166   : > { %v981_v3 = vadd.f32 %v1586_v59, %v468_v55  ;;  %v997_v4 = vadd.f32 %v1634_v60, %v484_v57  ;;  %v1589_v5 = vadd.f32 %v1588_v0, %v1587_v61  ;;  %v1637_v6 = vadd.f32 %v1636_v2, %v1635_v62  ;;  %v1075_v55 = vld [vmem:[%s2014_s8 + $0x20] sm:$0xff] (!%p1533_p13)  ;;  %v1077_v57 = vld [vmem:[%s2014_s8 + $0x30] sm:$0xff] (!%p1533_p13)  ;;  %v1080_v58 = vld [vmem:[%s2014_s8 + $0x48] sm:$0xff] (!%p1533_p13) }
 0x167   : > { %v1079_v59 = vld [vmem:[%s2014_s8 + $0x40] sm:$0xff] (!%p1533_p13)  ;;  %v1082_v60 = vld [vmem:[%s2014_s8 + $0x58] sm:$0xff] (!%p1533_p13)  ;;  %v1081_v61 = vld [vmem:[%s2014_s8 + $0x50] sm:$0xff] (!%p1533_p13) }
 0x168   : > { %1013 = vst [vmem:[#allocation2 + $0x50] sm:$0xff] %v981_v3  ;;  %1029 = vst [vmem:[#allocation2 + $0xd0] sm:$0xff] %v997_v4  ;;  %v982_v7 = vadd.f32 %v1589_v5, %v469_v63  ;;  %v998_v8 = vadd.f32 %v1637_v6, %v485_v1  ;;  %1120 = vperm.xlu1 (!%p1533_p13), %1789, %v1074_v52   ;;  %1110 = vperm.xlu0 (!%p1533_p13), %1788, %v1072_v53   ;;  %v1084_v62 = vld [vmem:[%s2014_s8 + $0x68] sm:$0xff] (!%p1533_p13)  ;;  %v1083_v63 = vld [vmem:[%s2014_s8 + $0x60] sm:$0xff] (!%p1533_p13) }
 0x169   : > { %v1086_v0 = vld [vmem:[%s2014_s8 + $0x78] sm:$0xff] (!%p1533_p13)  ;;  %v1085_v1 = vld [vmem:[%s2014_s8 + $0x70] sm:$0xff] (!%p1533_p13)  ;;  %v1088_v2 = vld [vmem:[%s2014_s8 + $0x88] sm:$0xff] (!%p1533_p13) }
 0x16a   : > { %1014 = vst [vmem:[#allocation2 + $0x58] sm:$0xff] %v982_v7  ;;  %1030 = vst [vmem:[#allocation2 + $0xd8] sm:$0xff] %v998_v8  ;;  %v1590_v9 = vpop.f32.mrb[24].mxu0  ;;  %v1638_v10 = vpop.f32.mrb[24].mxu1  ;;  %v1087_v3 = vld [vmem:[%s2014_s8 + $0x80] sm:$0xff] (!%p1533_p13)  ;;  %v1090_v4 = vld [vmem:[%s2014_s8 + $0x98] sm:$0xff] (!%p1533_p13) }
 0x16b   : > { %v1591_v12 = vpop.f32.mrb[25].mxu0  ;;  %v1639_v14 = vpop.f32.mrb[25].mxu1  ;;  %v1089_v5 = vld [vmem:[%s2014_s8 + $0x90] sm:$0xff] (!%p1533_p13)  ;;  %v1092_v6 = vld [vmem:[%s2014_s8 + $0xa8] sm:$0xff] (!%p1533_p13)  ;;  %v1091_v7 = vld [vmem:[%s2014_s8 + $0xa0] sm:$0xff] (!%p1533_p13) }
 0x16c   : > { %v1592_v15 = vadd.f32 %v1591_v12, %v1590_v9  ;;  %v1640_v16 = vadd.f32 %v1639_v14, %v1638_v10  ;;  %v1593_v17 = vpop.f32.mrb[26].mxu0  ;;  %v1641_v18 = vpop.f32.mrb[26].mxu1  ;;  %1130 = vperm.xlu1 (!%p1533_p13), %1789, %v1076_v54   ;;  %1125 = vperm.xlu0 (!%p1533_p13), %1788, %v1075_v55   ;;  %v1094_v8 = vld [vmem:[%s2014_s8 + $0xb8] sm:$0xff] (!%p1533_p13)  ;;  %v1093_v9 = vld [vmem:[%s2014_s8 + $0xb0] sm:$0xff] (!%p1533_p13)  ;;  %v1096_v10 = vld [vmem:[%s2014_s8 + $0xc8] sm:$0xff] (!%p1533_p13) }
 0x16d   : > { %v1594_v20 = vpop.f32.mrb[27].mxu0  ;;  %v1642_v22 = vpop.f32.mrb[27].mxu1  ;;  %v1098_v12 = vld [vmem:[%s2014_s8 + $0xd8] sm:$0xff] (!%p1533_p13)  ;;  %v1100_v14 = vld [vmem:[%s2014_s8 + $0xe8] sm:$0xff] (!%p1533_p13)  ;;  %v1047_v50 = vld [vmem:[#allocation2 + $0x40] sm:$0xff] (!%p1533_p13) }
 0x16e   : > { %v983_v23 = vadd.f32 %v1592_v15, %v470_v11  ;;  %v999_v24 = vadd.f32 %v1640_v16, %v486_v13  ;;  %v1595_v25 = vadd.f32 %v1594_v20, %v1593_v17  ;;  %v1643_v26 = vadd.f32 %v1642_v22, %v1641_v18  ;;  %v1095_v11 = vld [vmem:[%s2014_s8 + $0xc0] sm:$0xff] (!%p1533_p13)  ;;  %v1097_v13 = vld [vmem:[%s2014_s8 + $0xd0] sm:$0xff] (!%p1533_p13)  ;;  %v1102_v16 = vld [vmem:[%s2014_s8 + $0xf8] sm:$0xff] (!%p1533_p13) }
 0x16f   : > { %v1099_v15 = vld [vmem:[%s2014_s8 + $0xe0] sm:$0xff] (!%p1533_p13)  ;;  %v1101_v17 = vld [vmem:[%s2014_s8 + $0xf0] sm:$0xff] (!%p1533_p13)  ;;  %v1048_v49 = vld [vmem:[#allocation2 + $0x48] sm:$0xff] (!%p1533_p13) }
 0x170   : > { %1015 = vst [vmem:[#allocation2 + $0x60] sm:$0xff] %v983_v23  ;;  %1031 = vst [vmem:[#allocation2 + $0xe0] sm:$0xff] %v999_v24  ;;  %v984_v27 = vadd.f32 %v1595_v25, %v471_v19  ;;  %v1000_v28 = vadd.f32 %v1643_v26, %v487_v21  ;;  %1140 = vperm.xlu1 (!%p1533_p13), %1789, %v1078_v56   ;;  %1135 = vperm.xlu0 (!%p1533_p13), %1788, %v1077_v57   ;;  %v1041_v18 = vld [vmem:[#allocation2 + $0x10] sm:$0xff] (!%p1533_p13)  ;;  %v1039_v19 = vld [vmem:[#allocation2] sm:$0xff] (!%p1533_p13) }
 0x171   : > { %v2108_v20 = vld [vmem:[%s2198_s3] ss:$0 sm:$0xff] (!%p1533_p13)  ;;  %v1042_v25 = vld [vmem:[#allocation2 + $0x18] sm:$0xff] (!%p1533_p13)  ;;  %v1040_v26 = vld [vmem:[#allocation2 + $0x8] sm:$0xff] (!%p1533_p13) }
 0x172   : > { %1016 = vst [vmem:[#allocation2 + $0x68] sm:$0xff] %v984_v27  ;;  %1032 = vst [vmem:[#allocation2 + $0xe8] sm:$0xff] %v1000_v28  ;;  %v1596_v29 = vpop.f32.mrb[28].mxu0  ;;  %v1644_v30 = vpop.f32.mrb[28].mxu1  ;;  %v1050_v57 = vld [vmem:[#allocation2 + $0x58] sm:$0xff] (!%p1533_p13) }
 0x173   : > { %v1597_v32 = vpop.f32.mrb[29].mxu0  ;;  %v1645_v34 = vpop.f32.mrb[29].mxu1 }
 0x174   : > { %v1598_v35 = vadd.f32 %v1597_v32, %v1596_v29  ;;  %v1646_v36 = vadd.f32 %v1645_v34, %v1644_v30  ;;  %v1599_v37 = vpop.f32.mrb[30].mxu0  ;;  %v1647_v38 = vpop.f32.mrb[30].mxu1  ;;  %1038 = sbr.rel (%p1533_p13) target bundleno = 549 (0x225), region = 82  ;;  %1150 = vperm.xlu1 (!%p1533_p13), %1789, %v1080_v58   ;;  %1145 = vperm.xlu0 (!%p1533_p13), %1788, %v1079_v59   ;;  %v1043_v34 = vld [vmem:[#allocation2 + $0x20] sm:$0xff] (!%p1533_p13)  ;;  %v1049_v58 = vld [vmem:[#allocation2 + $0x50] sm:$0xff] (!%p1533_p13) }
 0x175   : > { %v1600_v40 = vpop.f32.mrb[31].mxu0  ;;  %v1648_v42 = vpop.f32.mrb[31].mxu1 }
 0x176   : > { %v985_v43 = vadd.f32 %v1598_v35, %v472_v31  ;;  %v1001_v44 = vadd.f32 %v1646_v36, %v488_v33  ;;  %v1601_v45 = vadd.f32 %v1600_v40, %v1599_v37  ;;  %v1649_v46 = vadd.f32 %v1648_v42, %v1647_v38  ;;  %v1044_v33 = vld [vmem:[#allocation2 + $0x28] sm:$0xff] (!%p1533_p13)  ;;  %v1045_v42 = vld [vmem:[#allocation2 + $0x30] sm:$0xff] (!%p1533_p13) }
 0x178   : > { %1017 = vst [vmem:[#allocation2 + $0x70] sm:$0xff] %v985_v43  ;;  %1033 = vst [vmem:[#allocation2 + $0xf0] sm:$0xff] %v1001_v44  ;;  %v986_v47 = vadd.f32 %v1601_v45, %v473_v39  ;;  %v1002_v48 = vadd.f32 %v1649_v46, %v489_v41  ;;  %1160 = vperm.xlu1 (!%p1533_p13), %1789, %v1082_v60   ;;  %1155 = vperm.xlu0 (!%p1533_p13), %1788, %v1081_v61   ;;  %v1046_v41 = vld [vmem:[#allocation2 + $0x38] sm:$0xff] (!%p1533_p13) }
 0x17a   : > { %1018 = vst [vmem:[#allocation2 + $0x78] sm:$0xff] %v986_v47  ;;  %1034 = vst [vmem:[#allocation2 + $0xf8] sm:$0xff] %v1002_v48 }
 0x17c   : > { %1170 = vperm.xlu1 %1789, %v1084_v62   ;;  %1165 = vperm.xlu0 %1788, %v1083_v63  }
 0x180   : > { %1180 = vperm.xlu1 %1789, %v1086_v0   ;;  %1175 = vperm.xlu0 %1788, %v1085_v1   ;;  %v1052_v1 = vld [vmem:[#allocation2 + $0x68] sm:$0xff] }
 0x184   : > { %1190 = vperm.xlu1 %1789, %v1088_v2   ;;  %1185 = vperm.xlu0 %1788, %v1087_v3   ;;  %v1051_v2 = vld [vmem:[#allocation2 + $0x60] sm:$0xff] }
 0x188   : > { %1200 = vperm.xlu1 %1789, %v1090_v4   ;;  %1195 = vperm.xlu0 %1788, %v1089_v5  }
 0x18c   : > { %1210 = vperm.xlu1 %1789, %v1092_v6   ;;  %1205 = vperm.xlu0 %1788, %v1091_v7  }
 0x190   : > { %1220 = vperm.xlu1 %1789, %v1094_v8   ;;  %1215 = vperm.xlu0 %1788, %v1093_v9   ;;  %v1054_v9 = vld [vmem:[#allocation2 + $0x78] sm:$0xff] }
 0x194   : > { %1230 = vperm.xlu1 %1789, %v1096_v10   ;;  %1225 = vperm.xlu0 %1788, %v1095_v11   ;;  %v1053_v10 = vld [vmem:[#allocation2 + $0x70] sm:$0xff] }
 0x198   : > { %1240 = vperm.xlu1 %1789, %v1098_v12   ;;  %1235 = vperm.xlu0 %1788, %v1097_v13  }
 0x19c   : > { %1250 = vperm.xlu1 %1789, %v1100_v14   ;;  %1245 = vperm.xlu0 %1788, %v1099_v15  }
 0x1a0   : > { %1260 = vperm.xlu1 %1789, %v1102_v16   ;;  %1255 = vperm.xlu0 %1788, %v1101_v17   ;;  %v1056_v17 = vld [vmem:[#allocation2 + $0x88] sm:$0xff] }
 0x1e3   : > { %v1116_v21 = vpop.permute.xlu1 %1115  ;;  %v1106_v22 = vpop.permute.xlu0 %1105 }
 0x1e4   : > { %v1265_v23 = vmul.f32 %v1116_v21, %v1041_v18  ;;  %v1263_v24 = vmul.f32 %v1106_v22, %v1039_v19  ;;  %v1055_v18 = vld [vmem:[#allocation2 + $0x80] sm:$0xff] }
 0x1e6   : > { %v1304_v27 = vadd.f32 %v2108_v20, %v1265_v23  ;;  %v1302_v28 = vadd.f32 %v2108_v20, %v1263_v24 }
 0x1e7   : > { %v1121_v29 = vpop.permute.xlu1 %1120  ;;  %v1111_v30 = vpop.permute.xlu0 %1110 }
 0x1e8   : > { %1336 = vst [vmem:[%s2019_s10 + $0x10] sm:$0xff] %v1304_v27  ;;  %1334 = vst [vmem:[%s2019_s10] sm:$0xff] %v1302_v28  ;;  %v1266_v31 = vmul.f32 %v1121_v29, %v1042_v25  ;;  %v1264_v32 = vmul.f32 %v1111_v30, %v1040_v26  ;;  %v1058_v26 = vld [vmem:[#allocation2 + $0x98] sm:$0xff]  ;;  %v1057_v27 = vld [vmem:[#allocation2 + $0x90] sm:$0xff] }
 0x1ea   : > { %v1305_v35 = vadd.f32 %v2108_v20, %v1266_v31  ;;  %v1303_v36 = vadd.f32 %v2108_v20, %v1264_v32 }
 0x1eb   : > { %v1131_v37 = vpop.permute.xlu1 %1130  ;;  %v1126_v38 = vpop.permute.xlu0 %1125 }
 0x1ec   : > { %1337 = vst [vmem:[%s2019_s10 + $0x18] sm:$0xff] %v1305_v35  ;;  %1335 = vst [vmem:[%s2019_s10 + $0x8] sm:$0xff] %v1303_v36  ;;  %v1268_v39 = vmul.f32 %v1131_v37, %v1044_v33  ;;  %v1267_v40 = vmul.f32 %v1126_v38, %v1043_v34  ;;  %v1060_v34 = vld [vmem:[#allocation2 + $0xa8] sm:$0xff]  ;;  %v1059_v35 = vld [vmem:[#allocation2 + $0xa0] sm:$0xff] }
 0x1ee   : > { %v1307_v43 = vadd.f32 %v2108_v20, %v1268_v39  ;;  %v1306_v44 = vadd.f32 %v2108_v20, %v1267_v40 }
 0x1ef   : > { %v1141_v45 = vpop.permute.xlu1 %1140  ;;  %v1136_v46 = vpop.permute.xlu0 %1135 }
 0x1f0   : > { %1339 = vst [vmem:[%s2019_s10 + $0x28] sm:$0xff] %v1307_v43  ;;  %1338 = vst [vmem:[%s2019_s10 + $0x20] sm:$0xff] %v1306_v44  ;;  %v1270_v47 = vmul.f32 %v1141_v45, %v1046_v41  ;;  %v1269_v48 = vmul.f32 %v1136_v46, %v1045_v42  ;;  %v1062_v42 = vld [vmem:[#allocation2 + $0xb8] sm:$0xff]  ;;  %v1061_v43 = vld [vmem:[#allocation2 + $0xb0] sm:$0xff] }
 0x1f2   : > { %v1309_v51 = vadd.f32 %v2108_v20, %v1270_v47  ;;  %v1308_v52 = vadd.f32 %v2108_v20, %v1269_v48 }
 0x1f3   : > { %v1151_v53 = vpop.permute.xlu1 %1150  ;;  %v1146_v54 = vpop.permute.xlu0 %1145 }
 0x1f4   : > { %1341 = vst [vmem:[%s2019_s10 + $0x38] sm:$0xff] %v1309_v51  ;;  %1340 = vst [vmem:[%s2019_s10 + $0x30] sm:$0xff] %v1308_v52  ;;  %v1272_v55 = vmul.f32 %v1151_v53, %v1048_v49  ;;  %v1271_v56 = vmul.f32 %v1146_v54, %v1047_v50  ;;  %v1064_v50 = vld [vmem:[#allocation2 + $0xc8] sm:$0xff]  ;;  %v1063_v51 = vld [vmem:[#allocation2 + $0xc0] sm:$0xff] }
 0x1f6   : > { %v1311_v59 = vadd.f32 %v2108_v20, %v1272_v55  ;;  %v1310_v60 = vadd.f32 %v2108_v20, %v1271_v56 }
 0x1f7   : > { %v1161_v61 = vpop.permute.xlu1 %1160  ;;  %v1156_v62 = vpop.permute.xlu0 %1155 }
 0x1f8   : > { %1343 = vst [vmem:[%s2019_s10 + $0x48] sm:$0xff] %v1311_v59  ;;  %1342 = vst [vmem:[%s2019_s10 + $0x40] sm:$0xff] %v1310_v60  ;;  %v1274_v63 = vmul.f32 %v1161_v61, %v1050_v57  ;;  %v1273_v0 = vmul.f32 %v1156_v62, %v1049_v58  ;;  %v1066_v58 = vld [vmem:[#allocation2 + $0xd8] sm:$0xff]  ;;  %v1065_v59 = vld [vmem:[#allocation2 + $0xd0] sm:$0xff] }
 0x1fa   : > { %v1313_v3 = vadd.f32 %v2108_v20, %v1274_v63  ;;  %v1312_v4 = vadd.f32 %v2108_v20, %v1273_v0 }
 0x1fb   : > { %v1171_v5 = vpop.permute.xlu1 %1170  ;;  %v1166_v6 = vpop.permute.xlu0 %1165 }
 0x1fc   : > { %1345 = vst [vmem:[%s2019_s10 + $0x58] sm:$0xff] %v1313_v3  ;;  %1344 = vst [vmem:[%s2019_s10 + $0x50] sm:$0xff] %v1312_v4  ;;  %v1276_v7 = vmul.f32 %v1171_v5, %v1052_v1  ;;  %v1275_v8 = vmul.f32 %v1166_v6, %v1051_v2  ;;  %v1068_v2 = vld [vmem:[#allocation2 + $0xe8] sm:$0xff]  ;;  %v1067_v3 = vld [vmem:[#allocation2 + $0xe0] sm:$0xff] }
 0x1fe   : > { %v1315_v11 = vadd.f32 %v2108_v20, %v1276_v7  ;;  %v1314_v12 = vadd.f32 %v2108_v20, %v1275_v8 }
 0x1ff   : > { %v1181_v13 = vpop.permute.xlu1 %1180  ;;  %v1176_v14 = vpop.permute.xlu0 %1175 }
 0x200   : > { %1347 = vst [vmem:[%s2019_s10 + $0x68] sm:$0xff] %v1315_v11  ;;  %1346 = vst [vmem:[%s2019_s10 + $0x60] sm:$0xff] %v1314_v12  ;;  %v1278_v15 = vmul.f32 %v1181_v13, %v1054_v9  ;;  %v1277_v16 = vmul.f32 %v1176_v14, %v1053_v10  ;;  %v1070_v10 = vld [vmem:[#allocation2 + $0xf8] sm:$0xff]  ;;  %v1069_v11 = vld [vmem:[#allocation2 + $0xf0] sm:$0xff] }
 0x202   : > { %v1317_v19 = vadd.f32 %v2108_v20, %v1278_v15  ;;  %v1316_v21 = vadd.f32 %v2108_v20, %v1277_v16 }
 0x203   : > { %v1191_v22 = vpop.permute.xlu1 %1190  ;;  %v1186_v23 = vpop.permute.xlu0 %1185 }
 0x204   : > { %1349 = vst [vmem:[%s2019_s10 + $0x78] sm:$0xff] %v1317_v19  ;;  %1348 = vst [vmem:[%s2019_s10 + $0x70] sm:$0xff] %v1316_v21  ;;  %v1280_v24 = vmul.f32 %v1191_v22, %v1056_v17  ;;  %v1279_v25 = vmul.f32 %v1186_v23, %v1055_v18 }
 0x206   : > { %v1319_v28 = vadd.f32 %v2108_v20, %v1280_v24  ;;  %v1318_v29 = vadd.f32 %v2108_v20, %v1279_v25 }
 0x207   : > { %v1201_v30 = vpop.permute.xlu1 %1200  ;;  %v1196_v31 = vpop.permute.xlu0 %1195 }
 0x208   : > { %1351 = vst [vmem:[%s2019_s10 + $0x88] sm:$0xff] %v1319_v28  ;;  %1350 = vst [vmem:[%s2019_s10 + $0x80] sm:$0xff] %v1318_v29  ;;  %v1282_v32 = vmul.f32 %v1201_v30, %v1058_v26  ;;  %v1281_v33 = vmul.f32 %v1196_v31, %v1057_v27 }
 0x20a   : > { %v1321_v36 = vadd.f32 %v2108_v20, %v1282_v32  ;;  %v1320_v37 = vadd.f32 %v2108_v20, %v1281_v33 }
 0x20b   : > { %v1211_v38 = vpop.permute.xlu1 %1210  ;;  %v1206_v39 = vpop.permute.xlu0 %1205 }
 0x20c   : > { %1353 = vst [vmem:[%s2019_s10 + $0x98] sm:$0xff] %v1321_v36  ;;  %1352 = vst [vmem:[%s2019_s10 + $0x90] sm:$0xff] %v1320_v37  ;;  %v1284_v40 = vmul.f32 %v1211_v38, %v1060_v34  ;;  %v1283_v41 = vmul.f32 %v1206_v39, %v1059_v35 }
 0x20e   : > { %v1323_v44 = vadd.f32 %v2108_v20, %v1284_v40  ;;  %v1322_v45 = vadd.f32 %v2108_v20, %v1283_v41 }
 0x20f   : > { %v1221_v46 = vpop.permute.xlu1 %1220  ;;  %v1216_v47 = vpop.permute.xlu0 %1215 }
 0x210   : > { %1355 = vst [vmem:[%s2019_s10 + $0xa8] sm:$0xff] %v1323_v44  ;;  %1354 = vst [vmem:[%s2019_s10 + $0xa0] sm:$0xff] %v1322_v45  ;;  %v1286_v48 = vmul.f32 %v1221_v46, %v1062_v42  ;;  %v1285_v49 = vmul.f32 %v1216_v47, %v1061_v43 }
 0x212   : > { %v1325_v52 = vadd.f32 %v2108_v20, %v1286_v48  ;;  %v1324_v53 = vadd.f32 %v2108_v20, %v1285_v49 }
 0x213   : > { %v1231_v54 = vpop.permute.xlu1 %1230  ;;  %v1226_v55 = vpop.permute.xlu0 %1225 }
 0x214   : > { %1357 = vst [vmem:[%s2019_s10 + $0xb8] sm:$0xff] %v1325_v52  ;;  %1356 = vst [vmem:[%s2019_s10 + $0xb0] sm:$0xff] %v1324_v53  ;;  %v1288_v56 = vmul.f32 %v1231_v54, %v1064_v50  ;;  %v1287_v57 = vmul.f32 %v1226_v55, %v1063_v51 }
 0x216   : > { %v1327_v60 = vadd.f32 %v2108_v20, %v1288_v56  ;;  %v1326_v61 = vadd.f32 %v2108_v20, %v1287_v57 }
 0x217   : > { %v1241_v62 = vpop.permute.xlu1 %1240  ;;  %v1236_v63 = vpop.permute.xlu0 %1235 }
 0x218   : > { %1359 = vst [vmem:[%s2019_s10 + $0xc8] sm:$0xff] %v1327_v60  ;;  %1358 = vst [vmem:[%s2019_s10 + $0xc0] sm:$0xff] %v1326_v61  ;;  %v1290_v0 = vmul.f32 %v1241_v62, %v1066_v58  ;;  %v1289_v1 = vmul.f32 %v1236_v63, %v1065_v59 }
 0x21a   : > { %v1329_v4 = vadd.f32 %v2108_v20, %v1290_v0  ;;  %v1328_v5 = vadd.f32 %v2108_v20, %v1289_v1 }
 0x21b   : > { %v1251_v6 = vpop.permute.xlu1 %1250  ;;  %v1246_v7 = vpop.permute.xlu0 %1245 }
 0x21c   : > { %1361 = vst [vmem:[%s2019_s10 + $0xd8] sm:$0xff] %v1329_v4  ;;  %1360 = vst [vmem:[%s2019_s10 + $0xd0] sm:$0xff] %v1328_v5  ;;  %v1292_v8 = vmul.f32 %v1251_v6, %v1068_v2  ;;  %v1291_v9 = vmul.f32 %v1246_v7, %v1067_v3 }
 0x21e   : > { %v1331_v12 = vadd.f32 %v2108_v20, %v1292_v8  ;;  %v1330_v13 = vadd.f32 %v2108_v20, %v1291_v9 }
 0x21f   : > { %v1261_v14 = vpop.permute.xlu1 %1260  ;;  %v1256_v15 = vpop.permute.xlu0 %1255 }
 0x220   : > { %1363 = vst [vmem:[%s2019_s10 + $0xe8] sm:$0xff] %v1331_v12  ;;  %1362 = vst [vmem:[%s2019_s10 + $0xe0] sm:$0xff] %v1330_v13  ;;  %v1294_v16 = vmul.f32 %v1261_v14, %v1070_v10  ;;  %v1293_v17 = vmul.f32 %v1256_v15, %v1069_v11 }
 0x222   : > { %v1333_v18 = vadd.f32 %v2108_v20, %v1294_v16  ;;  %v1332_v19 = vadd.f32 %v2108_v20, %v1293_v17 }
 0x224   : > { %1365 = vst [vmem:[%s2019_s10 + $0xf8] sm:$0xff] %v1333_v18  ;;  %1364 = vst [vmem:[%s2019_s10 + $0xf0] sm:$0xff] %v1332_v19 }
 0x225 PF: > { %s14_s21 = sadd.s32 1, %s1844_s21   ;;  %s2200_s15 = smov %s1824_s16 }
 0x226   : > { %p11_p0 = scmp.ge.s32.totalorder %s14_s21, 6   ;;  %s2201_s16 = smov %s1924_s28 }
 0x227   : > { %s2202_s17 = smov %s1836_s19  ;;  %s2203_s18 = smov %s1840_s20 }
 0x228   : > { %s2204_s19 = smov %s2207_s22  ;;  %s2205_s20 = smov %s2211_s23 }
 0x229   :  { %13 = sbr.rel (!%p11_p0) target bundleno = 4 (0x4), region = 123 }

</bundles_post_ra>
